<compile_context>
chip_gen: v7x
topology: tpu7x:2x2x1
jax: 0.10.0
libtpu: 0.0.40
codegen_flags: <defaults>
</compile_context>

<pallas_src>
import functools

import jax
import jax.numpy as jnp
from jax import lax
from jax.experimental import pallas as pl
from jax.experimental.pallas import tpu as pltpu


def _vq3_kernel(x_ref, wpe_ref, bpe_ref, gamma_ref, betaln_ref,
                et_ref, e_ref, esq_ref, wue_ref, bue_ref,
                y_ref, loss_ref, ind_ref,
                *, n_e, m_valid, eps):
    tm = x_ref.shape[0]
    x = x_ref[...].astype(jnp.float32)                         # (tm, Pin)

    # ---- patch_emb: Linear(Pin -> e_dim) ----
    h = jnp.dot(x, wpe_ref[...], preferred_element_type=jnp.float32)
    h = h + bpe_ref[...]                                       # (tm, e_dim)

    # ---- LayerNorm over e_dim ----
    mu = jnp.mean(h, axis=-1, keepdims=True)
    hc = h - mu
    var = jnp.mean(hc * hc, axis=-1, keepdims=True)
    z = hc * lax.rsqrt(var + eps)
    z = z * gamma_ref[...] + betaln_ref[...]                   # (tm, e_dim)

    # ---- nearest codebook entry ----
    # full distance is ||z||^2 + ||e||^2 - 2 z.e ; ||z||^2 is constant per row
    # and cannot change the argmin, so it is dropped (saves one lane reduction).
    d = esq_ref[...] - 2.0 * jnp.dot(z, et_ref[...],
                                     preferred_element_type=jnp.float32)  # (tm, n_e)
    dmin = jnp.min(d, axis=-1, keepdims=True)                  # (tm, 1)
    lane = lax.broadcasted_iota(jnp.int32, d.shape, 1)
    # first minimal index (matches torch.argmin tie-break)
    idx = jnp.min(jnp.where(d == dmin, lane, n_e), axis=-1, keepdims=True)  # (tm, 1)
    one_hot = (lane == idx).astype(jnp.float32)                # (tm, n_e)

    # gather as a small MXU matmul: z_q = one_hot @ E
    zq = jnp.dot(one_hot, e_ref[...], preferred_element_type=jnp.float32)  # (tm, e_dim)

    # ---- commitment-loss partial sum (one scalar per tile, masked for padding) ----
    row = lax.broadcasted_iota(jnp.int32, (tm, 1), 0) + pl.program_id(0) * tm
    valid = jnp.where(row < m_valid, 1.0, 0.0)                 # (tm, 1)
    diff = zq - z
    sq_rows = jnp.sum(diff * diff, axis=-1, keepdims=True) * valid  # (tm, 1)
    tile_sq = jnp.sum(sq_rows, axis=0, keepdims=True)          # (1, 1)
    loss_ref[...] = (jnp.zeros((8, 1), jnp.float32) + tile_sq)  # broadcast into 8 rows

    # ---- straight-through (forward value == z_q), then patch_unemb ----
    y = jnp.dot(zq, wue_ref[...], preferred_element_type=jnp.float32)
    y = y + bue_ref[...]                                       # (tm, Pin)
    y_ref[...] = y.astype(y_ref.dtype)
    ind_ref[...] = idx.astype(jnp.int32)


def vector_quantizer3_forward(z, embed_w, w_pe, b_pe, ln_gamma, ln_beta,
                              w_ue, b_ue, *, beta=0.25, patch_size=2,
                              eps=1e-5, tm=512):
    """z: (B, C, H, W).  Returns (z_q (B,C,H,W), loss scalar,
    (None, None, min_encoding_indices (B*L,)))."""
    B, C, H, W = z.shape
    p = patch_size
    assert H % p == 0 and W % p == 0
    n_e, e_dim = embed_w.shape
    Pin = p * p * C
    hp, wp = H // p, W // p
    M = B * hp * wp

    # --- patchify (== F.unfold(kernel=p, stride=p) then transpose) ---
    x = jnp.transpose(z.reshape(B, C, hp, p, wp, p),
                      (0, 2, 4, 1, 3, 5)).reshape(M, Pin)

    # --- tile size: as large as possible, multiple of 8, padded grid ---
    tm = max(8, min(int(tm), M))
    tm -= tm % 8
    num_tiles = -(-M // tm)
    M_pad = num_tiles * tm
    if M_pad != M:
        x = jnp.pad(x, ((0, M_pad - M), (0, 0)))

    # --- weights in kernel-friendly layouts (resident in VMEM) ---
    wpe_t = w_pe.T                                   # (Pin, e_dim)
    bpe_row = b_pe.reshape(1, e_dim)
    gamma_row = ln_gamma.reshape(1, e_dim)
    betaln_row = ln_beta.reshape(1, e_dim)
    e_t = embed_w.T                                  # (e_dim, n_e)
    e_sq = jnp.sum(embed_w * embed_w, axis=1).reshape(1, n_e)
    wue_t = w_ue.T                                   # (e_dim, Pin)
    bue_row = b_ue.reshape(1, Pin)

    kernel = functools.partial(_vq3_kernel, n_e=int(n_e),
                               m_valid=int(M), eps=float(eps))

    y_flat, loss_raw, ind_flat = pl.pallas_call(
        kernel,
        out_shape=(
            jax.ShapeDtypeStruct((M_pad, Pin), jnp.float32),        # unpatch_emb output
            jax.ShapeDtypeStruct((num_tiles * 8, 1), jnp.float32),  # per-tile loss partials
            jax.ShapeDtypeStruct((M_pad, 1), jnp.int32),            # codebook indices
        ),
        grid=(num_tiles,),
        in_specs=[
            pl.BlockSpec((tm, Pin), lambda i: (i, 0)),       # x tile
            pl.BlockSpec((Pin, e_dim), lambda i: (0, 0)),    # patch_emb weight
            pl.BlockSpec((1, e_dim), lambda i: (0, 0)),      # patch_emb bias
            pl.BlockSpec((1, e_dim), lambda i: (0, 0)),      # LayerNorm gamma
            pl.BlockSpec((1, e_dim), lambda i: (0, 0)),      # LayerNorm beta
            pl.BlockSpec((e_dim, n_e), lambda i: (0, 0)),    # codebook^T (for distances)
            pl.BlockSpec((n_e, e_dim), lambda i: (0, 0)),    # codebook   (for gather)
            pl.BlockSpec((1, n_e), lambda i: (0, 0)),        # ||e||^2 row
            pl.BlockSpec((e_dim, Pin), lambda i: (0, 0)),    # patch_unemb weight
            pl.BlockSpec((1, Pin), lambda i: (0, 0)),        # patch_unemb bias
        ],
        out_specs=(
            pl.BlockSpec((tm, Pin), lambda i: (i, 0)),
            pl.BlockSpec((8, 1), lambda i: (i, 0)),
            pl.BlockSpec((tm, 1), lambda i: (i, 0)),
        ),
        compiler_params=pltpu.CompilerParams(
            dimension_semantics=("parallel",)),
    )(x, wpe_t, bpe_row, gamma_row, betaln_row, e_t, embed_w, e_sq,
      wue_t, bue_row)

    # --- unpatchify (== patch_unemb already applied; F.fold(kernel=p, stride=p)) ---
    y = y_flat[:M]
    z_q = jnp.transpose(y.reshape(B, hp, wp, C, p, p),
                        (0, 3, 1, 4, 2, 5)).reshape(B, C, H, W)

    # --- loss (legacy=True): mean((zq-z)^2) + beta*mean((zq-z)^2) in fwd value ---
    total_sq = jnp.sum(loss_raw[0::8, 0])
    mse = total_sq / (M * e_dim)
    loss = mse + beta * mse

    # TODO(synk): remap/`used` re-indexing and int64 indices not implemented
    # (remap=None path, sane_index_shape=False); indices returned as int32 (B*L,).
    indices = ind_flat[:M, 0]
    perplexity, min_encodings = None, None
    return z_q, loss, (perplexity, min_encodings, indices)


if __name__ == "__main__":
    # Module hyperparameters (small, TPU-friendly: Pin = p*p*in_c = 128 lanes)
    in_c = 32
    n_e = 512
    e_dim = 64
    beta = 0.25
    patch_size = 2

    B, H, W = 2, 32, 32

    key = jax.random.PRNGKey(0)
    k_z, k_e, k_wpe, k_bpe, k_wue, k_bue = jax.random.split(key, 6)

    Pin = patch_size * patch_size * in_c
    z = jax.random.normal(k_z, (B, in_c, H, W), jnp.float32)

    # nn.Embedding(n_e, e_dim).weight.uniform_(-1/n_e, 1/n_e)
    embed_w = jax.random.uniform(k_e, (n_e, e_dim), jnp.float32,
                                 -1.0 / n_e, 1.0 / n_e)
    # nn.Linear(Pin, e_dim)
    w_pe = jax.random.normal(k_wpe, (e_dim, Pin), jnp.float32) * 0.02
    b_pe = jax.random.normal(k_bpe, (e_dim,), jnp.float32) * 0.01
    # nn.LayerNorm(e_dim) default init
    ln_gamma = jnp.ones((e_dim,), jnp.float32)
    ln_beta = jnp.zeros((e_dim,), jnp.float32)
    # nn.Linear(e_dim, Pin)
    w_ue = jax.random.normal(k_wue, (Pin, e_dim), jnp.float32) * 0.02
    b_ue = jax.random.normal(k_bue, (Pin,), jnp.float32) * 0.01

    # tm=256 here so the small demo still exercises a multi-step grid;
    # for production-sized inputs use the default tm=512 (or larger).
    z_q, loss, (perplexity, min_encodings, ind) = vector_quantizer3_forward(
        z, embed_w, w_pe, b_pe, ln_gamma, ln_beta, w_ue, b_ue,
        beta=beta, patch_size=patch_size, tm=256)
    jax.block_until_ready((z_q, loss, ind))

    L = (H // patch_size) * (W // patch_size)
    assert z_q.shape == (B, in_c, H, W)
    assert loss.shape == ()
    assert ind.shape == (B * L,)
    assert bool(jnp.isfinite(loss))
    assert bool(jnp.all(ind >= 0)) and bool(jnp.all(ind < n_e))
    print("KERNEL_OK")
</pallas_src>

<mosaic_0001>
module attributes {stable_mosaic.version = 11 : i64} {
  func.func @_vq3_kernel(%arg0: i32, %arg1: memref<256x128xf32, #tpu.memory_space<vmem>>, %arg2: memref<128x64xf32, #tpu.memory_space<vmem>>, %arg3: memref<1x64xf32, #tpu.memory_space<vmem>>, %arg4: memref<1x64xf32, #tpu.memory_space<vmem>>, %arg5: memref<1x64xf32, #tpu.memory_space<vmem>>, %arg6: memref<64x512xf32, #tpu.memory_space<vmem>>, %arg7: memref<512x64xf32, #tpu.memory_space<vmem>>, %arg8: memref<1x512xf32, #tpu.memory_space<vmem>>, %arg9: memref<64x128xf32, #tpu.memory_space<vmem>>, %arg10: memref<1x128xf32, #tpu.memory_space<vmem>>, %arg11: memref<256x128xf32, #tpu.memory_space<vmem>>, %arg12: memref<8x1xf32, #tpu.memory_space<vmem>>, %arg13: memref<256x1xi32, #tpu.memory_space<vmem>>) attributes {dimension_semantics = [#tpu.dimension_semantics<parallel>], iteration_bounds = array<i64: 2>, scalar_prefetch = 0 : i64, scratch_operands = 0 : i64, tpu.core_type = #tpu.core_type<tc>, window_params = [{transform_indices = @transform_0, window_bounds = array<i64: 256, 128>}, {pipeline_mode = #tpu.pipeline_mode<synchronous>, transform_indices = @transform_1, window_bounds = array<i64: 128, 64>}, {pipeline_mode = #tpu.pipeline_mode<synchronous>, transform_indices = @transform_2, window_bounds = array<i64: 1, 64>}, {pipeline_mode = #tpu.pipeline_mode<synchronous>, transform_indices = @transform_3, window_bounds = array<i64: 1, 64>}, {pipeline_mode = #tpu.pipeline_mode<synchronous>, transform_indices = @transform_4, window_bounds = array<i64: 1, 64>}, {pipeline_mode = #tpu.pipeline_mode<synchronous>, transform_indices = @transform_5, window_bounds = array<i64: 64, 512>}, {pipeline_mode = #tpu.pipeline_mode<synchronous>, transform_indices = @transform_6, window_bounds = array<i64: 512, 64>}, {pipeline_mode = #tpu.pipeline_mode<synchronous>, transform_indices = @transform_7, window_bounds = array<i64: 1, 512>}, {pipeline_mode = #tpu.pipeline_mode<synchronous>, transform_indices = @transform_8, window_bounds = array<i64: 64, 128>}, {pipeline_mode = #tpu.pipeline_mode<synchronous>, transform_indices = @transform_9, window_bounds = array<i64: 1, 128>}, {transform_indices = @transform_10, window_bounds = array<i64: 256, 128>}, {transform_indices = @transform_11, window_bounds = array<i64: 8, 1>}, {transform_indices = @transform_12, window_bounds = array<i64: 256, 1>}]} {
    %c0 = arith.constant 0 : index
    %c0_0 = arith.constant 0 : index
    %0 = vector.load %arg1[%c0, %c0_0] : memref<256x128xf32, #tpu.memory_space<vmem>>, vector<256x128xf32>
    %c0_1 = arith.constant 0 : index
    %c0_2 = arith.constant 0 : index
    %1 = vector.load %arg2[%c0_1, %c0_2] : memref<128x64xf32, #tpu.memory_space<vmem>>, vector<128x64xf32>
    %cst = arith.constant dense<0.000000e+00> : vector<256x64xf32>
    %2 = tpu.matmul %0, %1, %cst {dimension_numbers = #tpu.dot_dimension_numbers<[1], [0], [0], [1], [0, 0, 1, 1], [], []>} : vector<256x128xf32>, vector<128x64xf32>, vector<256x64xf32> -> vector<256x64xf32>
    %c0_3 = arith.constant 0 : index
    %c0_4 = arith.constant 0 : index
    %3 = vector.load %arg3[%c0_3, %c0_4] : memref<1x64xf32, #tpu.memory_space<vmem>>, vector<1x64xf32>
    %4 = vector.broadcast %3 : vector<1x64xf32> to vector<256x64xf32>
    %5 = arith.addf %2, %4 : vector<256x64xf32>
    %cst_5 = arith.constant dense<0.000000e+00> : vector<256xf32>
    %6 = vector.multi_reduction <add>, %5, %cst_5 [1] : vector<256x64xf32> to vector<256xf32>
    %7 = vector.shape_cast %6 : vector<256xf32> to vector<256x1xf32>
    %cst_6 = arith.constant 6.400000e+01 : f32
    %8 = vector.broadcast %cst_6 : f32 to vector<256x1xf32>
    %9 = arith.divf %7, %8 : vector<256x1xf32>
    %10 = vector.broadcast %9 : vector<256x1xf32> to vector<256x64xf32>
    %11 = arith.subf %5, %10 : vector<256x64xf32>
    %12 = arith.mulf %11, %11 : vector<256x64xf32>
    %cst_7 = arith.constant dense<0.000000e+00> : vector<256xf32>
    %13 = vector.multi_reduction <add>, %12, %cst_7 [1] : vector<256x64xf32> to vector<256xf32>
    %14 = vector.shape_cast %13 : vector<256xf32> to vector<256x1xf32>
    %cst_8 = arith.constant 6.400000e+01 : f32
    %15 = vector.broadcast %cst_8 : f32 to vector<256x1xf32>
    %16 = arith.divf %14, %15 : vector<256x1xf32>
    %cst_9 = arith.constant 9.99999974E-6 : f32
    %17 = vector.broadcast %cst_9 : f32 to vector<256x1xf32>
    %18 = arith.addf %16, %17 : vector<256x1xf32>
    %19 = math.rsqrt %18 : vector<256x1xf32>
    %20 = vector.broadcast %19 : vector<256x1xf32> to vector<256x64xf32>
    %21 = arith.mulf %11, %20 : vector<256x64xf32>
    %c0_10 = arith.constant 0 : index
    %c0_11 = arith.constant 0 : index
    %22 = vector.load %arg4[%c0_10, %c0_11] : memref<1x64xf32, #tpu.memory_space<vmem>>, vector<1x64xf32>
    %23 = vector.broadcast %22 : vector<1x64xf32> to vector<256x64xf32>
    %24 = arith.mulf %21, %23 : vector<256x64xf32>
    %c0_12 = arith.constant 0 : index
    %c0_13 = arith.constant 0 : index
    %25 = vector.load %arg5[%c0_12, %c0_13] : memref<1x64xf32, #tpu.memory_space<vmem>>, vector<1x64xf32>
    %26 = vector.broadcast %25 : vector<1x64xf32> to vector<256x64xf32>
    %27 = arith.addf %24, %26 : vector<256x64xf32>
    %c0_14 = arith.constant 0 : index
    %c0_15 = arith.constant 0 : index
    %28 = vector.load %arg8[%c0_14, %c0_15] : memref<1x512xf32, #tpu.memory_space<vmem>>, vector<1x512xf32>
    %c0_16 = arith.constant 0 : index
    %c0_17 = arith.constant 0 : index
    %29 = vector.load %arg6[%c0_16, %c0_17] : memref<64x512xf32, #tpu.memory_space<vmem>>, vector<64x512xf32>
    %cst_18 = arith.constant dense<0.000000e+00> : vector<256x512xf32>
    %30 = tpu.matmul %27, %29, %cst_18 {dimension_numbers = #tpu.dot_dimension_numbers<[1], [0], [0], [1], [0, 0, 1, 1], [], []>} : vector<256x64xf32>, vector<64x512xf32>, vector<256x512xf32> -> vector<256x512xf32>
    %cst_19 = arith.constant 2.000000e+00 : f32
    %31 = vector.broadcast %cst_19 : f32 to vector<256x512xf32>
    %32 = arith.mulf %31, %30 : vector<256x512xf32>
    %33 = vector.broadcast %28 : vector<1x512xf32> to vector<256x512xf32>
    %34 = arith.subf %33, %32 : vector<256x512xf32>
    %cst_20 = arith.constant dense<0x7F800000> : vector<256xf32>
    %35 = vector.multi_reduction <minimumf>, %34, %cst_20 [1] : vector<256x512xf32> to vector<256xf32>
    %36 = vector.shape_cast %35 : vector<256xf32> to vector<256x1xf32>
    %37 = tpu.iota {dimensions = array<i32: 1>} : vector<256x512xi32>
    %38 = vector.broadcast %36 : vector<256x1xf32> to vector<256x512xf32>
    %39 = arith.cmpf oeq, %34, %38 : vector<256x512xf32>
    %c512_i32 = arith.constant 512 : i32
    %40 = vector.broadcast %c512_i32 : i32 to vector<256x512xi32>
    %41 = arith.select %39, %37, %40 : vector<256x512xi1>, vector<256x512xi32>
    %cst_21 = arith.constant dense<2147483647> : vector<256xi32>
    %42 = vector.multi_reduction <minsi>, %41, %cst_21 [1] : vector<256x512xi32> to vector<256xi32>
    %43 = vector.shape_cast %42 : vector<256xi32> to vector<256x1xi32>
    %44 = vector.broadcast %43 : vector<256x1xi32> to vector<256x512xi32>
    %45 = arith.cmpi eq, %37, %44 : vector<256x512xi32>
    %46 = arith.extui %45 : vector<256x512xi1> to vector<256x512xi32>
    %47 = arith.sitofp %46 : vector<256x512xi32> to vector<256x512xf32>
    %c0_22 = arith.constant 0 : index
    %c0_23 = arith.constant 0 : index
    %48 = vector.load %arg7[%c0_22, %c0_23] : memref<512x64xf32, #tpu.memory_space<vmem>>, vector<512x64xf32>
    %cst_24 = arith.constant dense<0.000000e+00> : vector<256x64xf32>
    %49 = tpu.matmul %47, %48, %cst_24 {dimension_numbers = #tpu.dot_dimension_numbers<[1], [0], [0], [1], [0, 0, 1, 1], [], []>} : vector<256x512xf32>, vector<512x64xf32>, vector<256x64xf32> -> vector<256x64xf32>
    %50 = tpu.iota {dimensions = array<i32: 0>} : vector<256x1xi32>
    %c256_i32 = arith.constant 256 : i32
    %51 = arith.muli %arg0, %c256_i32 : i32
    %52 = vector.broadcast %51 : i32 to vector<256x1xi32>
    %53 = arith.addi %50, %52 : vector<256x1xi32>
    %c512_i32_25 = arith.constant 512 : i32
    %54 = vector.broadcast %c512_i32_25 : i32 to vector<256x1xi32>
    %55 = arith.cmpi slt, %53, %54 : vector<256x1xi32>
    %cst_26 = arith.constant 1.000000e+00 : f32
    %cst_27 = arith.constant 0.000000e+00 : f32
    %56 = vector.broadcast %cst_26 : f32 to vector<256x1xf32>
    %57 = vector.broadcast %cst_27 : f32 to vector<256x1xf32>
    %58 = arith.select %55, %56, %57 : vector<256x1xi1>, vector<256x1xf32>
    %59 = arith.subf %49, %27 : vector<256x64xf32>
    %60 = arith.mulf %59, %59 : vector<256x64xf32>
    %cst_28 = arith.constant dense<0.000000e+00> : vector<256xf32>
    %61 = vector.multi_reduction <add>, %60, %cst_28 [1] : vector<256x64xf32> to vector<256xf32>
    %62 = vector.shape_cast %61 : vector<256xf32> to vector<256x1xf32>
    %63 = arith.mulf %62, %58 : vector<256x1xf32>
    %cst_29 = arith.constant dense<0.000000e+00> : vector<1xf32>
    %64 = vector.multi_reduction <add>, %63, %cst_29 [0] : vector<256x1xf32> to vector<1xf32>
    %65 = vector.shape_cast %64 : vector<1xf32> to vector<1x1xf32>
    %cst_30 = arith.constant 0.000000e+00 : f32
    %66 = vector.broadcast %cst_30 : f32 to vector<8x1xf32>
    %67 = vector.broadcast %65 : vector<1x1xf32> to vector<8x1xf32>
    %68 = arith.addf %66, %67 : vector<8x1xf32>
    %c0_31 = arith.constant 0 : index
    %c0_32 = arith.constant 0 : index
    %69 = vector.load %arg12[%c0_31, %c0_32] : memref<8x1xf32, #tpu.memory_space<vmem>>, vector<8x1xf32>
    tpu.vector_store %arg12[%c0_31, %c0_32], %68 {strides = array<i32>} : memref<8x1xf32, #tpu.memory_space<vmem>>, vector<8x1xf32>,
    %c0_33 = arith.constant 0 : index
    %c0_34 = arith.constant 0 : index
    %70 = vector.load %arg9[%c0_33, %c0_34] : memref<64x128xf32, #tpu.memory_space<vmem>>, vector<64x128xf32>
    %cst_35 = arith.constant dense<0.000000e+00> : vector<256x128xf32>
    %71 = tpu.matmul %49, %70, %cst_35 {dimension_numbers = #tpu.dot_dimension_numbers<[1], [0], [0], [1], [0, 0, 1, 1], [], []>} : vector<256x64xf32>, vector<64x128xf32>, vector<256x128xf32> -> vector<256x128xf32>
    %c0_36 = arith.constant 0 : index
    %c0_37 = arith.constant 0 : index
    %72 = vector.load %arg10[%c0_36, %c0_37] : memref<1x128xf32, #tpu.memory_space<vmem>>, vector<1x128xf32>
    %73 = vector.broadcast %72 : vector<1x128xf32> to vector<256x128xf32>
    %74 = arith.addf %71, %73 : vector<256x128xf32>
    %c0_38 = arith.constant 0 : index
    %c0_39 = arith.constant 0 : index
    %75 = vector.load %arg11[%c0_38, %c0_39] : memref<256x128xf32, #tpu.memory_space<vmem>>, vector<256x128xf32>
    tpu.vector_store %arg11[%c0_38, %c0_39], %74 {strides = array<i32>} : memref<256x128xf32, #tpu.memory_space<vmem>>, vector<256x128xf32>,
    %c0_40 = arith.constant 0 : index
    %c0_41 = arith.constant 0 : index
    %76 = vector.load %arg13[%c0_40, %c0_41] : memref<256x1xi32, #tpu.memory_space<vmem>>, vector<256x1xi32>
    tpu.vector_store %arg13[%c0_40, %c0_41], %43 {strides = array<i32>} : memref<256x1xi32, #tpu.memory_space<vmem>>, vector<256x1xi32>,
    return
  }
  func.func @transform_0(%arg0: i32) -> (i32, i32) {
    %c0_i32 = arith.constant 0 : i32
    %c0_i32_0 = arith.constant 0 : i32
    return %arg0, %c0_i32 : i32, i32
  }
  func.func @transform_1(%arg0: i32) -> (i32, i32) {
    %c0_i32 = arith.constant 0 : i32
    %c0_i32_0 = arith.constant 0 : i32
    %c0_i32_1 = arith.constant 0 : i32
    return %c0_i32, %c0_i32_0 : i32, i32
  }
  func.func @transform_2(%arg0: i32) -> (i32, i32) {
    %c0_i32 = arith.constant 0 : i32
    %c0_i32_0 = arith.constant 0 : i32
    %c0_i32_1 = arith.constant 0 : i32
    return %c0_i32, %c0_i32_0 : i32, i32
  }
  func.func @transform_3(%arg0: i32) -> (i32, i32) {
    %c0_i32 = arith.constant 0 : i32
    %c0_i32_0 = arith.constant 0 : i32
    %c0_i32_1 = arith.constant 0 : i32
    return %c0_i32, %c0_i32_0 : i32, i32
  }
  func.func @transform_4(%arg0: i32) -> (i32, i32) {
    %c0_i32 = arith.constant 0 : i32
    %c0_i32_0 = arith.constant 0 : i32
    %c0_i32_1 = arith.constant 0 : i32
    return %c0_i32, %c0_i32_0 : i32, i32
  }
  func.func @transform_5(%arg0: i32) -> (i32, i32) {
    %c0_i32 = arith.constant 0 : i32
    %c0_i32_0 = arith.constant 0 : i32
    %c0_i32_1 = arith.constant 0 : i32
    return %c0_i32, %c0_i32_0 : i32, i32
  }
  func.func @transform_6(%arg0: i32) -> (i32, i32) {
    %c0_i32 = arith.constant 0 : i32
    %c0_i32_0 = arith.constant 0 : i32
    %c0_i32_1 = arith.constant 0 : i32
    return %c0_i32, %c0_i32_0 : i32, i32
  }
  func.func @transform_7(%arg0: i32) -> (i32, i32) {
    %c0_i32 = arith.constant 0 : i32
    %c0_i32_0 = arith.constant 0 : i32
    %c0_i32_1 = arith.constant 0 : i32
    return %c0_i32, %c0_i32_0 : i32, i32
  }
  func.func @transform_8(%arg0: i32) -> (i32, i32) {
    %c0_i32 = arith.constant 0 : i32
    %c0_i32_0 = arith.constant 0 : i32
    %c0_i32_1 = arith.constant 0 : i32
    return %c0_i32, %c0_i32_0 : i32, i32
  }
  func.func @transform_9(%arg0: i32) -> (i32, i32) {
    %c0_i32 = arith.constant 0 : i32
    %c0_i32_0 = arith.constant 0 : i32
    %c0_i32_1 = arith.constant 0 : i32
    return %c0_i32, %c0_i32_0 : i32, i32
  }
  func.func @transform_10(%arg0: i32) -> (i32, i32) {
    %c0_i32 = arith.constant 0 : i32
    %c0_i32_0 = arith.constant 0 : i32
    return %arg0, %c0_i32 : i32, i32
  }
  func.func @transform_11(%arg0: i32) -> (i32, i32) {
    %c0_i32 = arith.constant 0 : i32
    %c0_i32_0 = arith.constant 0 : i32
    return %arg0, %c0_i32 : i32, i32
  }
  func.func @transform_12(%arg0: i32) -> (i32, i32) {
    %c0_i32 = arith.constant 0 : i32
    %c0_i32_0 = arith.constant 0 : i32
    return %arg0, %c0_i32 : i32, i32
  }
}

</mosaic_0001>

<bundles_post_ra>
// kernel: tpu_custom_call.1
= control target key start
LH: loop header
LB: loop body
LE: loop exit
PB: predicated region body
PF: predicated region fallthrough
CT: control target
= control target key end

     0   :  { %18 = vsyncpa [#allocation3], 0  ;;  %s9774_s0 = inlined_call_operand.vmem [shape: f32[512,128], index: 0, kind: input, shape index: {}]   ;;  %s9775_s1 = inlined_call_operand.vmem [shape: f32[128,64], index: 1, kind: input, shape index: {}]   ;;  %s9776_s2 = inlined_call_operand.vmem [shape: f32[1,64], index: 2, kind: input, shape index: {}]   ;;  %s9777_s3 = inlined_call_operand.vmem [shape: f32[1,64], index: 3, kind: input, shape index: {}]   ;;  %s9778_s4 = inlined_call_operand.vmem [shape: f32[1,64], index: 4, kind: input, shape index: {}]   ;;  %s9779_s5 = inlined_call_operand.vmem [shape: f32[64,512], index: 5, kind: input, shape index: {}]   ;;  %s9780_s6 = inlined_call_operand.vmem [shape: f32[512,64], index: 6, kind: input, shape index: {}]   ;;  %s9781_s7 = inlined_call_operand.vmem [shape: f32[1,512], index: 7, kind: input, shape index: {}]   ;;  %s9782_s8 = inlined_call_operand.vmem [shape: f32[64,128], index: 8, kind: input, shape index: {}]   ;;  %s9783_s9 = inlined_call_operand.vmem [shape: f32[1,128], index: 9, kind: input, shape index: {}]   ;;  %s9784_s10 = inlined_call_operand.hbm [shape: f32[512,128], index: 10, kind: output, shape index: {0}]   ;;  %s9785_s11 = inlined_call_operand.vmem [shape: f32[16,1], index: 11, kind: output, shape index: {1}]   ;;  %s9786_s12 = inlined_call_operand.vmem [shape: s32[512,1], index: 12, kind: output, shape index: {2}]  }
   0x1   :  { %20 = vsyncpa [#allocation3 + $0x1], 0  ;;  %s6094_s21 = smov 0   ;;  %s6096_s22 = smov 0  }
   0x2   :  { %s6098_s23 = smov 0   ;;  %s6100_s24 = smov 0  }
   0x3 LB: > { %9956 = sst [smem:[#allocation5_spill]] %s6017_s23  ;;  %s6115_s25 = sadd.s32 4294967295, %s6021_s24   ;;  %s6021_s24 = sphi %s6100_s24, %s10249_s24   ;;  %s6017_s23 = sphi %s6098_s23, %s10246_s23   ;;  %s6013_s22 = sphi %s6096_s22, %s10248_s22   ;;  %s6009_s21 = sphi %s6094_s21, %s10247_s21  }
   0x4   : > { %s4998_s26 = sadd.s32 4294967294, %s6021_s24   ;;  %s6119_s27 = sadd.s32 1, %s6021_s24  }
   0x5   : > { %s248_s28 = sadd.s32 1, %s6017_s23  ;;  %s245_s29 = ssub.s32 %s6021_s24, %s6119_s27 }
   0x6   : > { %p258_p0 = scmp.ne.s32.totalorder %s6017_s23, %s6013_s22  ;;  %p246_p1 = scmp.eq.s32.totalorder %s245_s29, 0 }
   0x7   : > { %p259_p2 = scmp.eq.s32.totalorder %s6115_s25, 1  ;;  %p264_p3 = scmp.ne.s32.totalorder %s6013_s22, %s6009_s21 }
   0x8   : > { %p265_p4 = scmp.eq.s32.totalorder %s4998_s26, 1  ;;  %p5001_p7 = scmp.ge.s32.totalorder %s6021_s24, 1 }
   0x9   : > { %s6130_s30 = scalar_select %p246_p1, %s6017_s23, %s248_s28  }
   0xa   : > { %p6132_p5 = por %p259_p2, %p258_p0  ;;  %p6136_p6 = por %p265_p4, %p264_p3 }
   0xb   : > { %9957 = sst [smem:[#allocation6_spill]] %s6130_s30  ;;  %p371_p8 = scmp.lt.s32.totalorder %s6021_s24, 3 }
   0xd   : > { %p372_p9 = pnand %p5001_p7, %p371_p8 }
   0xf   : > { %375 = sbr.rel (%p372_p9) target bundleno = 2079 (0x81f), region = 60 }
  0x16   : > { %v471_v0 = vld [vmem:[%s9775_s1] sm:$0xff]  ;;  %v472_v1 = vld [vmem:[%s9775_s1 + $0x8] sm:$0xff]  ;;  %v473_v2 = vld [vmem:[%s9775_s1 + $0x10] sm:$0xff]  ;;  %s5003_s26 = sshll.u32 %s6115_s25, 5  ;;  %vm719_vm0 = vcmask 523264   ;;  %s5331_s16 = sshll.u32 %s6115_s25, 8 }
  0x17   : > { %v5603_v3 = vpack.c.bf16 %v472_v1, %v471_v0  ;;  %v474_v4 = vld [vmem:[%s9775_s1 + $0x18] sm:$0xff]  ;;  %p423_p10 = scmp.lt.s32.totalorder %s5003_s26, 63  ;;  %v475_v6 = vld [vmem:[%s9775_s1 + $0x20] sm:$0xff]  ;;  %v476_v7 = vld [vmem:[%s9775_s1 + $0x28] sm:$0xff]  ;;  %p429_p11 = scmp.lt.s32.totalorder %s6115_s25, 1 }
  0x18   : > { %v5607_v5 = vpack.c.bf16 %v474_v4, %v473_v2  ;;  %v5611_v8 = vpack.c.bf16 %v476_v7, %v475_v6  ;;  %v477_v9 = vld [vmem:[%s9775_s1 + $0x30] sm:$0xff]  ;;  %v478_v10 = vld [vmem:[%s9775_s1 + $0x38] sm:$0xff]  ;;  %v479_v13 = vld [vmem:[%s9775_s1 + $0x40] sm:$0xff]  ;;  %s6026_s28 = smov [#allocation2]  }
  0x19   : > { %5604 = vmatprep.subr.bf16.mxu0 %v5603_v3  ;;  %s10251_s26 = smov (!%p423_p10, %s5003_s26), 63  ;;  %v5615_v12 = vpack.c.bf16 %v478_v10, %v477_v9  ;;  %v480_v14 = vld [vmem:[%s9775_s1 + $0x48] sm:$0xff]  ;;  %v481_v16 = vld [vmem:[%s9775_s1 + $0x50] sm:$0xff]  ;;  %v482_v17 = vld [vmem:[%s9775_s1 + $0x58] sm:$0xff]  ;;  %s5963_s15 = sshll.u32 %s6026_s28, 4  ;;  %s5964_s15 = int_to_ptr.vmem [resolvable:$false] %s5963_s15 }
  0x1a   : > { %5606 = vmatpush3.bf16.msra.mxu0 %v5603_v3  ;;  %s9788_s17 = sshll.u32 %s10251_s26, 3  ;;  %v5619_v15 = vpack.c.bf16 %v480_v14, %v479_v13  ;;  %v5623_v18 = vpack.c.bf16 %v482_v17, %v481_v16  ;;  %v483_v19 = vld [vmem:[%s9775_s1 + $0x60] sm:$0xff]  ;;  %v484_v20 = vld [vmem:[%s9775_s1 + $0x68] sm:$0xff]  ;;  %v485_v22 = vld [vmem:[%s9775_s1 + $0x70] sm:$0xff]  ;;  %s10210_s19 = sshll.u32 %s10251_s26, 3 }
  0x1b   : > { %5608 = vmatprep.subr.bf16.mxu0 %v5607_v5  ;;  %s6175_s29 = scalar_lea.vmem %s9774_s0, %s9788_s17  ;;  %v5627_v21 = vpack.c.bf16 %v484_v20, %v483_v19  ;;  %v486_v23 = vld [vmem:[%s9775_s1 + $0x78] sm:$0xff]  ;;  %v6236_v56 = vld [vmem:[%s9776_s2] ss:$0 sm:$0xff]  ;;  %s8697_s23 = scalar_lea.vmem %s9786_s12, %s10210_s19 }
  0x1c   : > { %v439_v11 = vld [vmem:[%s6175_s29] sm:$0xff]  ;;  %v5631_v24 = vpack.c.bf16 %v486_v23, %v485_v22  ;;  %v440_v25 = vld [vmem:[%s6175_s29 + $0x8] sm:$0xff]  ;;  %v441_v26 = vld [vmem:[%s6175_s29 + $0x10] sm:$0xff]  ;;  %s430_s26 = scalar_select %p429_p11, %s6115_s25, 1 }
  0x1d   : > { %5491 = vmatprep.mubr.f32.mxu0 %v439_v11  ;;  %v442_v27 = vld [vmem:[%s6175_s29 + $0x18] sm:$0xff]  ;;  %v443_v28 = vld [vmem:[%s6175_s29 + $0x20] sm:$0xff]  ;;  %v444_v29 = vld [vmem:[%s6175_s29 + $0x28] sm:$0xff] }
  0x1e   : > { %5610 = vmatpush3.bf16.msra.mxu0 %v5607_v5  ;;  %v445_v30 = vld [vmem:[%s6175_s29 + $0x30] sm:$0xff]  ;;  %v446_v31 = vld [vmem:[%s6175_s29 + $0x38] sm:$0xff]  ;;  %v447_v32 = vld [vmem:[%s6175_s29 + $0x40] sm:$0xff]  ;;  %s5005_s17 = sshll.u32 %s430_s26, 3 }
  0x1f   : > { %5612 = vmatprep.subr.bf16.mxu0 %v5611_v8  ;;  %v448_v33 = vld [vmem:[%s6175_s29 + $0x48] sm:$0xff]  ;;  %v449_v34 = vld [vmem:[%s6175_s29 + $0x50] sm:$0xff]  ;;  %v450_v35 = vld [vmem:[%s6175_s29 + $0x58] sm:$0xff] }
  0x20   : > { %v451_v36 = vld [vmem:[%s6175_s29 + $0x60] sm:$0xff]  ;;  %v452_v37 = vld [vmem:[%s6175_s29 + $0x68] sm:$0xff]  ;;  %v453_v38 = vld [vmem:[%s6175_s29 + $0x70] sm:$0xff] }
  0x21   : > { %v454_v39 = vld [vmem:[%s6175_s29 + $0x78] sm:$0xff]  ;;  %v455_v40 = vld [vmem:[%s6175_s29 + $0x80] sm:$0xff]  ;;  %v456_v41 = vld [vmem:[%s6175_s29 + $0x88] sm:$0xff] }
  0x22   : > { %5614 = vmatpush3.bf16.msra.mxu0 %v5611_v8  ;;  %v457_v42 = vld [vmem:[%s6175_s29 + $0x90] sm:$0xff]  ;;  %v458_v43 = vld [vmem:[%s6175_s29 + $0x98] sm:$0xff]  ;;  %v459_v44 = vld [vmem:[%s6175_s29 + $0xa0] sm:$0xff] }
  0x23   : > { %5616 = vmatprep.subr.bf16.mxu0 %v5615_v12  ;;  %v460_v45 = vld [vmem:[%s6175_s29 + $0xa8] sm:$0xff]  ;;  %v461_v46 = vld [vmem:[%s6175_s29 + $0xb0] sm:$0xff]  ;;  %v462_v47 = vld [vmem:[%s6175_s29 + $0xb8] sm:$0xff] }
  0x24   : > { %v463_v48 = vld [vmem:[%s6175_s29 + $0xc0] sm:$0xff]  ;;  %v464_v49 = vld [vmem:[%s6175_s29 + $0xc8] sm:$0xff]  ;;  %v465_v50 = vld [vmem:[%s6175_s29 + $0xd0] sm:$0xff] }
  0x25   : > { %v466_v51 = vld [vmem:[%s6175_s29 + $0xd8] sm:$0xff]  ;;  %v467_v52 = vld [vmem:[%s6175_s29 + $0xe0] sm:$0xff]  ;;  %v468_v53 = vld [vmem:[%s6175_s29 + $0xe8] sm:$0xff] }
  0x26   : > { %5618 = vmatpush3.bf16.msra.mxu0 %v5615_v12  ;;  %v469_v54 = vld [vmem:[%s6175_s29 + $0xf0] sm:$0xff]  ;;  %v470_v55 = vld [vmem:[%s6175_s29 + $0xf8] sm:$0xff]  ;;  %s406_s29 = sand.u32 1, %s6013_s22  }
  0x27   : > { %5620 = vmatprep.subr.bf16.mxu0 %v5619_v15  ;;  %s5002_s18 = sshll.u32 %s406_s29, 8 }
  0x28   : > { %s9583_s30 = scalar_lea.vmem [#allocation2], %s5002_s18 }
  0x29   : > { %s4880_s18 = sshll.u32 %s9583_s30, 4  ;;  %s9726_s18 = int_to_ptr.vmem [resolvable:$true] %s4880_s18 }
  0x2a   : > { %5622 = vmatpush3.bf16.msra.mxu0 %v5619_v15  ;;  %p5966_p1 = scmp.lt.s32.totalorder %s9726_s18, %s5964_s15 }
  0x2b   : > { %5624 = vmatprep.subr.bf16.mxu0 %v5623_v18 }
  0x2e   : > { %5626 = vmatpush3.bf16.msra.mxu0 %v5623_v18 }
  0x2f   : > { %5628 = vmatprep.subr.bf16.mxu0 %v5627_v21 }
  0x32   : > { %5630 = vmatpush3.bf16.msra.mxu0 %v5627_v21 }
  0x33   : > { %5632 = vmatprep.subr.bf16.mxu0 %v5631_v24 }
  0x36   : > { %5634 = vmatpush3.bf16.msra.mxu0 %v5631_v24 }
  0x39   : > { %5492 = vmatmul.mubr.f32.vlgmr.msra.gmra.mrb[0].mxu0 %v440_v25 }
  0x3a   : > { %5494 = vmatprep.mubr.f32.mxu0 %v441_v26 }
  0x3d   : > { %5495 = vmatmul.mubr.f32.gmra.mrb[2].mxu0 %v442_v27 }
  0x3e   : > { %5497 = vmatprep.mubr.f32.mxu0 %v443_v28 }
  0x41   : > { %5498 = vmatmul.mubr.f32.gmra.mrb[4].mxu0 %v444_v29 }
  0x42   : > { %5500 = vmatprep.mubr.f32.mxu0 %v445_v30 }
  0x45   : > { %5501 = vmatmul.mubr.f32.gmra.mrb[6].mxu0 %v446_v31 }
  0x46   : > { %5503 = vmatprep.mubr.f32.mxu0 %v447_v32 }
  0x49   : > { %5504 = vmatmul.mubr.f32.gmra.mrb[8].mxu0 %v448_v33 }
  0x4a   : > { %5506 = vmatprep.mubr.f32.mxu0 %v449_v34 }
  0x4d   : > { %5507 = vmatmul.mubr.f32.gmra.mrb[10].mxu0 %v450_v35 }
  0x4e   : > { %5509 = vmatprep.mubr.f32.mxu0 %v451_v36 }
  0x51   : > { %5510 = vmatmul.mubr.f32.gmra.mrb[12].mxu0 %v452_v37 }
  0x52   : > { %5512 = vmatprep.mubr.f32.mxu0 %v453_v38 }
  0x55   : > { %5513 = vmatmul.mubr.f32.gmra.mrb[14].mxu0 %v454_v39 }
  0x56   : > { %5515 = vmatprep.mubr.f32.mxu0 %v455_v40 }
  0x59   : > { %5516 = vmatmul.mubr.f32.gmra.mrb[16].mxu0 %v456_v41 }
  0x5a   : > { %5518 = vmatprep.mubr.f32.mxu0 %v457_v42 }
  0x5d   : > { %5519 = vmatmul.mubr.f32.gmra.mrb[18].mxu0 %v458_v43 }
  0x5e   : > { %5521 = vmatprep.mubr.f32.mxu0 %v459_v44 }
  0x61   : > { %5522 = vmatmul.mubr.f32.gmra.mrb[20].mxu0 %v460_v45 }
  0x62   : > { %5524 = vmatprep.mubr.f32.mxu0 %v461_v46 }
  0x65   : > { %5525 = vmatmul.mubr.f32.gmra.mrb[22].mxu0 %v462_v47 }
  0x66   : > { %5527 = vmatprep.mubr.f32.mxu0 %v463_v48 }
  0x69   : > { %5528 = vmatmul.mubr.f32.gmra.mrb[24].mxu0 %v464_v49 }
  0x6a   : > { %5530 = vmatprep.mubr.f32.mxu0 %v465_v50 }
  0x6d   : > { %5531 = vmatmul.mubr.f32.gmra.mrb[26].mxu0 %v466_v51 }
  0x6e   : > { %5533 = vmatprep.mubr.f32.mxu0 %v467_v52 }
  0x71   : > { %5534 = vmatmul.mubr.f32.gmra.mrb[28].mxu0 %v468_v53 }
  0x72   : > { %5536 = vmatprep.mubr.f32.mxu0 %v469_v54 }
  0x75   : > { %5537 = vmatmul.mubr.f32.gmra.mrb[30].mxu0 %v470_v55 }
 0x10c   : > { %v5493_v57 = vpop.f32.mrb[0].mxu0 }
 0x10d   : > { %v560_v58 = vpop.f32.mrb[1].mxu0  ;;  %v6242_v60 = vadd.f32 %v5493_v57, %v6236_v56 }
 0x10e   : > { %v6239_v59 = vadd.f32 %v6236_v56, %v560_v58 }
 0x10f   : > { %v723_v4 = vsel %vm719_vm0, %v6242_v60, 0.0 }
 0x110   : > { %v5496_v61 = vpop.f32.mrb[2].mxu0  ;;  %v720_v62 = vsel %vm719_vm0, %v6239_v59, 0.0 }
 0x111   : > { %v570_v63 = vpop.f32.mrb[3].mxu0  ;;  %721 = vadd.xlane.f32.xlu0 %v720_v62  ;;  %v6250_v1 = vadd.f32 %v5496_v61, %v6236_v56 }
 0x112   : > { %v6247_v0 = vadd.f32 %v6236_v56, %v570_v63 }
 0x113   : > { %v729_v9 = vsel %vm719_vm0, %v6250_v1, 0.0 }
 0x114   : > { %v5499_v2 = vpop.f32.mrb[4].mxu0  ;;  %v726_v3 = vsel %vm719_vm0, %v6247_v0, 0.0 }
 0x115   : > { %v580_v5 = vpop.f32.mrb[5].mxu0  ;;  %727 = vadd.xlane.f32.xlu1 %v726_v3  ;;  %724 = vadd.xlane.f32.xlu0 %v723_v4  ;;  %v6260_v7 = vadd.f32 %v5499_v2, %v6236_v56 }
 0x116   : > { %v6257_v6 = vadd.f32 %v6236_v56, %v580_v5 }
 0x117   : > { %v735_v15 = vsel %vm719_vm0, %v6260_v7, 0.0 }
 0x118   : > { %v5502_v8 = vpop.f32.mrb[6].mxu0  ;;  %v732_v10 = vsel %vm719_vm0, %v6257_v6, 0.0 }
 0x119   : > { %v590_v11 = vpop.f32.mrb[7].mxu0  ;;  %730 = vadd.xlane.f32.xlu1 %v729_v9  ;;  %733 = vadd.xlane.f32.xlu0 %v732_v10  ;;  %v6270_v13 = vadd.f32 %v5502_v8, %v6236_v56 }
 0x11a   : > { %v6267_v12 = vadd.f32 %v6236_v56, %v590_v11 }
 0x11b   : > { %v741_v21 = vsel %vm719_vm0, %v6270_v13, 0.0 }
 0x11c   : > { %v5505_v14 = vpop.f32.mrb[8].mxu0  ;;  %v738_v16 = vsel %vm719_vm0, %v6267_v12, 0.0 }
 0x11d   : > { %v600_v17 = vpop.f32.mrb[9].mxu0  ;;  %736 = vadd.xlane.f32.xlu1 %v735_v15  ;;  %739 = vadd.xlane.f32.xlu0 %v738_v16  ;;  %v6277_v18 = vadd.f32 %v5505_v14, %v6236_v56 }
 0x11e   : > { %v6280_v19 = vadd.f32 %v6236_v56, %v600_v17 }
 0x11f   : > { %v747_v26 = vsel %vm719_vm0, %v6277_v18, 0.0 }
 0x120   : > { %v5508_v20 = vpop.f32.mrb[10].mxu0  ;;  %v744_v22 = vsel %vm719_vm0, %v6280_v19, 0.0 }
 0x121   : > { %v610_v23 = vpop.f32.mrb[11].mxu0  ;;  %742 = vadd.xlane.f32.xlu1 %v741_v21  ;;  %745 = vadd.xlane.f32.xlu0 %v744_v22  ;;  %v6287_v24 = vadd.f32 %v5508_v20, %v6236_v56 }
 0x122   : > { %v6290_v25 = vadd.f32 %v6236_v56, %v610_v23 }
 0x123   : > { %v753_v32 = vsel %vm719_vm0, %v6287_v24, 0.0 }
 0x124   : > { %v5511_v27 = vpop.f32.mrb[12].mxu0  ;;  %v750_v28 = vsel %vm719_vm0, %v6290_v25, 0.0 }
 0x125   : > { %v620_v29 = vpop.f32.mrb[13].mxu0  ;;  %748 = vadd.xlane.f32.xlu1 %v747_v26  ;;  %751 = vadd.xlane.f32.xlu0 %v750_v28  ;;  %v6297_v30 = vadd.f32 %v5511_v27, %v6236_v56 }
 0x126   : > { %v6300_v31 = vadd.f32 %v6236_v56, %v620_v29 }
 0x127   : > { %v759_v34 = vsel %vm719_vm0, %v6297_v30, 0.0 }
 0x128   : > { %v756_v33 = vsel %vm719_vm0, %v6300_v31, 0.0  ;;  %v6308_v35 = vpop.f32.mrb[14].mxu0 }
 0x129   : > { %754 = vadd.xlane.f32.xlu1 %v753_v32  ;;  %757 = vadd.xlane.f32.xlu0 %v756_v33  ;;  %v630_v36 = vpop.f32.mrb[15].mxu0 }
 0x12a   : > { %v6379_v32 = vadd.f32 %v6236_v56, %v630_v36 }
 0x12c   : > { %v6310_v37 = vpop.f32.mrb[16].mxu0 }
 0x12d   : > { %760 = vadd.xlane.f32.xlu1 %v759_v34  ;;  %v6312_v38 = vpop.f32.mrb[17].mxu0 }
 0x130   : > { %v6314_v39 = vpop.f32.mrb[18].mxu0 }
 0x131   : > { %v6316_v40 = vpop.f32.mrb[19].mxu0 }
 0x134   : > { %v6318_v41 = vpop.f32.mrb[20].mxu0 }
 0x135   : > { %v6320_v42 = vpop.f32.mrb[21].mxu0 }
 0x138   : > { %v6322_v43 = vpop.f32.mrb[22].mxu0 }
 0x139   : > { %v6324_v44 = vpop.f32.mrb[23].mxu0 }
 0x13c   : > { %v6326_v45 = vpop.f32.mrb[24].mxu0 }
 0x13d   : > { %v6328_v46 = vpop.f32.mrb[25].mxu0 }
 0x140   : > { %v6330_v47 = vpop.f32.mrb[26].mxu0 }
 0x141   : > { %v6332_v48 = vpop.f32.mrb[27].mxu0 }
 0x144   : > { %v6334_v49 = vpop.f32.mrb[28].mxu0 }
 0x145   : > { %v6336_v50 = vpop.f32.mrb[29].mxu0 }
 0x148   : > { %v6338_v51 = vpop.f32.mrb[30].mxu0 }
 0x149   : > { %v6340_v52 = vpop.f32.mrb[31].mxu0 }
 0x19e   : > { %v722_v53 = vpop.xlane.xlu0 %721 }
 0x19f   : > { %v817_v54 = vmul.f32 0.015625, %v722_v53 }
 0x1a1   : > { %v6343_v55 = vsub.f32 %v6239_v59, %v817_v54 }
 0x1a2   : > { %v728_v57 = vpop.xlane.xlu1 %727  ;;  %v725_v58 = vpop.xlane.xlu0 %724 }
 0x1a3   : > { %v819_v61 = vmul.f32 0.015625, %v728_v57  ;;  %v818_v62 = vmul.f32 0.015625, %v725_v58  ;;  %v881_v63 = vmul.f32 %v6343_v55, %v6343_v55 }
 0x1a5   : > { %v6348_v2 = vsub.f32 %v6247_v0, %v819_v61  ;;  %v6351_v3 = vsub.f32 %v6242_v60, %v818_v62  ;;  %v913_v4 = vsel %vm719_vm0, %v881_v63, 0.0 }
 0x1a6   : > { %v731_v5 = vpop.xlane.xlu1 %730  ;;  %914 = vadd.xlane.f32.xlu0 %v913_v4  ;;  %v734_v8 = vpop.xlane.xlu0 %733  ;;  %v762_v4 = vsel %vm719_vm0, %v6379_v32, 0.0 }
 0x1a7   : > { %v820_v59 = vmul.f32 0.015625, %v731_v5  ;;  %v821_v9 = vmul.f32 0.015625, %v734_v8  ;;  %v883_v10 = vmul.f32 %v6348_v2, %v6348_v2  ;;  %v882_v11 = vmul.f32 %v6351_v3, %v6351_v3 }
 0x1a9   : > { %v6359_v14 = vsub.f32 %v6250_v1, %v820_v59  ;;  %v6362_v0 = vsub.f32 %v6257_v6, %v821_v9  ;;  %v919_v60 = vsel %vm719_vm0, %v883_v10, 0.0  ;;  %v916_v15 = vsel %vm719_vm0, %v882_v11, 0.0 }
 0x1aa   : > { %v737_v16 = vpop.xlane.xlu1 %736  ;;  %920 = vadd.xlane.f32.xlu0 %v919_v60  ;;  %917 = vadd.xlane.f32.xlu1 %v916_v15  ;;  %v740_v17 = vpop.xlane.xlu0 %739  ;;  %v6409_v10 = vadd.f32 %v6236_v56, %v6312_v38  ;;  %v1216_v15 = vld [vmem:[%s9779_s5] sm:$0xff] }
 0x1ab   : > { %v822_v20 = vmul.f32 0.015625, %v737_v16  ;;  %v823_v21 = vmul.f32 0.015625, %v740_v17  ;;  %v884_v22 = vmul.f32 %v6359_v14, %v6359_v14  ;;  %v885_v1 = vmul.f32 %v6362_v0, %v6362_v0  ;;  %v1220_v38 = vld [vmem:[%s9779_s5 + $0x20] sm:$0xff] }
 0x1ad   : > { %v6371_v23 = vsub.f32 %v6260_v7, %v822_v20  ;;  %v6374_v6 = vsub.f32 %v6267_v12, %v823_v21  ;;  %v922_v26 = vsel %vm719_vm0, %v884_v22, 0.0  ;;  %v925_v27 = vsel %vm719_vm0, %v885_v1, 0.0 }
 0x1ae   : > { %v743_v28 = vpop.xlane.xlu1 %742  ;;  %923 = vadd.xlane.f32.xlu1 %v922_v26  ;;  %926 = vadd.xlane.f32.xlu0 %v925_v27  ;;  %v746_v29 = vpop.xlane.xlu0 %745  ;;  %v5637_v1 = vpack.c.bf16 %v1220_v38, %v1216_v15  ;;  %v768_v26 = vsel %vm719_vm0, %v6409_v10, 0.0  ;;  %v1225_v27 = vld [vmem:[%s9779_s5 + $0x48] sm:$0xff]  ;;  %v6489_v15 = vadd.f32 %v6314_v39, %v6236_v56 }
 0x1af   : > { %v824_v33 = vmul.f32 0.015625, %v743_v28  ;;  %v825_v34 = vmul.f32 0.015625, %v746_v29  ;;  %v886_v7 = vmul.f32 %v6371_v23, %v6371_v23  ;;  %v887_v12 = vmul.f32 %v6374_v6, %v6374_v6 }
 0x1b0   : > { %v6441_v29 = vadd.f32 %v6310_v37, %v6236_v56 }
 0x1b1   : > { %v6386_v53 = vsub.f32 %v6270_v13, %v824_v33  ;;  %v6389_v54 = vsub.f32 %v6280_v19, %v825_v34  ;;  %v928_v57 = vsel %vm719_vm0, %v886_v7, 0.0  ;;  %v931_v58 = vsel %vm719_vm0, %v887_v12, 0.0  ;;  %v1224_v34 = vld [vmem:[%s9779_s5 + $0x40] sm:$0xff] }
 0x1b2   : > { %v749_v36 = vpop.xlane.xlu1 %748  ;;  %929 = vadd.xlane.f32.xlu1 %v928_v57  ;;  %932 = vadd.xlane.f32.xlu0 %v931_v58  ;;  %v752_v61 = vpop.xlane.xlu0 %751  ;;  %v6399_v13 = vadd.f32 %v6308_v35, %v6236_v56  ;;  %v1217_v35 = vld [vmem:[%s9779_s5 + $0x8] sm:$0xff]  ;;  %v1228_v7 = vld [vmem:[%s9779_s5 + $0x60] sm:$0xff] }
 0x1b3   : > { %v826_v62 = vmul.f32 0.015625, %v749_v36  ;;  %v888_v63 = vmul.f32 %v6386_v53, %v6386_v53  ;;  %v827_v5 = vmul.f32 0.015625, %v752_v61  ;;  %v889_v59 = vmul.f32 %v6389_v54, %v6389_v54 }
 0x1b4   : > { %v765_v11 = vsel %vm719_vm0, %v6399_v13, 0.0  ;;  %v5641_v58 = vpack.c.bf16 %v1228_v7, %v1224_v34  ;;  %v6457_v61 = vadd.f32 %v6236_v56, %v6316_v40  ;;  %v1232_v40 = vld [vmem:[%s9779_s5 + $0x80] sm:$0xff]  ;;  %v6522_v34 = vadd.f32 %v6318_v41, %v6236_v56 }
 0x1b5   : > { %v6402_v19 = vsub.f32 %v6277_v18, %v826_v62  ;;  %v934_v8 = vsel %vm719_vm0, %v888_v63, 0.0  ;;  %v1221_v18 = vld [vmem:[%s9779_s5 + $0x28] sm:$0xff]  ;;  %v6426_v16 = vsub.f32 %v6290_v25, %v827_v5  ;;  %v937_v21 = vsel %vm719_vm0, %v889_v59, 0.0 }
 0x1b6   : > { %v755_v9 = vpop.xlane.xlu1 %754  ;;  %935 = vadd.xlane.f32.xlu1 %v934_v8  ;;  %763 = vadd.xlane.f32.xlu0 %v762_v4  ;;  %v5635_v60 = vpack.c.bf16 %v1221_v18, %v1217_v35  ;;  %v758_v20 = vpop.xlane.xlu0 %757  ;;  %v1229_v25 = vld [vmem:[%s9779_s5 + $0x68] sm:$0xff]  ;;  %v771_v4 = vsel %vm719_vm0, %v6441_v29, 0.0  ;;  %v1236_v8 = vld [vmem:[%s9779_s5 + $0xa0] sm:$0xff]  ;;  %v774_v18 = vsel %vm719_vm0, %v6457_v61, 0.0  ;;  %v6539_v41 = vadd.f32 %v6326_v45, %v6236_v56 }
 0x1b7   : > { %v828_v17 = vmul.f32 0.015625, %v755_v9  ;;  %v890_v22 = vmul.f32 %v6402_v19, %v6402_v19  ;;  %v829_v28 = vmul.f32 0.015625, %v758_v20  ;;  %v5639_v33 = vpack.c.bf16 %v1229_v25, %v1225_v27  ;;  %v1233_v62 = vld [vmem:[%s9779_s5 + $0x88] sm:$0xff]  ;;  %v1244_v20 = vld [vmem:[%s9779_s5 + $0xe0] sm:$0xff] }
 0x1b8   : > { %5636 = vmatprep.subr.bf16.mxu0 %v5635_v60  ;;  %5779 = vmatprep.subr.bf16.mxu1 %v5635_v60  ;;  %v891_v37 = vmul.f32 %v6426_v16, %v6426_v16  ;;  %v5645_v35 = vpack.c.bf16 %v1236_v8, %v1232_v40  ;;  %v1245_v60 = vld [vmem:[%s9779_s5 + $0xe8] sm:$0xff]  ;;  %v6555_v45 = vadd.f32 %v6236_v56, %v6336_v50 }
 0x1b9   : > { %5638 = vmatpush1.bf16.msra.mxu0 %v5637_v1  ;;  %5783 = vmatpush1.bf16.msra.mxu1 %v5637_v1  ;;  %v6450_v12 = vsub.f32 %v6287_v24, %v828_v17  ;;  %v940_v57 = vsel %vm719_vm0, %v890_v22, 0.0  ;;  %v1237_v24 = vld [vmem:[%s9779_s5 + $0xa8] sm:$0xff]  ;;  %v6466_v63 = vsub.f32 %v6300_v31, %v829_v28  ;;  %v1240_v17 = vld [vmem:[%s9779_s5 + $0xc0] sm:$0xff]  ;;  %v9789_v28 = vmov 0.0  }
 0x1ba   : > { %766 = vadd.xlane.f32.xlu0 %v765_v11  ;;  %938 = vadd.xlane.f32.xlu1 %v937_v21  ;;  %v761_v36 = vpop.xlane.xlu1 %760  ;;  %v5643_v5 = vpack.c.bf16 %v1237_v24, %v1233_v62  ;;  %v943_v9 = vsel %vm719_vm0, %v891_v37, 0.0  ;;  %v1241_v11 = vld [vmem:[%s9779_s5 + $0xc8] sm:$0xff]  ;;  %v5649_v1 = vpack.c.bf16 %v1244_v20, %v1240_v17  ;;  %v6531_v37 = vadd.f32 %v6236_v56, %v6328_v46 }
 0x1bb   : > { %5640 = vmatprep.subr.bf16.mxu0 %v5639_v33  ;;  %5780 = vmatprep.subr.bf16.mxu1 %v5639_v33  ;;  %v830_v59 = vmul.f32 0.015625, %v761_v36  ;;  %v892_v31 = vmul.f32 %v6450_v12, %v6450_v12  ;;  %v5647_v38 = vpack.c.bf16 %v1245_v60, %v1241_v11  ;;  %v893_v39 = vmul.f32 %v6466_v63, %v6466_v63 }
 0x1bc   : > { %1408 = vmatprep.mubr.f32.mxu0 %v9789_v28  ;;  %1492 = vmatprep.mubr.f32.mxu1 %v9789_v28  ;;  %v792_v46 = vsel %vm719_vm0, %v6531_v37, 0.0  ;;  %v6551_v62 = vadd.f32 %v6330_v47, %v6236_v56  ;;  %v795_v24 = vsel %vm719_vm0, %v6539_v41, 0.0  ;;  %v6567_v47 = vadd.f32 %v6236_v56, %v6340_v52 }
 0x1bd   : > { %5642 = vmatpush1.bf16.msra.mxu0 %v5641_v58  ;;  %5784 = vmatpush1.bf16.msra.mxu1 %v5641_v58  ;;  %v6498_v21 = vsub.f32 %v6297_v30, %v830_v59  ;;  %v946_v22 = vsel %vm719_vm0, %v892_v31, 0.0  ;;  %v777_v30 = vsel %vm719_vm0, %v6489_v15, 0.0  ;;  %v949_v27 = vsel %vm719_vm0, %v893_v39, 0.0  ;;  %v1219_v59 = vld [vmem:[%s9779_s5 + $0x18] sm:$0xff] }
 0x1be   : > { %769 = vadd.xlane.f32.xlu0 %v768_v26  ;;  %941 = vadd.xlane.f32.xlu1 %v940_v57  ;;  %v6505_v26 = vadd.f32 %v6236_v56, %v6320_v42  ;;  %v6516_v42 = vadd.f32 %v6236_v56, %v6324_v44  ;;  %v6527_v57 = vadd.f32 %v6322_v43, %v6236_v56  ;;  %v783_v58 = vsel %vm719_vm0, %v6522_v34, 0.0 }
 0x1bf   : > { %5644 = vmatprep.subr.bf16.mxu0 %v5643_v5  ;;  %5781 = vmatprep.subr.bf16.mxu1 %v5643_v5  ;;  %v894_v25 = vmul.f32 %v6498_v21, %v6498_v21  ;;  %v6543_v43 = vadd.f32 %v6236_v56, %v6332_v48  ;;  %v804_v50 = vsel %vm719_vm0, %v6555_v45, 0.0  ;;  %v801_v5 = vsel %vm719_vm0, %v6551_v62, 0.0 }
 0x1c0   : > { %v780_v33 = vsel %vm719_vm0, %v6505_v26, 0.0  ;;  %v786_v44 = vsel %vm719_vm0, %v6516_v42, 0.0  ;;  %v789_v36 = vsel %vm719_vm0, %v6527_v57, 0.0  ;;  %v6575_v40 = vadd.f32 %v6338_v51, %v6236_v56 }
 0x1c1   : > { %5646 = vmatpush1.bf16.msra.mxu0 %v5645_v35  ;;  %5785 = vmatpush1.bf16.msra.mxu1 %v5645_v35  ;;  %v952_v7 = vsel %vm719_vm0, %v894_v25, 0.0  ;;  %v798_v48 = vsel %vm719_vm0, %v6543_v43, 0.0 }
 0x1c2   : > { %772 = vadd.xlane.f32.xlu0 %v771_v4  ;;  %944 = vadd.xlane.f32.xlu1 %v943_v9  ;;  %v6563_v4 = vadd.f32 %v6334_v49, %v6236_v56  ;;  %v810_v49 = vsel %vm719_vm0, %v6567_v47, 0.0  ;;  %v813_v52 = vsel %vm719_vm0, %v6575_v40, 0.0  ;;  %v1223_v56 = vld [vmem:[%s9779_s5 + $0x38] sm:$0xff] }
 0x1c3   : > { %5648 = vmatprep.subr.bf16.mxu0 %v5647_v38  ;;  %5782 = vmatprep.subr.bf16.mxu1 %v5647_v38  ;;  %v5651_v51 = vpack.c.bf16 %v1223_v56, %v1219_v59  ;;  %v6604_v59 = vld [vmem:[%s9778_s4] ss:$0 sm:$0xff]  ;;  %v1231_v56 = vld [vmem:[%s9779_s5 + $0x78] sm:$0xff] }
 0x1c4   : > { %v807_v8 = vsel %vm719_vm0, %v6563_v4, 0.0 }
 0x1c5   : > { %5650 = vmatpush1.bf16.msra.mxu0 %v5649_v1  ;;  %5786 = vmatpush1.bf16.msra.mxu1 %v5649_v1 }
 0x1c6   : > { %775 = vadd.xlane.f32.xlu0 %v774_v18  ;;  %947 = vadd.xlane.f32.xlu1 %v946_v22 }
 0x1c7   : > { %5652 = vmatprep.subr.bf16.mxu0 %v5651_v51 }
 0x1ca   : > { %778 = vadd.xlane.f32.xlu0 %v777_v30  ;;  %950 = vadd.xlane.f32.xlu1 %v949_v27 }
 0x1ce   : > { %781 = vadd.xlane.f32.xlu0 %v780_v33  ;;  %953 = vadd.xlane.f32.xlu1 %v952_v7 }
 0x1d2   : > { %787 = vadd.xlane.f32.xlu0 %v786_v44  ;;  %784 = vadd.xlane.f32.xlu1 %v783_v58 }
 0x1d6   : > { %793 = vadd.xlane.f32.xlu0 %v792_v46  ;;  %790 = vadd.xlane.f32.xlu1 %v789_v36  ;;  %v6592_v46 = vld [vmem:[%s9777_s3] ss:$0 sm:$0xff] }
 0x1da   : > { %799 = vadd.xlane.f32.xlu0 %v798_v48  ;;  %796 = vadd.xlane.f32.xlu1 %v795_v24 }
 0x1de   : > { %805 = vadd.xlane.f32.xlu0 %v804_v50  ;;  %802 = vadd.xlane.f32.xlu1 %v801_v5 }
 0x1e2   : > { %811 = vadd.xlane.f32.xlu0 %v810_v49  ;;  %808 = vadd.xlane.f32.xlu1 %v807_v8  ;;  %v1218_v49 = vld [vmem:[%s9779_s5 + $0x10] sm:$0xff] }
 0x1e3   : > { %v1222_v8 = vld [vmem:[%s9779_s5 + $0x30] sm:$0xff] }
 0x1e6   : > { %814 = vadd.xlane.f32.xlu1 %v813_v52 }
 0x233   : > { %v915_v9 = vpop.xlane.xlu0 %914 }
 0x234   : > { %v1009_v31 = vmul.f32 0.015625, %v915_v9 }
 0x236   : > { %v1041_v35 = vadd.f32 1e-05, %v1009_v31  ;;  %v1226_v31 = vld [vmem:[%s9779_s5 + $0x50] sm:$0xff] }
 0x237   : > { %v918_v18 = vpop.xlane.xlu1 %917  ;;  %v921_v11 = vpop.xlane.xlu0 %920 }
 0x238   : > { %5895 = vrsqrt.f32 %v1041_v35  ;;  %v1010_v60 = vmul.f32 0.015625, %v918_v18  ;;  %v1011_v38 = vmul.f32 0.015625, %v921_v11  ;;  %v1230_v35 = vld [vmem:[%s9779_s5 + $0x70] sm:$0xff] }
 0x23a   : > { %v1042_v17 = vadd.f32 1e-05, %v1010_v60  ;;  %v1043_v20 = vadd.f32 1e-05, %v1011_v38  ;;  %v5653_v38 = vpack.c.bf16 %v1222_v8, %v1218_v49  ;;  %v1243_v8 = vld [vmem:[%s9779_s5 + $0xd8] sm:$0xff] }
 0x23b   : > { %v924_v22 = vpop.xlane.xlu1 %923  ;;  %v927_v39 = vpop.xlane.xlu0 %926 }
 0x23c   : > { %5897 = vrsqrt.f32 %v1042_v17  ;;  %v1012_v1 = vmul.f32 0.015625, %v924_v22  ;;  %v1013_v30 = vmul.f32 0.015625, %v927_v39  ;;  %v1235_v17 = vld [vmem:[%s9779_s5 + $0x98] sm:$0xff] }
 0x23d   : > { %5899 = vrsqrt.f32 %v1043_v20  ;;  %v1239_v20 = vld [vmem:[%s9779_s5 + $0xb8] sm:$0xff] }
 0x23e   : > { %v1044_v27 = vadd.f32 1e-05, %v1012_v1  ;;  %v1045_v25 = vadd.f32 1e-05, %v1013_v30 }
 0x23f   : > { %v930_v33 = vpop.xlane.xlu1 %929  ;;  %v933_v7 = vpop.xlane.xlu0 %932 }
 0x240   : > { %5901 = vrsqrt.f32 %v1044_v27  ;;  %v1014_v44 = vmul.f32 0.015625, %v930_v33  ;;  %v1015_v48 = vmul.f32 0.015625, %v933_v7  ;;  %v5657_v7 = vpack.c.bf16 %v1230_v35, %v1226_v31 }
 0x241   : > { %5903 = vrsqrt.f32 %v1045_v25 }
 0x242   : > { %v5896_v58 = vpop.eup %5895  ;;  %v1046_v36 = vadd.f32 1e-05, %v1014_v44  ;;  %v1047_v11 = vadd.f32 1e-05, %v1015_v48  ;;  %v5659_v48 = vpack.c.bf16 %v1239_v20, %v1235_v17 }
 0x243   : > { %v1105_v24 = vmul.f32 %v5896_v58, %v6343_v55  ;;  %v936_v50 = vpop.xlane.xlu1 %935  ;;  %v764_v5 = vpop.xlane.xlu0 %763  ;;  %v1227_v55 = vld [vmem:[%s9779_s5 + $0x58] sm:$0xff] }
 0x244   : > { %v831_v52 = vmul.f32 0.015625, %v764_v5  ;;  %v1016_v9 = vmul.f32 0.015625, %v936_v50  ;;  %5905 = vrsqrt.f32 %v1046_v36  ;;  %v5655_v25 = vpack.c.bf16 %v1231_v56, %v1227_v55 }
 0x245   : > { %v1144_v51 = vmul.f32 %v6592_v46, %v1105_v24  ;;  %v1234_v24 = vld [vmem:[%s9779_s5 + $0x90] sm:$0xff]  ;;  %5907 = vrsqrt.f32 %v1047_v11 }
 0x246   : > { %v5898_v18 = vpop.eup %5897  ;;  %v6620_v60 = vsub.f32 %v6379_v32, %v831_v52  ;;  %v1048_v44 = vadd.f32 1e-05, %v1016_v9  ;;  %v1247_v52 = vld [vmem:[%s9779_s5 + $0xf8] sm:$0xff] }
 0x247   : > { %v5900_v22 = vpop.eup %5899  ;;  %v939_v39 = vpop.xlane.xlu1 %938  ;;  %v6629_v30 = vadd.f32 %v6604_v59, %v1144_v51  ;;  %v1106_v27 = vmul.f32 %v5898_v18, %v6351_v3 }
 0x248   : > { %v767_v1 = vpop.xlane.xlu0 %766  ;;  %v895_v33 = vmul.f32 %v6620_v60, %v6620_v60  ;;  %v1107_v36 = vmul.f32 %v5900_v22, %v6348_v2  ;;  %v1017_v50 = vmul.f32 0.015625, %v939_v39  ;;  %v1238_v2 = vld [vmem:[%s9779_s5 + $0xb0] sm:$0xff]  ;;  %5909 = vrsqrt.f32 %v1048_v44 }
 0x249   : > { %9960 = vst [vmem:[#allocation7_spill] sm:$0xff] %v6629_v30  ;;  %v832_v32 = vmul.f32 0.015625, %v767_v1  ;;  %5011 = vmatmul.mubr.msk.f32.vlgmr.msra.gmra.mrb[32].mxu0 %vm719_vm0, %v6629_v30  ;;  %v1145_v58 = vmul.f32 %v6592_v46, %v1106_v27  ;;  %v5661_v11 = vpack.c.bf16 %v1238_v2, %v1234_v24  ;;  %v1246_v1 = vld [vmem:[%s9779_s5 + $0xf0] sm:$0xff] }
 0x24a   : > { %v5902_v3 = vpop.eup %5901  ;;  %v955_v49 = vsel %vm719_vm0, %v895_v33, 0.0  ;;  %1414 = vmatprep.mubr.f32.mxu0 %v9789_v28  ;;  %5654 = vmatpush1.bf16.msra.mxu0 %v5653_v38  ;;  %v1146_v51 = vmul.f32 %v6592_v46, %v1107_v36  ;;  %v5663_v38 = vpack.c.bf16 %v1247_v52, %v1243_v8  ;;  %v1049_v17 = vadd.f32 1e-05, %v1017_v50 }
 0x24b   : > { %v6642_v5 = vsub.f32 %v6399_v13, %v832_v32  ;;  %v942_v55 = vpop.xlane.xlu1 %941  ;;  %956 = vadd.xlane.f32.xlu0 %v955_v49  ;;  %v6656_v56 = vadd.f32 %v6604_v59, %v1145_v58  ;;  %v1108_v9 = vmul.f32 %v5902_v3, %v6359_v14  ;;  %5656 = vmatprep.subr.bf16.mxu0 %v5655_v25  ;;  %v5904_v31 = vpop.eup %5903  ;;  %v1242_v14 = vld [vmem:[%s9779_s5 + $0xd0] sm:$0xff] }
 0x24c   : > { %v770_v13 = vpop.xlane.xlu0 %769  ;;  %v1018_v20 = vmul.f32 0.015625, %v942_v55  ;;  %v6676_v32 = vadd.f32 %v6604_v59, %v1146_v51  ;;  %v1109_v33 = vmul.f32 %v5904_v31, %v6362_v0  ;;  %v5665_v24 = vpack.c.bf16 %v1246_v1, %v1242_v14 }
 0x24d   : > { %9961 = vst [vmem:[#allocation8_spill] sm:$0xff] %v6656_v56  ;;  %v833_v35 = vmul.f32 0.015625, %v770_v13  ;;  %v896_v18 = vmul.f32 %v6642_v5, %v6642_v5  ;;  %5012 = vmatmul.mubr.msk.f32.gmra.mrb[34].mxu0 %vm719_vm0, %v6656_v56  ;;  %5911 = vrsqrt.f32 %v1049_v17 }
 0x24e   : > { %1420 = vmatprep.mubr.f32.mxu0 %v9789_v28  ;;  %5658 = vmatpush1.bf16.msra.mxu0 %v5657_v7  ;;  %9962 = vst [vmem:[#allocation9_spill] sm:$0xff] %v6676_v32  ;;  %v5906_v7 = vpop.eup %5905  ;;  %v1050_v3 = vadd.f32 1e-05, %v1018_v20  ;;  %v1148_v8 = vmul.f32 %v6592_v46, %v1109_v33 }
 0x24f   : > { %v6665_v22 = vsub.f32 %v6409_v10, %v833_v35  ;;  %v958_v39 = vsel %vm719_vm0, %v896_v18, 0.0  ;;  %v945_v27 = vpop.xlane.xlu1 %944  ;;  %v1147_v10 = vmul.f32 %v6592_v46, %v1108_v9  ;;  %5660 = vmatprep.subr.bf16.mxu0 %v5659_v48  ;;  %v1110_v52 = vmul.f32 %v5906_v7, %v6371_v23  ;;  %v5908_v55 = vpop.eup %5907 }
 0x250   : > { %959 = vadd.xlane.f32.xlu1 %v958_v39  ;;  %v773_v25 = vpop.xlane.xlu0 %772  ;;  %v1019_v36 = vmul.f32 0.015625, %v945_v27  ;;  %5913 = vrsqrt.f32 %v1050_v3  ;;  %v1111_v20 = vmul.f32 %v5908_v55, %v6374_v6 }
 0x251   : > { %v834_v44 = vmul.f32 0.015625, %v773_v25  ;;  %v897_v58 = vmul.f32 %v6665_v22, %v6665_v22  ;;  %5013 = vmatmul.mubr.msk.f32.gmra.mrb[36].mxu0 %vm719_vm0, %v6676_v32  ;;  %v6690_v2 = vadd.f32 %v6604_v59, %v1147_v10  ;;  %v1149_v17 = vmul.f32 %v6592_v46, %v1110_v52 }
 0x252   : > { %1426 = vmatprep.mubr.f32.mxu0 %v9789_v28  ;;  %5662 = vmatpush1.bf16.msra.mxu0 %v5661_v11  ;;  %v1051_v51 = vadd.f32 1e-05, %v1019_v36  ;;  %v5910_v23 = vpop.eup %5909  ;;  %v1150_v7 = vmul.f32 %v6592_v46, %v1111_v20 }
 0x253   : > { %v6685_v50 = vsub.f32 %v6441_v29, %v834_v44  ;;  %v961_v49 = vsel %vm719_vm0, %v897_v58, 0.0  ;;  %v948_v0 = vpop.xlane.xlu1 %947  ;;  %9963 = vst [vmem:[#allocation10_spill] sm:$0xff] %v6690_v2  ;;  %5664 = vmatprep.subr.bf16.mxu0 %v5663_v38  ;;  %v6704_v38 = vadd.f32 %v6604_v59, %v1148_v8  ;;  %v6718_v33 = vadd.f32 %v6604_v59, %v1149_v17 }
 0x254   : > { %962 = vadd.xlane.f32.xlu0 %v961_v49  ;;  %v776_v48 = vpop.xlane.xlu0 %775  ;;  %v1020_v9 = vmul.f32 0.015625, %v948_v0  ;;  %5915 = vrsqrt.f32 %v1051_v51  ;;  %v1112_v44 = vmul.f32 %v5910_v23, %v6386_v53  ;;  %v6732_v8 = vadd.f32 %v6604_v59, %v1150_v7 }
 0x255   : > { %v835_v13 = vmul.f32 0.015625, %v776_v48  ;;  %v898_v29 = vmul.f32 %v6685_v50, %v6685_v50  ;;  %5014 = vmatmul.mubr.msk.f32.gmra.mrb[38].mxu0 %vm719_vm0, %v6690_v2  ;;  %9964 = vst [vmem:[#allocation11_spill] sm:$0xff] %v6704_v38  ;;  %9965 = vst [vmem:[#allocation12_spill] sm:$0xff] %v6718_v33 }
 0x256   : > { %1432 = vmatprep.mubr.f32.mxu0 %v9789_v28  ;;  %5666 = vmatpush1.bf16.msra.mxu0 %v5665_v24  ;;  %v1052_v14 = vadd.f32 1e-05, %v1020_v9  ;;  %9966 = vst [vmem:[#allocation13_spill] sm:$0xff] %v6732_v8  ;;  %v1151_v52 = vmul.f32 %v6592_v46, %v1112_v44 }
 0x257   : > { %v6699_v31 = vsub.f32 %v6457_v61, %v835_v13  ;;  %v964_v35 = vsel %vm719_vm0, %v898_v29, 0.0  ;;  %v951_v18 = vpop.xlane.xlu1 %950  ;;  %v5912_v58 = vpop.eup %5911 }
 0x258   : > { %965 = vadd.xlane.f32.xlu1 %v964_v35  ;;  %v779_v11 = vpop.xlane.xlu0 %778  ;;  %v1021_v1 = vmul.f32 0.015625, %v951_v18  ;;  %5917 = vrsqrt.f32 %v1052_v14  ;;  %v1113_v55 = vmul.f32 %v5912_v58, %v6389_v54  ;;  %v6749_v20 = vadd.f32 %v6604_v59, %v1151_v52 }
 0x259   : > { %v836_v39 = vmul.f32 0.015625, %v779_v11  ;;  %v899_v61 = vmul.f32 %v6699_v31, %v6699_v31  ;;  %5015 = vmatmul.mubr.msk.f32.gmra.mrb[40].mxu0 %vm719_vm0, %v6704_v38 }
 0x25a   : > { %1438 = vmatprep.mubr.f32.mxu0 %v9789_v28  ;;  %v1053_v3 = vadd.f32 1e-05, %v1021_v1  ;;  %v5914_v13 = vpop.eup %5913  ;;  %9967 = vst [vmem:[#allocation14_spill] sm:$0xff] %v6749_v20 }
 0x25b   : > { %v6713_v27 = vsub.f32 %v6489_v15, %v836_v39  ;;  %v967_v25 = vsel %vm719_vm0, %v899_v61, 0.0  ;;  %v954_v10 = vpop.xlane.xlu1 %953  ;;  %v1152_v39 = vmul.f32 %v6592_v46, %v1113_v55  ;;  %v1114_v61 = vmul.f32 %v5914_v13, %v6402_v19 }
 0x25c   : > { %968 = vadd.xlane.f32.xlu0 %v967_v25  ;;  %v782_v6 = vpop.xlane.xlu0 %781  ;;  %v1022_v24 = vmul.f32 0.015625, %v954_v10  ;;  %5919 = vrsqrt.f32 %v1053_v3 }
 0x25d   : > { %v837_v36 = vmul.f32 0.015625, %v782_v6  ;;  %v900_v15 = vmul.f32 %v6713_v27, %v6713_v27  ;;  %5016 = vmatmul.mubr.msk.f32.gmra.mrb[42].mxu0 %vm719_vm0, %v6718_v33  ;;  %v6769_v58 = vadd.f32 %v6604_v59, %v1152_v39 }
 0x25e   : > { %1444 = vmatprep.mubr.f32.mxu0 %v9789_v28  ;;  %v1054_v9 = vadd.f32 1e-05, %v1022_v24  ;;  %v5916_v54 = vpop.eup %5915 }
 0x25f   : > { %v6727_v49 = vsub.f32 %v6505_v26, %v837_v36  ;;  %v970_v0 = vsel %vm719_vm0, %v900_v15, 0.0  ;;  %v785_v48 = vpop.xlane.xlu1 %784  ;;  %9968 = vst [vmem:[#allocation15_spill] sm:$0xff] %v6769_v58  ;;  %v1153_v36 = vmul.f32 %v6592_v46, %v1114_v61 }
 0x260   : > { %971 = vadd.xlane.f32.xlu1 %v970_v0  ;;  %v788_v53 = vpop.xlane.xlu0 %787  ;;  %v838_v29 = vmul.f32 0.015625, %v785_v48  ;;  %5921 = vrsqrt.f32 %v1054_v9 }
 0x261   : > { %v839_v51 = vmul.f32 0.015625, %v788_v53  ;;  %v901_v26 = vmul.f32 %v6727_v49, %v6727_v49  ;;  %5017 = vmatmul.mubr.msk.f32.gmra.mrb[44].mxu0 %vm719_vm0, %v6732_v8 }
 0x262   : > { %v6741_v35 = vsub.f32 %v6522_v34, %v838_v29  ;;  %1450 = vmatprep.mubr.f32.mxu0 %v9789_v28  ;;  %v5918_v15 = vpop.eup %5917  ;;  %v6789_v29 = vadd.f32 %v6604_v59, %v1153_v36 }
 0x263   : > { %v6744_v23 = vsub.f32 %v6516_v42, %v839_v51  ;;  %v973_v18 = vsel %vm719_vm0, %v901_v26, 0.0  ;;  %v791_v11 = vpop.xlane.xlu1 %790 }
 0x264   : > { %974 = vadd.xlane.f32.xlu0 %v973_v18  ;;  %v794_v17 = vpop.xlane.xlu0 %793  ;;  %v840_v34 = vmul.f32 0.015625, %v791_v11  ;;  %v902_v42 = vmul.f32 %v6741_v35, %v6741_v35  ;;  %9969 = vst [vmem:[#allocation16_spill] sm:$0xff] %v6789_v29 }
 0x265   : > { %v841_v14 = vmul.f32 0.015625, %v794_v17  ;;  %v903_v1 = vmul.f32 %v6744_v23, %v6744_v23  ;;  %5018 = vmatmul.mubr.msk.f32.gmra.mrb[46].mxu0 %vm719_vm0, %v6749_v20 }
 0x266   : > { %v6760_v25 = vsub.f32 %v6527_v57, %v840_v34  ;;  %v976_v19 = vsel %vm719_vm0, %v902_v42, 0.0  ;;  %1456 = vmatprep.mubr.f32.mxu0 %v9789_v28  ;;  %v1115_v57 = vmul.f32 %v5916_v54, %v6426_v16  ;;  %v5920_v26 = vpop.eup %5919 }
 0x267   : > { %v6763_v10 = vsub.f32 %v6531_v37, %v841_v14  ;;  %v979_v6 = vsel %vm719_vm0, %v903_v1, 0.0  ;;  %v797_v7 = vpop.xlane.xlu1 %796  ;;  %977 = vadd.xlane.f32.xlu1 %v976_v19  ;;  %v1117_v1 = vmul.f32 %v5920_v26, %v6466_v63 }
 0x268   : > { %980 = vadd.xlane.f32.xlu0 %v979_v6  ;;  %v800_v44 = vpop.xlane.xlu0 %799  ;;  %v842_v37 = vmul.f32 0.015625, %v797_v7  ;;  %v904_v3 = vmul.f32 %v6760_v25, %v6760_v25  ;;  %v1154_v51 = vmul.f32 %v6592_v46, %v1115_v57 }
 0x269   : > { %v843_v24 = vmul.f32 0.015625, %v800_v44  ;;  %v905_v0 = vmul.f32 %v6763_v10, %v6763_v10  ;;  %5019 = vmatmul.mubr.msk.f32.gmra.mrb[48].mxu0 %vm719_vm0, %v6769_v58 }
 0x26a   : > { %v6780_v48 = vsub.f32 %v6539_v41, %v842_v37  ;;  %v982_v16 = vsel %vm719_vm0, %v904_v3, 0.0  ;;  %1462 = vmatprep.mubr.f32.mxu0 %v9789_v28  ;;  %v1116_v41 = vmul.f32 %v5918_v15, %v6450_v12  ;;  %v5922_v61 = vpop.eup %5921  ;;  %v6809_v42 = vadd.f32 %v6604_v59, %v1154_v51 }
 0x26b   : > { %v6783_v53 = vsub.f32 %v6543_v43, %v843_v24  ;;  %v985_v52 = vsel %vm719_vm0, %v905_v0, 0.0  ;;  %v803_v55 = vpop.xlane.xlu1 %802  ;;  %983 = vadd.xlane.f32.xlu1 %v982_v16  ;;  %v1156_v24 = vmul.f32 %v6592_v46, %v1117_v1 }
 0x26c   : > { %986 = vadd.xlane.f32.xlu0 %v985_v52  ;;  %v806_v13 = vpop.xlane.xlu0 %805  ;;  %v844_v43 = vmul.f32 0.015625, %v803_v55  ;;  %v906_v18 = vmul.f32 %v6780_v48, %v6780_v48  ;;  %9970 = vst [vmem:[#allocation17_spill] sm:$0xff] %v6809_v42 }
 0x26d   : > { %v845_v9 = vmul.f32 0.015625, %v806_v13  ;;  %v907_v54 = vmul.f32 %v6783_v53, %v6783_v53  ;;  %5020 = vmatmul.mubr.msk.f32.gmra.mrb[50].mxu0 %vm719_vm0, %v6789_v29 }
 0x26e   : > { %v6800_v11 = vsub.f32 %v6551_v62, %v844_v43  ;;  %v988_v12 = vsel %vm719_vm0, %v906_v18, 0.0  ;;  %1468 = vmatprep.mubr.f32.mxu0 %v9789_v28  ;;  %v1155_v62 = vmul.f32 %v6592_v46, %v1116_v41 }
 0x26f   : > { %v6803_v17 = vsub.f32 %v6555_v45, %v845_v9  ;;  %v991_v39 = vsel %vm719_vm0, %v907_v54, 0.0  ;;  %v809_v34 = vpop.xlane.xlu1 %808  ;;  %989 = vadd.xlane.f32.xlu1 %v988_v12 }
 0x270   : > { %992 = vadd.xlane.f32.xlu0 %v991_v39  ;;  %v812_v14 = vpop.xlane.xlu0 %811  ;;  %v846_v45 = vmul.f32 0.015625, %v809_v34  ;;  %v908_v6 = vmul.f32 %v6800_v11, %v6800_v11  ;;  %v6829_v37 = vadd.f32 %v6604_v59, %v1155_v62 }
 0x271   : > { %v847_v19 = vmul.f32 0.015625, %v812_v14  ;;  %v909_v7 = vmul.f32 %v6803_v17, %v6803_v17  ;;  %5021 = vmatmul.mubr.msk.f32.gmra.mrb[52].mxu0 %vm719_vm0, %v6809_v42 }
 0x272   : > { %v6820_v44 = vsub.f32 %v6563_v4, %v846_v45  ;;  %v994_v57 = vsel %vm719_vm0, %v908_v6, 0.0  ;;  %1474 = vmatprep.mubr.f32.mxu0 %v9789_v28  ;;  %9971 = vst [vmem:[#allocation18_spill] sm:$0xff] %v6829_v37  ;;  %v1118_v4 = vmul.f32 %v5922_v61, %v6498_v21  ;;  %v6846_v21 = vadd.f32 %v6604_v59, %v1156_v24 }
 0x273   : > { %v6823_v36 = vsub.f32 %v6567_v47, %v847_v19  ;;  %v997_v63 = vsel %vm719_vm0, %v909_v7, 0.0  ;;  %v815_v15 = vpop.xlane.xlu1 %814  ;;  %995 = vadd.xlane.f32.xlu1 %v994_v57 }
 0x274   : > { %998 = vadd.xlane.f32.xlu0 %v997_v63  ;;  %v848_v3 = vmul.f32 0.015625, %v815_v15  ;;  %v910_v47 = vmul.f32 %v6820_v44, %v6820_v44  ;;  %9972 = vst [vmem:[#allocation19_spill] sm:$0xff] %v6846_v21  ;;  %v1157_v13 = vmul.f32 %v6592_v46, %v1118_v4 }
 0x275   : > { %v911_v0 = vmul.f32 %v6823_v36, %v6823_v36  ;;  %5022 = vmatmul.mubr.msk.f32.gmra.mrb[54].mxu0 %vm719_vm0, %v6829_v37 }
 0x276   : > { %v6840_v16 = vsub.f32 %v6575_v40, %v848_v3  ;;  %v1000_v52 = vsel %vm719_vm0, %v910_v47, 0.0  ;;  %1480 = vmatprep.mubr.f32.mxu0 %v9789_v28  ;;  %v6856_v41 = vadd.f32 %v6604_v59, %v1157_v13 }
 0x277   : > { %v1003_v55 = vsel %vm719_vm0, %v911_v0, 0.0  ;;  %1001 = vadd.xlane.f32.xlu1 %v1000_v52 }
 0x278   : > { %1004 = vadd.xlane.f32.xlu0 %v1003_v55  ;;  %v912_v51 = vmul.f32 %v6840_v16, %v6840_v16  ;;  %9973 = vst [vmem:[#allocation20_spill] sm:$0xff] %v6856_v41 }
 0x279   : > { %5023 = vmatmul.mubr.msk.f32.gmra.mrb[56].mxu0 %vm719_vm0, %v6846_v21 }
 0x27a   : > { %v1006_v40 = vsel %vm719_vm0, %v912_v51, 0.0  ;;  %1486 = vmatprep.mubr.f32.mxu0 %v9789_v28 }
 0x27b   : > { %1007 = vadd.xlane.f32.xlu1 %v1006_v40 }
 0x27d   : > { %5024 = vmatmul.mubr.msk.f32.gmra.mrb[58].mxu0 %vm719_vm0, %v6856_v41 }
 0x27e   : > { %1665 = vmatprep.mubr.f32.mxu0 %v9789_v28 }
 0x281   : > { %5043 = vmatmul.mubr.msk.f32.vlgmr.msra.gmra.mrb[60].mxu0 %vm719_vm0, %v6629_v30 }
 0x282   : > { %1671 = vmatprep.mubr.f32.mxu0 %v9789_v28 }
 0x285   : > { %5044 = vmatmul.mubr.msk.f32.gmra.mrb[62].mxu0 %vm719_vm0, %v6656_v56 }
 0x286   : > { %1677 = vmatprep.mubr.f32.mxu0 %v9789_v28 }
 0x289   : > { %5045 = vmatmul.mubr.msk.f32.gmra.mrb[64].mxu0 %vm719_vm0, %v6676_v32 }
 0x28a   : > { %1683 = vmatprep.mubr.f32.mxu0 %v9789_v28 }
 0x28d   : > { %5046 = vmatmul.mubr.msk.f32.gmra.mrb[66].mxu0 %vm719_vm0, %v6690_v2 }
 0x28e   : > { %1689 = vmatprep.mubr.f32.mxu0 %v9789_v28 }
 0x291   : > { %5047 = vmatmul.mubr.msk.f32.gmra.mrb[68].mxu0 %vm719_vm0, %v6704_v38 }
 0x292   : > { %1695 = vmatprep.mubr.f32.mxu0 %v9789_v28 }
 0x295   : > { %5048 = vmatmul.mubr.msk.f32.gmra.mrb[70].mxu0 %vm719_vm0, %v6718_v33 }
 0x296   : > { %1701 = vmatprep.mubr.f32.mxu0 %v9789_v28 }
 0x299   : > { %5049 = vmatmul.mubr.msk.f32.gmra.mrb[72].mxu0 %vm719_vm0, %v6732_v8 }
 0x29a   : > { %1707 = vmatprep.mubr.f32.mxu0 %v9789_v28 }
 0x29d   : > { %5050 = vmatmul.mubr.msk.f32.gmra.mrb[74].mxu0 %vm719_vm0, %v6749_v20 }
 0x29e   : > { %1713 = vmatprep.mubr.f32.mxu0 %v9789_v28 }
 0x2a1   : > { %5051 = vmatmul.mubr.msk.f32.gmra.mrb[76].mxu0 %vm719_vm0, %v6769_v58 }
 0x2a2   : > { %1719 = vmatprep.mubr.f32.mxu0 %v9789_v28 }
 0x2a5   : > { %5052 = vmatmul.mubr.msk.f32.gmra.mrb[78].mxu0 %vm719_vm0, %v6789_v29 }
 0x2a6   : > { %1725 = vmatprep.mubr.f32.mxu0 %v9789_v28 }
 0x2a9   : > { %5053 = vmatmul.mubr.msk.f32.gmra.mrb[80].mxu0 %vm719_vm0, %v6809_v42 }
 0x2aa   : > { %1731 = vmatprep.mubr.f32.mxu0 %v9789_v28 }
 0x2ad   : > { %5054 = vmatmul.mubr.msk.f32.gmra.mrb[82].mxu0 %vm719_vm0, %v6829_v37 }
 0x2ae   : > { %1737 = vmatprep.mubr.f32.mxu0 %v9789_v28 }
 0x2b1   : > { %5055 = vmatmul.mubr.msk.f32.gmra.mrb[84].mxu0 %vm719_vm0, %v6846_v21 }
 0x2b2   : > { %1743 = vmatprep.mubr.f32.mxu0 %v9789_v28 }
 0x2b5   : > { %5056 = vmatmul.mubr.msk.f32.gmra.mrb[86].mxu0 %vm719_vm0, %v6856_v41 }
 0x2b6   : > { %1749 = vmatprep.mubr.f32.mxu0 %v9789_v28 }
 0x2d8   : > { %v957_v26 = vpop.xlane.xlu0 %956 }
 0x2d9   : > { %v1023_v43 = vmul.f32 0.015625, %v957_v26 }
 0x2db   : > { %v1055_v9 = vadd.f32 1e-05, %v1023_v43 }
 0x2dd   : > { %v960_v18 = vpop.xlane.xlu1 %959  ;;  %5923 = vrsqrt.f32 %v1055_v9 }
 0x2de   : > { %v1024_v54 = vmul.f32 0.015625, %v960_v18 }
 0x2e0   : > { %v1056_v12 = vadd.f32 1e-05, %v1024_v54 }
 0x2e1   : > { %v963_v39 = vpop.xlane.xlu0 %962 }
 0x2e2   : > { %5925 = vrsqrt.f32 %v1056_v12  ;;  %v1025_v61 = vmul.f32 0.015625, %v963_v39 }
 0x2e4   : > { %v1057_v34 = vadd.f32 1e-05, %v1025_v61 }
 0x2e5   : > { %v966_v14 = vpop.xlane.xlu1 %965 }
 0x2e6   : > { %5927 = vrsqrt.f32 %v1057_v34  ;;  %v1026_v62 = vmul.f32 0.015625, %v966_v14 }
 0x2e7   : > { %v5924_v1 = vpop.eup %5923 }
 0x2e8   : > { %v1058_v45 = vadd.f32 1e-05, %v1026_v62  ;;  %v1119_v6 = vmul.f32 %v5924_v1, %v6620_v60 }
 0x2e9   : > { %v969_v19 = vpop.xlane.xlu0 %968 }
 0x2ea   : > { %5929 = vrsqrt.f32 %v1058_v45  ;;  %v1027_v7 = vmul.f32 0.015625, %v969_v19  ;;  %v1158_v57 = vmul.f32 %v6592_v46, %v1119_v6 }
 0x2ec   : > { %v5926_v63 = vpop.eup %5925  ;;  %v1059_v15 = vadd.f32 1e-05, %v1027_v7  ;;  %v6906_v4 = vadd.f32 %v6604_v59, %v1158_v57 }
 0x2ed   : > { %v972_v24 = vpop.xlane.xlu1 %971  ;;  %v1120_v3 = vmul.f32 %v5926_v63, %v6642_v5 }
 0x2ee   : > { %9974 = vst [vmem:[#allocation21_spill] sm:$0xff] %v6906_v4  ;;  %5931 = vrsqrt.f32 %v1059_v15  ;;  %v1028_v47 = vmul.f32 0.015625, %v972_v24  ;;  %5025 = vmatmul.mubr.msk.f32.vlgmr.msra.gmra.mrb[0].mxu1 %vm719_vm0, %v6906_v4  ;;  %5057 = vmatmul.mubr.msk.f32.gmra.mrb[88].mxu0 %vm719_vm0, %v6906_v4 }
 0x2ef   : > { %v1159_v60 = vmul.f32 %v6592_v46, %v1120_v3  ;;  %1498 = vmatprep.mubr.f32.mxu1 %v9789_v28  ;;  %1755 = vmatprep.mubr.f32.mxu0 %v9789_v28 }
 0x2f0   : > { %v5928_v0 = vpop.eup %5927  ;;  %v1060_v52 = vadd.f32 1e-05, %v1028_v47 }
 0x2f1   : > { %v975_v55 = vpop.xlane.xlu0 %974  ;;  %v6917_v13 = vadd.f32 %v6604_v59, %v1159_v60  ;;  %v1121_v5 = vmul.f32 %v5928_v0, %v6665_v22 }
 0x2f2   : > { %5933 = vrsqrt.f32 %v1060_v52  ;;  %v1029_v51 = vmul.f32 0.015625, %v975_v55 }
 0x2f3   : > { %9975 = vst [vmem:[#allocation22_spill] sm:$0xff] %v6917_v13  ;;  %5026 = vmatmul.mubr.msk.f32.gmra.mrb[2].mxu1 %vm719_vm0, %v6917_v13  ;;  %5058 = vmatmul.mubr.msk.f32.gmra.mrb[90].mxu0 %vm719_vm0, %v6917_v13  ;;  %v1160_v40 = vmul.f32 %v6592_v46, %v1121_v5 }
 0x2f4   : > { %v5930_v26 = vpop.eup %5929  ;;  %v1061_v43 = vadd.f32 1e-05, %v1029_v51  ;;  %1504 = vmatprep.mubr.f32.mxu1 %v9789_v28  ;;  %1761 = vmatprep.mubr.f32.mxu0 %v9789_v28  ;;  %v978_v9 = vpop.xlane.xlu1 %977 }
 0x2f5   : > { %v981_v18 = vpop.xlane.xlu0 %980  ;;  %v6928_v22 = vadd.f32 %v6604_v59, %v1160_v40  ;;  %v1122_v54 = vmul.f32 %v5930_v26, %v6685_v50  ;;  %v1030_v12 = vmul.f32 0.015625, %v978_v9 }
 0x2f6   : > { %5935 = vrsqrt.f32 %v1061_v43  ;;  %v1031_v39 = vmul.f32 0.015625, %v981_v18 }
 0x2f7   : > { %9976 = vst [vmem:[#allocation23_spill] sm:$0xff] %v6928_v22  ;;  %5027 = vmatmul.mubr.msk.f32.gmra.mrb[4].mxu1 %vm719_vm0, %v6928_v22  ;;  %5059 = vmatmul.mubr.msk.f32.gmra.mrb[92].mxu0 %vm719_vm0, %v6928_v22  ;;  %v1161_v61 = vmul.f32 %v6592_v46, %v1122_v54  ;;  %v1062_v14 = vadd.f32 1e-05, %v1030_v12 }
 0x2f8   : > { %v5932_v34 = vpop.eup %5931  ;;  %v1063_v62 = vadd.f32 1e-05, %v1031_v39  ;;  %1510 = vmatprep.mubr.f32.mxu1 %v9789_v28  ;;  %1767 = vmatprep.mubr.f32.mxu0 %v9789_v28  ;;  %v984_v1 = vpop.xlane.xlu1 %983 }
 0x2f9   : > { %v987_v50 = vpop.xlane.xlu0 %986  ;;  %v6939_v45 = vadd.f32 %v6604_v59, %v1161_v61  ;;  %v1123_v19 = vmul.f32 %v5932_v34, %v6699_v31  ;;  %5937 = vrsqrt.f32 %v1062_v14  ;;  %v1032_v6 = vmul.f32 0.015625, %v984_v1 }
 0x2fa   : > { %v1033_v7 = vmul.f32 0.015625, %v987_v50  ;;  %5939 = vrsqrt.f32 %v1063_v62 }
 0x2fb   : > { %9977 = vst [vmem:[#allocation24_spill] sm:$0xff] %v6939_v45  ;;  %5028 = vmatmul.mubr.msk.f32.gmra.mrb[6].mxu1 %vm719_vm0, %v6939_v45  ;;  %5060 = vmatmul.mubr.msk.f32.gmra.mrb[94].mxu0 %vm719_vm0, %v6939_v45  ;;  %v1162_v57 = vmul.f32 %v6592_v46, %v1123_v19  ;;  %v1064_v15 = vadd.f32 1e-05, %v1032_v6 }
 0x2fc   : > { %v5934_v63 = vpop.eup %5933  ;;  %v1065_v24 = vadd.f32 1e-05, %v1033_v7  ;;  %1516 = vmatprep.mubr.f32.mxu1 %v9789_v28  ;;  %1773 = vmatprep.mubr.f32.mxu0 %v9789_v28  ;;  %v990_v31 = vpop.xlane.xlu1 %989 }
 0x2fd   : > { %v993_v3 = vpop.xlane.xlu0 %992  ;;  %v6950_v47 = vadd.f32 %v6604_v59, %v1162_v57  ;;  %v1124_v60 = vmul.f32 %v5934_v63, %v6713_v27  ;;  %5941 = vrsqrt.f32 %v1064_v15  ;;  %v1034_v0 = vmul.f32 0.015625, %v990_v31 }
 0x2fe   : > { %5943 = vrsqrt.f32 %v1065_v24  ;;  %v1035_v51 = vmul.f32 0.015625, %v993_v3 }
 0x2ff   : > { %9978 = vst [vmem:[#allocation25_spill] sm:$0xff] %v6950_v47  ;;  %5029 = vmatmul.mubr.msk.f32.gmra.mrb[8].mxu1 %vm719_vm0, %v6950_v47  ;;  %5061 = vmatmul.mubr.msk.f32.gmra.mrb[96].mxu0 %vm719_vm0, %v6950_v47  ;;  %v1163_v52 = vmul.f32 %v6592_v46, %v1124_v60  ;;  %v1066_v5 = vadd.f32 1e-05, %v1034_v0 }
 0x300   : > { %v5936_v55 = vpop.eup %5935  ;;  %1522 = vmatprep.mubr.f32.mxu1 %v9789_v28  ;;  %1779 = vmatprep.mubr.f32.mxu0 %v9789_v28  ;;  %v996_v40 = vpop.xlane.xlu1 %995  ;;  %v1067_v18 = vadd.f32 1e-05, %v1035_v51 }
 0x301   : > { %v6961_v27 = vadd.f32 %v6604_v59, %v1163_v52  ;;  %v1125_v26 = vmul.f32 %v5936_v55, %v6727_v49  ;;  %5945 = vrsqrt.f32 %v1066_v5  ;;  %v1036_v54 = vmul.f32 0.015625, %v996_v40  ;;  %v999_v39 = vpop.xlane.xlu0 %998 }
 0x302   : > { %5947 = vrsqrt.f32 %v1067_v18  ;;  %v1037_v50 = vmul.f32 0.015625, %v999_v39 }
 0x303   : > { %9979 = vst [vmem:[#allocation26_spill] sm:$0xff] %v6961_v27  ;;  %5030 = vmatmul.mubr.msk.f32.gmra.mrb[10].mxu1 %vm719_vm0, %v6961_v27  ;;  %5062 = vmatmul.mubr.msk.f32.gmra.mrb[98].mxu0 %vm719_vm0, %v6961_v27  ;;  %v1164_v43 = vmul.f32 %v6592_v46, %v1125_v26  ;;  %v5938_v9 = vpop.eup %5937  ;;  %v1068_v1 = vadd.f32 1e-05, %v1036_v54 }
 0x304   : > { %1528 = vmatprep.mubr.f32.mxu1 %v9789_v28  ;;  %1785 = vmatprep.mubr.f32.mxu0 %v9789_v28  ;;  %v5940_v12 = vpop.eup %5939  ;;  %v1126_v61 = vmul.f32 %v5938_v9, %v6741_v35  ;;  %v1002_v19 = vpop.xlane.xlu1 %1001  ;;  %v1069_v57 = vadd.f32 1e-05, %v1037_v50 }
 0x305   : > { %v6972_v49 = vadd.f32 %v6604_v59, %v1164_v43  ;;  %v1127_v34 = vmul.f32 %v5940_v12, %v6744_v23  ;;  %5949 = vrsqrt.f32 %v1068_v1  ;;  %v1038_v63 = vmul.f32 0.015625, %v1002_v19  ;;  %v1005_v15 = vpop.xlane.xlu0 %1004 }
 0x306   : > { %v1165_v14 = vmul.f32 %v6592_v46, %v1126_v61  ;;  %5951 = vrsqrt.f32 %v1069_v57  ;;  %v1039_v0 = vmul.f32 0.015625, %v1005_v15 }
 0x307   : > { %9980 = vst [vmem:[#allocation27_spill] sm:$0xff] %v6972_v49  ;;  %5031 = vmatmul.mubr.msk.f32.gmra.mrb[12].mxu1 %vm719_vm0, %v6972_v49  ;;  %5063 = vmatmul.mubr.msk.f32.gmra.mrb[100].mxu0 %vm719_vm0, %v6972_v49  ;;  %v5942_v62 = vpop.eup %5941  ;;  %v1166_v23 = vmul.f32 %v6592_v46, %v1127_v34  ;;  %v1070_v60 = vadd.f32 1e-05, %v1038_v63 }
 0x308   : > { %1534 = vmatprep.mubr.f32.mxu1 %v9789_v28  ;;  %1791 = vmatprep.mubr.f32.mxu0 %v9789_v28  ;;  %v6984_v35 = vadd.f32 %v6604_v59, %v1165_v14  ;;  %v1128_v6 = vmul.f32 %v5942_v62, %v6760_v25  ;;  %v5944_v7 = vpop.eup %5943  ;;  %v1008_v52 = vpop.xlane.xlu1 %1007  ;;  %v1071_v40 = vadd.f32 1e-05, %v1039_v0 }
 0x309   : > { %v6995_v24 = vadd.f32 %v6604_v59, %v1166_v23  ;;  %v1129_v31 = vmul.f32 %v5944_v7, %v6763_v10  ;;  %5953 = vrsqrt.f32 %v1070_v60  ;;  %v1040_v26 = vmul.f32 0.015625, %v1008_v52 }
 0x30a   : > { %9981 = vst [vmem:[#allocation28_spill] sm:$0xff] %v6984_v35  ;;  %v1167_v25 = vmul.f32 %v6592_v46, %v1128_v6  ;;  %5955 = vrsqrt.f32 %v1071_v40 }
 0x30b   : > { %5032 = vmatmul.mubr.msk.f32.gmra.mrb[14].mxu1 %vm719_vm0, %v6984_v35  ;;  %5064 = vmatmul.mubr.msk.f32.gmra.mrb[102].mxu0 %vm719_vm0, %v6984_v35  ;;  %9982 = vst [vmem:[#allocation29_spill] sm:$0xff] %v6995_v24  ;;  %v5946_v3 = vpop.eup %5945  ;;  %v1168_v10 = vmul.f32 %v6592_v46, %v1129_v31  ;;  %v1072_v54 = vadd.f32 1e-05, %v1040_v26 }
 0x30c   : > { %1540 = vmatprep.mubr.f32.mxu1 %v9789_v28  ;;  %1797 = vmatprep.mubr.f32.mxu0 %v9789_v28  ;;  %v7006_v55 = vadd.f32 %v6604_v59, %v1167_v25  ;;  %v1130_v5 = vmul.f32 %v5946_v3, %v6780_v48  ;;  %v5948_v51 = vpop.eup %5947 }
 0x30d   : > { %v7017_v43 = vadd.f32 %v6604_v59, %v1168_v10  ;;  %v1131_v48 = vmul.f32 %v5948_v51, %v6783_v53  ;;  %5957 = vrsqrt.f32 %v1072_v54 }
 0x30e   : > { %9983 = vst [vmem:[#allocation30_spill] sm:$0xff] %v7006_v55  ;;  %v1169_v9 = vmul.f32 %v6592_v46, %v1130_v5 }
 0x30f   : > { %5033 = vmatmul.mubr.msk.f32.gmra.mrb[16].mxu1 %vm719_vm0, %v6995_v24  ;;  %5065 = vmatmul.mubr.msk.f32.gmra.mrb[104].mxu0 %vm719_vm0, %v6995_v24  ;;  %9984 = vst [vmem:[#allocation31_spill] sm:$0xff] %v7017_v43  ;;  %v5950_v18 = vpop.eup %5949  ;;  %v1170_v39 = vmul.f32 %v6592_v46, %v1131_v48 }
 0x310   : > { %1546 = vmatprep.mubr.f32.mxu1 %v9789_v28  ;;  %1803 = vmatprep.mubr.f32.mxu0 %v9789_v28  ;;  %v7028_v12 = vadd.f32 %v6604_v59, %v1169_v9  ;;  %v1132_v53 = vmul.f32 %v5950_v18, %v6800_v11  ;;  %v5952_v61 = vpop.eup %5951 }
 0x311   : > { %v7041_v14 = vadd.f32 %v6604_v59, %v1170_v39  ;;  %v1133_v11 = vmul.f32 %v5952_v61, %v6803_v17 }
 0x312   : > { %9985 = vst [vmem:[#allocation32_spill] sm:$0xff] %v7028_v12  ;;  %v1171_v62 = vmul.f32 %v6592_v46, %v1132_v53 }
 0x313   : > { %5034 = vmatmul.mubr.msk.f32.gmra.mrb[18].mxu1 %vm719_vm0, %v7006_v55  ;;  %5066 = vmatmul.mubr.msk.f32.gmra.mrb[106].mxu0 %vm719_vm0, %v7006_v55  ;;  %9986 = vst [vmem:[#allocation33_spill] sm:$0xff] %v7041_v14  ;;  %v5954_v1 = vpop.eup %5953  ;;  %v1172_v17 = vmul.f32 %v6592_v46, %v1133_v11  ;;  %v9791_v11 = vlaneseq }
 0x314   : > { %1552 = vmatprep.mubr.f32.mxu1 %v9789_v28  ;;  %1809 = vmatprep.mubr.f32.mxu0 %v9789_v28  ;;  %v7056_v23 = vadd.f32 %v6604_v59, %v1171_v62  ;;  %v1134_v6 = vmul.f32 %v5954_v1, %v6820_v44  ;;  %v5956_v7 = vpop.eup %5955 }
 0x315   : > { %v7071_v15 = vadd.f32 %v6604_v59, %v1172_v17  ;;  %v1135_v25 = vmul.f32 %v5956_v7, %v6823_v36 }
 0x316   : > { %9987 = vst [vmem:[#allocation34_spill] sm:$0xff] %v7056_v23  ;;  %v1173_v44 = vmul.f32 %v6592_v46, %v1134_v6  ;;  %v7144_v6 = vshrl.u32 %v9791_v11, 7 }
 0x317   : > { %5035 = vmatmul.mubr.msk.f32.gmra.mrb[20].mxu1 %vm719_vm0, %v7017_v43  ;;  %5067 = vmatmul.mubr.msk.f32.gmra.mrb[108].mxu0 %vm719_vm0, %v7017_v43  ;;  %9988 = vst [vmem:[#allocation35_spill] sm:$0xff] %v7071_v15  ;;  %v5958_v31 = vpop.eup %5957  ;;  %v1174_v36 = vmul.f32 %v6592_v46, %v1135_v25 }
 0x318   : > { %1558 = vmatprep.mubr.f32.mxu1 %v9789_v28  ;;  %1815 = vmatprep.mubr.f32.mxu0 %v9789_v28  ;;  %v7086_v0 = vadd.f32 %v6604_v59, %v1173_v44  ;;  %v1136_v52 = vmul.f32 %v5958_v31, %v6840_v16  ;;  %9992 = vst [vmem:[#allocation39_spill] sm:$0xff] %v7144_v6  ;;  %v1989_v25 = vsub.s32 0, %v7144_v6  ;;  %v1993_v31 = vsub.s32 1, %v7144_v6 }
 0x319   : > { %v7101_v51 = vadd.f32 %v6604_v59, %v1174_v36  ;;  %v1215_v36 = vld [vmem:[%s9781_s7] sm:$0xf] }
 0x31a   : > { %9989 = vst [vmem:[#allocation36_spill] sm:$0xff] %v7086_v0  ;;  %v1175_v40 = vmul.f32 %v6592_v46, %v1136_v52 }
 0x31b   : > { %5036 = vmatmul.mubr.msk.f32.gmra.mrb[22].mxu1 %vm719_vm0, %v7028_v12  ;;  %5068 = vmatmul.mubr.msk.f32.gmra.mrb[110].mxu0 %vm719_vm0, %v7028_v12  ;;  %9990 = vst [vmem:[#allocation37_spill] sm:$0xff] %v7101_v51 }
 0x31c   : > { %1564 = vmatprep.mubr.f32.mxu1 %v9789_v28  ;;  %1821 = vmatprep.mubr.f32.mxu0 %v9789_v28  ;;  %v7038_v34 = vpop.f32.mrb[32].mxu0  ;;  %v7115_v9 = vadd.f32 %v6604_v59, %v1175_v40 }
 0x31d   : > { %v7045_v50 = vpop.f32.mrb[33].mxu0  ;;  %v1858_v11 = vmul.f32 2.0, %v7038_v34 }
 0x31e   : > { %9991 = vst [vmem:[#allocation38_spill] sm:$0xff] %v7115_v9 }
 0x31f   : > { %5037 = vmatmul.mubr.msk.f32.gmra.mrb[24].mxu1 %vm719_vm0, %v7041_v14  ;;  %5069 = vmatmul.mubr.msk.f32.gmra.mrb[112].mxu0 %vm719_vm0, %v7041_v14 }
 0x320   : > { %1570 = vmatprep.mubr.f32.mxu1 %v9789_v28  ;;  %1827 = vmatprep.mubr.f32.mxu0 %v9789_v28  ;;  %v7053_v19 = vpop.f32.mrb[34].mxu0 }
 0x321   : > { %v7060_v57 = vpop.f32.mrb[35].mxu0  ;;  %v1862_v34 = vmul.f32 2.0, %v7053_v19 }
 0x323   : > { %5038 = vmatmul.mubr.msk.f32.gmra.mrb[26].mxu1 %vm719_vm0, %v7056_v23  ;;  %5070 = vmatmul.mubr.msk.f32.gmra.mrb[114].mxu0 %vm719_vm0, %v7056_v23  ;;  %v2001_v23 = vsub.s32 3, %v7144_v6 }
 0x324   : > { %1576 = vmatprep.mubr.f32.mxu1 %v9789_v28  ;;  %1833 = vmatprep.mubr.f32.mxu0 %v9789_v28  ;;  %v7068_v63 = vpop.f32.mrb[36].mxu0 }
 0x325   : > { %v7075_v3 = vpop.f32.mrb[37].mxu0  ;;  %v1866_v24 = vmul.f32 2.0, %v7068_v63 }
 0x327   : > { %5039 = vmatmul.mubr.msk.f32.gmra.mrb[28].mxu1 %vm719_vm0, %v7071_v15  ;;  %5071 = vmatmul.mubr.msk.f32.gmra.mrb[116].mxu0 %vm719_vm0, %v7071_v15 }
 0x328   : > { %1582 = vmatprep.mubr.f32.mxu1 %v9789_v28  ;;  %1839 = vmatprep.mubr.f32.mxu0 %v9789_v28  ;;  %v7083_v60 = vpop.f32.mrb[38].mxu0 }
 0x329   : > { %v7090_v10 = vpop.f32.mrb[39].mxu0 }
 0x32a   : > { %v1871_v27 = vmul.f32 2.0, %v7090_v10 }
 0x32b   : > { %5040 = vmatmul.mubr.msk.f32.gmra.mrb[30].mxu1 %vm719_vm0, %v7086_v0  ;;  %5072 = vmatmul.mubr.msk.f32.gmra.mrb[118].mxu0 %vm719_vm0, %v7086_v0  ;;  %v7164_v0 = vrot.slane %v1215_v36, %v1993_v31  ;;  %v7181_v31 = vrot.slane %v1215_v36, %v2001_v23 }
 0x32c   : > { %1588 = vmatprep.mubr.f32.mxu1 %v9789_v28  ;;  %1845 = vmatprep.mubr.f32.mxu0 %v9789_v28  ;;  %v7098_v5 = vpop.f32.mrb[40].mxu0 }
 0x32d   : > { %v7104_v16 = vpop.f32.mrb[41].mxu0 }
 0x32f   : > { %5041 = vmatmul.mubr.msk.f32.gmra.mrb[32].mxu1 %vm719_vm0, %v7101_v51  ;;  %5073 = vmatmul.mubr.msk.f32.gmra.mrb[120].mxu0 %vm719_vm0, %v7101_v51  ;;  %v1859_v51 = vmul.f32 2.0, %v7045_v50  ;;  %v1863_v50 = vmul.f32 2.0, %v7060_v57 }
 0x330   : > { %1594 = vmatprep.mubr.f32.mxu1 %v9789_v28  ;;  %1851 = vmatprep.mubr.f32.mxu0 %v9789_v28  ;;  %v7112_v26 = vpop.f32.mrb[42].mxu0  ;;  %v1997_v28 = vsub.s32 2, %v7144_v6 }
 0x331   : > { %v7117_v48 = vpop.f32.mrb[43].mxu0  ;;  %v7177_v55 = vsub.f32 %v7164_v0, %v1859_v51  ;;  %v7191_v19 = vsub.f32 %v7164_v0, %v1863_v50  ;;  %v1870_v50 = vmul.f32 2.0, %v7083_v60 }
 0x332   : > { %v7171_v12 = vrot.slane %v1215_v36, %v1997_v28  ;;  %v1867_v28 = vmul.f32 2.0, %v7075_v3 }
 0x333   : > { %5042 = vmatmul.mubr.msk.f32.gmra.mrb[34].mxu1 %vm719_vm0, %v7115_v9  ;;  %5074 = vmatmul.mubr.msk.f32.gmra.mrb[122].mxu0 %vm719_vm0, %v7115_v9  ;;  %v7161_v9 = vrot.slane %v1215_v36, %v1989_v25 }
 0x334   : > { %v7123_v46 = vpop.f32.mrb[44].mxu0 }
 0x335   : > { %v7125_v18 = vpop.f32.mrb[45].mxu0  ;;  %v7174_v43 = vsub.f32 %v7161_v9, %v1858_v11  ;;  %v7188_v51 = vsub.f32 %v7161_v9, %v1862_v34  ;;  %v7200_v36 = vsub.f32 %v7161_v9, %v1866_v24  ;;  %v7204_v34 = vsub.f32 %v7164_v0, %v1867_v28 }
 0x336   : > { %v1883_v21 = vmul.f32 2.0, %v7125_v18 }
 0x337   : > { %v2135_v11 = vmin.f32 %v7174_v43, %v7177_v55  ;;  %v2145_v10 = vmin.f32 %v7200_v36, %v7204_v34 }
 0x338   : > { %v7127_v54 = vpop.f32.mrb[46].mxu0 }
 0x339   : > { %v7129_v39 = vpop.f32.mrb[47].mxu0 }
 0x33c   : > { %v7131_v53 = vpop.f32.mrb[48].mxu0 }
 0x33d   : > { %v7133_v59 = vpop.f32.mrb[49].mxu0 }
 0x340   : > { %v7135_v61 = vpop.f32.mrb[50].mxu0 }
 0x341   : > { %v7137_v62 = vpop.f32.mrb[51].mxu0 }
 0x342   : > { %v1895_v8 = vmul.f32 2.0, %v7137_v62 }
 0x344   : > { %v7139_v1 = vpop.f32.mrb[52].mxu0 }
 0x345   : > { %v7141_v17 = vpop.f32.mrb[53].mxu0 }
 0x348   : > { %v7146_v7 = vpop.f32.mrb[54].mxu0 }
 0x349   : > { %v7148_v44 = vpop.f32.mrb[55].mxu0 }
 0x34c   : > { %v7155_v52 = vpop.f32.mrb[56].mxu0 }
 0x34d   : > { %v7157_v40 = vpop.f32.mrb[57].mxu0 }
 0x34e   : > { %v1907_v30 = vmul.f32 2.0, %v7157_v40 }
 0x350   : > { %v7166_v15 = vpop.f32.mrb[58].mxu0 }
 0x351   : > { %v7169_v14 = vpop.f32.mrb[59].mxu0 }
 0x354   : > { %v1667_v25 = vpop.f32.mrb[60].mxu0 }
 0x355   : > { %v1860_v6 = vmul.f32 2.0, %v1667_v25  ;;  %v1669_v35 = vpop.f32.mrb[61].mxu0 }
 0x356   : > { %v1861_v49 = vmul.f32 2.0, %v1669_v35 }
 0x357   : > { %v7194_v57 = vsub.f32 %v7171_v12, %v1860_v6 }
 0x358   : > { %v7197_v23 = vsub.f32 %v7181_v31, %v1861_v49  ;;  %v1673_v63 = vpop.f32.mrb[62].mxu0  ;;  %v2140_v49 = vmin.f32 %v7188_v51, %v7191_v19 }
 0x359   : > { %v1864_v35 = vmul.f32 2.0, %v1673_v63  ;;  %v1675_v3 = vpop.f32.mrb[63].mxu0  ;;  %v2136_v25 = vmin.f32 %v2135_v11, %v7194_v57 }
 0x35a   : > { %v1865_v6 = vmul.f32 2.0, %v1675_v3  ;;  %v7221_v3 = vsub.f32 %v7161_v9, %v1870_v50  ;;  %v1878_v50 = vmul.f32 2.0, %v7112_v26 }
 0x35b   : > { %v7211_v47 = vsub.f32 %v7171_v12, %v1864_v35  ;;  %v2137_v24 = vmin.f32 %v2136_v25, %v7197_v23  ;;  %v7224_v35 = vsub.f32 %v7164_v0, %v1871_v27  ;;  %v1874_v25 = vmul.f32 2.0, %v7098_v5 }
 0x35c   : > { %v7215_v63 = vsub.f32 %v7181_v31, %v1865_v6  ;;  %v1679_v11 = vpop.f32.mrb[64].mxu0  ;;  %v1875_v6 = vmul.f32 2.0, %v7104_v16  ;;  %v1879_v16 = vmul.f32 2.0, %v7117_v48 }
 0x35d   : > { %v1868_v45 = vmul.f32 2.0, %v1679_v11  ;;  %v1681_v28 = vpop.f32.mrb[65].mxu0  ;;  %2138 = vmin.xlane.f32.xlu0 %v2137_v24  ;;  %v2141_v60 = vmin.f32 %v2140_v49, %v7211_v47  ;;  %v2150_v5 = vmin.f32 %v7221_v3, %v7224_v35 }
 0x35e   : > { %v1869_v22 = vmul.f32 2.0, %v1681_v28  ;;  %v7241_v28 = vsub.f32 %v7161_v9, %v1874_v25 }
 0x35f   : > { %v7229_v11 = vsub.f32 %v7171_v12, %v1868_v45  ;;  %v2142_v24 = vmin.f32 %v2141_v60, %v7215_v63 }
 0x360   : > { %v7233_v49 = vsub.f32 %v7181_v31, %v1869_v22  ;;  %v1685_v13 = vpop.f32.mrb[66].mxu0  ;;  %v7244_v22 = vsub.f32 %v7164_v0, %v1875_v6  ;;  %v7258_v6 = vsub.f32 %v7164_v0, %v1879_v16 }
 0x361   : > { %v1872_v4 = vmul.f32 2.0, %v1685_v13  ;;  %v1687_v41 = vpop.f32.mrb[67].mxu0  ;;  %2143 = vmin.xlane.f32.xlu1 %v2142_v24  ;;  %v2146_v27 = vmin.f32 %v2145_v10, %v7229_v11  ;;  %v7254_v24 = vsub.f32 %v7161_v9, %v1878_v50 }
 0x362   : > { %v1873_v45 = vmul.f32 2.0, %v1687_v41 }
 0x363   : > { %v7247_v60 = vsub.f32 %v7171_v12, %v1872_v4  ;;  %v2147_v13 = vmin.f32 %v2146_v27, %v7233_v49  ;;  %v1882_v4 = vmul.f32 2.0, %v7123_v46  ;;  %v2160_v18 = vmin.f32 %v7254_v24, %v7258_v6 }
 0x364   : > { %v7251_v26 = vsub.f32 %v7181_v31, %v1873_v45  ;;  %v1691_v10 = vpop.f32.mrb[68].mxu0  ;;  %v2155_v45 = vmin.f32 %v7241_v28, %v7244_v22 }
 0x365   : > { %v1876_v48 = vmul.f32 2.0, %v1691_v10  ;;  %v1693_v41 = vpop.f32.mrb[69].mxu0  ;;  %2148 = vmin.xlane.f32.xlu0 %v2147_v13  ;;  %v2151_v25 = vmin.f32 %v2150_v5, %v7247_v60 }
 0x366   : > { %v1877_v27 = vmul.f32 2.0, %v1693_v41  ;;  %v7275_v41 = vsub.f32 %v7161_v9, %v1882_v4  ;;  %v1890_v4 = vmul.f32 2.0, %v7131_v53 }
 0x367   : > { %v7265_v37 = vsub.f32 %v7171_v12, %v1876_v48  ;;  %v2152_v50 = vmin.f32 %v2151_v25, %v7251_v26  ;;  %v7278_v48 = vsub.f32 %v7164_v0, %v1883_v21  ;;  %v1886_v25 = vmul.f32 2.0, %v7127_v54 }
 0x368   : > { %v7269_v13 = vsub.f32 %v7181_v31, %v1877_v27  ;;  %v1697_v5 = vpop.f32.mrb[70].mxu0  ;;  %v1887_v27 = vmul.f32 2.0, %v7129_v39  ;;  %v1891_v39 = vmul.f32 2.0, %v7133_v59 }
 0x369   : > { %v1880_v10 = vmul.f32 2.0, %v1697_v5  ;;  %v1699_v16 = vpop.f32.mrb[71].mxu0  ;;  %2153 = vmin.xlane.f32.xlu1 %v2152_v50  ;;  %v2156_v46 = vmin.f32 %v2155_v45, %v7265_v37  ;;  %v2165_v54 = vmin.f32 %v7275_v41, %v7278_v48 }
 0x36a   : > { %v1881_v42 = vmul.f32 2.0, %v1699_v16  ;;  %v7295_v16 = vsub.f32 %v7161_v9, %v1886_v25 }
 0x36b   : > { %v7283_v5 = vsub.f32 %v7171_v12, %v1880_v10  ;;  %v2157_v50 = vmin.f32 %v2156_v46, %v7269_v13 }
 0x36c   : > { %v7287_v45 = vsub.f32 %v7181_v31, %v1881_v42  ;;  %v1703_v29 = vpop.f32.mrb[72].mxu0  ;;  %v7298_v42 = vsub.f32 %v7164_v0, %v1887_v27  ;;  %v7312_v27 = vsub.f32 %v7164_v0, %v1891_v39 }
 0x36d   : > { %9993 = vst [vmem:[#allocation40_spill] sm:$0xff] %v7283_v5  ;;  %v1884_v58 = vmul.f32 2.0, %v1703_v29  ;;  %v1705_v20 = vpop.f32.mrb[73].mxu0  ;;  %2158 = vmin.xlane.f32.xlu0 %v2157_v50  ;;  %v2161_v21 = vmin.f32 %v2160_v18, %v7283_v5  ;;  %v7308_v50 = vsub.f32 %v7161_v9, %v1890_v4 }
 0x36e   : > { %9994 = vst [vmem:[#allocation41_spill] sm:$0xff] %v7287_v45  ;;  %v1885_v10 = vmul.f32 2.0, %v1705_v20  ;;  %9996 = vst [vmem:[#allocation43_spill] sm:$0xff] %v7312_v27 }
 0x36f   : > { %v7301_v46 = vsub.f32 %v7171_v12, %v1884_v58  ;;  %v2162_v29 = vmin.f32 %v2161_v21, %v7287_v45  ;;  %9995 = vst [vmem:[#allocation42_spill] sm:$0xff] %v7308_v50  ;;  %v1894_v58 = vmul.f32 2.0, %v7135_v61  ;;  %v2175_v62 = vmin.f32 %v7308_v50, %v7312_v27 }
 0x370   : > { %v7305_v53 = vsub.f32 %v7181_v31, %v1885_v10  ;;  %v1709_v18 = vpop.f32.mrb[74].mxu0  ;;  %v2170_v10 = vmin.f32 %v7295_v16, %v7298_v42 }
 0x371   : > { %v1888_v59 = vmul.f32 2.0, %v1709_v18  ;;  %v1711_v20 = vpop.f32.mrb[75].mxu0  ;;  %2163 = vmin.xlane.f32.xlu1 %v2162_v29  ;;  %v2166_v25 = vmin.f32 %v2165_v54, %v7301_v46 }
 0x372   : > { %v1889_v21 = vmul.f32 2.0, %v1711_v20  ;;  %v7329_v20 = vsub.f32 %v7161_v9, %v1894_v58  ;;  %v1902_v58 = vmul.f32 2.0, %v7146_v7 }
 0x373   : > { %v7319_v33 = vsub.f32 %v7171_v12, %v1888_v59  ;;  %v2167_v4 = vmin.f32 %v2166_v25, %v7305_v53  ;;  %v7332_v59 = vsub.f32 %v7164_v0, %v1895_v8  ;;  %v1898_v25 = vmul.f32 2.0, %v7139_v1 }
 0x374   : > { %v7323_v29 = vsub.f32 %v7181_v31, %v1889_v21  ;;  %v1715_v54 = vpop.f32.mrb[76].mxu0  ;;  %9998 = vst [vmem:[#allocation45_spill] sm:$0xff] %v7329_v20  ;;  %v1899_v21 = vmul.f32 2.0, %v7141_v17  ;;  %v1903_v17 = vmul.f32 2.0, %v7148_v44 }
 0x375   : > { %v1892_v18 = vmul.f32 2.0, %v1715_v54  ;;  %v1717_v39 = vpop.f32.mrb[77].mxu0  ;;  %2168 = vmin.xlane.f32.xlu0 %v2167_v4  ;;  %v2171_v61 = vmin.f32 %v2170_v10, %v7319_v33  ;;  %9999 = vst [vmem:[#allocation46_spill] sm:$0xff] %v7332_v59  ;;  %v2180_v1 = vmin.f32 %v7329_v20, %v7332_v59 }
 0x376   : > { %9997 = vst [vmem:[#allocation44_spill] sm:$0xff] %v7323_v29  ;;  %v1893_v38 = vmul.f32 2.0, %v1717_v39  ;;  %v7349_v39 = vsub.f32 %v7161_v9, %v1898_v25 }
 0x377   : > { %v7337_v54 = vsub.f32 %v7171_v12, %v1892_v18  ;;  %v2172_v4 = vmin.f32 %v2171_v61, %v7323_v29 }
 0x378   : > { %v7341_v10 = vsub.f32 %v7181_v31, %v1893_v38  ;;  %v1721_v2 = vpop.f32.mrb[78].mxu0  ;;  %10002 = vst [vmem:[#allocation49_spill] sm:$0xff] %v7349_v39  ;;  %v7352_v38 = vsub.f32 %v7164_v0, %v1899_v21  ;;  %v7366_v21 = vsub.f32 %v7164_v0, %v1903_v17 }
 0x379   : > { %10000 = vst [vmem:[#allocation47_spill] sm:$0xff] %v7337_v54  ;;  %v1896_v32 = vmul.f32 2.0, %v1721_v2  ;;  %v1723_v56 = vpop.f32.mrb[79].mxu0  ;;  %2173 = vmin.xlane.f32.xlu1 %v2172_v4  ;;  %v2176_v8 = vmin.f32 %v2175_v62, %v7337_v54  ;;  %v7362_v4 = vsub.f32 %v7161_v9, %v1902_v58 }
 0x37a   : > { %10001 = vst [vmem:[#allocation48_spill] sm:$0xff] %v7341_v10  ;;  %v1897_v18 = vmul.f32 2.0, %v1723_v56  ;;  %10003 = vst [vmem:[#allocation50_spill] sm:$0xff] %v7352_v38 }
 0x37b   : > { %v7355_v61 = vsub.f32 %v7171_v12, %v1896_v32  ;;  %v2177_v2 = vmin.f32 %v2176_v8, %v7341_v10  ;;  %10006 = vst [vmem:[#allocation53_spill] sm:$0xff] %v7362_v4  ;;  %10007 = vst [vmem:[#allocation54_spill] sm:$0xff] %v7366_v21  ;;  %v1906_v32 = vmul.f32 2.0, %v7155_v52  ;;  %v2190_v40 = vmin.f32 %v7362_v4, %v7366_v21 }
 0x37c   : > { %v7359_v7 = vsub.f32 %v7181_v31, %v1897_v18  ;;  %v1727_v62 = vpop.f32.mrb[80].mxu0  ;;  %v2185_v18 = vmin.f32 %v7349_v39, %v7352_v38 }
 0x37d   : > { %10004 = vst [vmem:[#allocation51_spill] sm:$0xff] %v7355_v61  ;;  %v1900_v44 = vmul.f32 2.0, %v1727_v62  ;;  %v1729_v56 = vpop.f32.mrb[81].mxu0  ;;  %2178 = vmin.xlane.f32.xlu0 %v2177_v2  ;;  %v2181_v25 = vmin.f32 %v2180_v1, %v7355_v61 }
 0x37e   : > { %10005 = vst [vmem:[#allocation52_spill] sm:$0xff] %v7359_v7  ;;  %v1901_v8 = vmul.f32 2.0, %v1729_v56  ;;  %v7383_v56 = vsub.f32 %v7161_v9, %v1906_v32 }
 0x37f   : > { %v7373_v10 = vsub.f32 %v7171_v12, %v1900_v44  ;;  %v2182_v58 = vmin.f32 %v2181_v25, %v7359_v7  ;;  %v7386_v44 = vsub.f32 %v7164_v0, %v1907_v30  ;;  %v1910_v25 = vmul.f32 2.0, %v7166_v15 }
 0x380   : > { %v7377_v2 = vsub.f32 %v7181_v31, %v1901_v8  ;;  %v1733_v1 = vpop.f32.mrb[82].mxu0  ;;  %10010 = vst [vmem:[#allocation57_spill] sm:$0xff] %v7383_v56  ;;  %v1911_v8 = vmul.f32 2.0, %v7169_v14 }
 0x381   : > { %10008 = vst [vmem:[#allocation55_spill] sm:$0xff] %v7373_v10  ;;  %v1904_v62 = vmul.f32 2.0, %v1733_v1  ;;  %v1735_v17 = vpop.f32.mrb[83].mxu0  ;;  %2183 = vmin.xlane.f32.xlu1 %v2182_v58  ;;  %v2186_v52 = vmin.f32 %v2185_v18, %v7373_v10  ;;  %10011 = vst [vmem:[#allocation58_spill] sm:$0xff] %v7386_v44  ;;  %v7401_v14 = vsub.f32 %v7161_v9, %v1910_v25 }
 0x382   : > { %10009 = vst [vmem:[#allocation56_spill] sm:$0xff] %v7377_v2  ;;  %v1905_v38 = vmul.f32 2.0, %v1735_v17  ;;  %v2195_v17 = vmin.f32 %v7383_v56, %v7386_v44 }
 0x383   : > { %v7391_v1 = vsub.f32 %v7171_v12, %v1904_v62  ;;  %v2187_v58 = vmin.f32 %v2186_v52, %v7377_v2  ;;  %10014 = vst [vmem:[#allocation61_spill] sm:$0xff] %v7401_v14  ;;  %v7404_v62 = vsub.f32 %v7164_v0, %v1911_v8 }
 0x384   : > { %v7395_v18 = vsub.f32 %v7181_v31, %v1905_v38  ;;  %v1739_v21 = vpop.f32.mrb[84].mxu0 }
 0x385   : > { %10012 = vst [vmem:[#allocation59_spill] sm:$0xff] %v7391_v1  ;;  %v1908_v4 = vmul.f32 2.0, %v1739_v21  ;;  %v1741_v32 = vpop.f32.mrb[85].mxu0  ;;  %2188 = vmin.xlane.f32.xlu0 %v2187_v58  ;;  %v2191_v30 = vmin.f32 %v2190_v40, %v7391_v1  ;;  %10015 = vst [vmem:[#allocation62_spill] sm:$0xff] %v7404_v62  ;;  %v2200_v25 = vmin.f32 %v7401_v14, %v7404_v62 }
 0x386   : > { %10013 = vst [vmem:[#allocation60_spill] sm:$0xff] %v7395_v18  ;;  %v1909_v15 = vmul.f32 2.0, %v1741_v32 }
 0x387   : > { %v7407_v52 = vsub.f32 %v7171_v12, %v1908_v4  ;;  %v2192_v38 = vmin.f32 %v2191_v30, %v7395_v18 }
 0x388   : > { %v7411_v21 = vsub.f32 %v7181_v31, %v1909_v15  ;;  %v1745_v58 = vpop.f32.mrb[86].mxu0 }
 0x389   : > { %10016 = vst [vmem:[#allocation63_spill] sm:$0xff] %v7407_v52  ;;  %v1912_v40 = vmul.f32 2.0, %v1745_v58  ;;  %v1747_v1 = vpop.f32.mrb[87].mxu0  ;;  %2193 = vmin.xlane.f32.xlu1 %v2192_v38  ;;  %v2196_v32 = vmin.f32 %v2195_v17, %v7407_v52 }
 0x38a   : > { %10017 = vst [vmem:[#allocation64_spill] sm:$0xff] %v7411_v21  ;;  %v1913_v44 = vmul.f32 2.0, %v1747_v1 }
 0x38b   : > { %v7417_v8 = vsub.f32 %v7171_v12, %v1912_v40  ;;  %v2197_v4 = vmin.f32 %v2196_v32, %v7411_v21 }
 0x38c   : > { %v7421_v30 = vsub.f32 %v7181_v31, %v1913_v44 }
 0x38d   : > { %10018 = vst [vmem:[#allocation65_spill] sm:$0xff] %v7417_v8  ;;  %2198 = vmin.xlane.f32.xlu0 %v2197_v4  ;;  %v2201_v15 = vmin.f32 %v2200_v25, %v7417_v8 }
 0x38e   : > { %10019 = vst [vmem:[#allocation66_spill] sm:$0xff] %v7421_v30 }
 0x38f   : > { %v2202_v58 = vmin.f32 %v2201_v15, %v7421_v30 }
 0x391   : > { %2203 = vmin.xlane.f32.xlu1 %v2202_v58 }
 0x3c1   : > { %v1494_v38 = vpop.f32.mrb[0].mxu1  ;;  %v1751_v17 = vpop.f32.mrb[88].mxu0 }
 0x3c2   : > { %v1914_v1 = vmul.f32 2.0, %v1494_v38  ;;  %v1496_v52 = vpop.f32.mrb[1].mxu1  ;;  %v1753_v56 = vpop.f32.mrb[89].mxu0  ;;  %v1916_v62 = vmul.f32 2.0, %v1751_v17 }
 0x3c3   : > { %v1915_v14 = vmul.f32 2.0, %v1496_v52  ;;  %v1917_v44 = vmul.f32 2.0, %v1753_v56 }
 0x3c4   : > { %v7426_v40 = vsub.f32 %v7161_v9, %v1914_v1  ;;  %v7432_v30 = vsub.f32 %v7171_v12, %v1916_v62 }
 0x3c5   : > { %v7429_v32 = vsub.f32 %v7164_v0, %v1915_v14  ;;  %v7440_v14 = vsub.f32 %v7181_v31, %v1917_v44 }
 0x3c6   : > { %10020 = vst [vmem:[#allocation67_spill] sm:$0xff] %v7426_v40  ;;  %v1500_v4 = vpop.f32.mrb[2].mxu1  ;;  %v1757_v21 = vpop.f32.mrb[90].mxu0  ;;  %10022 = vst [vmem:[#allocation69_spill] sm:$0xff] %v7432_v30 }
 0x3c7   : > { %10021 = vst [vmem:[#allocation68_spill] sm:$0xff] %v7429_v32  ;;  %v1918_v25 = vmul.f32 2.0, %v1500_v4  ;;  %v1920_v8 = vmul.f32 2.0, %v1757_v21  ;;  %v1502_v15 = vpop.f32.mrb[3].mxu1  ;;  %v1759_v58 = vpop.f32.mrb[91].mxu0  ;;  %v2205_v38 = vmin.f32 %v7426_v40, %v7429_v32  ;;  %10024 = vst [vmem:[#allocation71_spill] sm:$0xff] %v7440_v14 }
 0x3c8   : > { %v1919_v52 = vmul.f32 2.0, %v1502_v15  ;;  %v1921_v1 = vmul.f32 2.0, %v1759_v58 }
 0x3c9   : > { %v7437_v17 = vsub.f32 %v7161_v9, %v1918_v25  ;;  %v2206_v18 = vmin.f32 %v2205_v38, %v7432_v30  ;;  %v7447_v62 = vsub.f32 %v7171_v12, %v1920_v8 }
 0x3ca   : > { %v7443_v56 = vsub.f32 %v7164_v0, %v1919_v52  ;;  %v1506_v21 = vpop.f32.mrb[4].mxu1  ;;  %v1763_v4 = vpop.f32.mrb[92].mxu0  ;;  %v7456_v58 = vsub.f32 %v7181_v31, %v1921_v1 }
 0x3cb   : > { %10023 = vst [vmem:[#allocation70_spill] sm:$0xff] %v7437_v17  ;;  %10026 = vst [vmem:[#allocation73_spill] sm:$0xff] %v7447_v62  ;;  %v1922_v2 = vmul.f32 2.0, %v1506_v21  ;;  %v1508_v32 = vpop.f32.mrb[5].mxu1  ;;  %v1765_v15 = vpop.f32.mrb[93].mxu0  ;;  %v1924_v40 = vmul.f32 2.0, %v1763_v4  ;;  %v2207_v7 = vmin.f32 %v2206_v18, %v7440_v14 }
 0x3cc   : > { %10025 = vst [vmem:[#allocation72_spill] sm:$0xff] %v7443_v56  ;;  %v2210_v25 = vmin.f32 %v7437_v17, %v7443_v56  ;;  %v1923_v44 = vmul.f32 2.0, %v1508_v32  ;;  %10028 = vst [vmem:[#allocation75_spill] sm:$0xff] %v7456_v58  ;;  %v1925_v8 = vmul.f32 2.0, %v1765_v15 }
 0x3cd   : > { %v7453_v52 = vsub.f32 %v7161_v9, %v1922_v2  ;;  %2208 = vmin.xlane.f32.xlu0 %v2207_v7  ;;  %v7463_v18 = vsub.f32 %v7171_v12, %v1924_v40 }
 0x3ce   : > { %v7459_v38 = vsub.f32 %v7164_v0, %v1923_v44  ;;  %v1512_v21 = vpop.f32.mrb[6].mxu1  ;;  %v1769_v30 = vpop.f32.mrb[94].mxu0  ;;  %v2211_v10 = vmin.f32 %v2210_v25, %v7447_v62  ;;  %v7472_v7 = vsub.f32 %v7181_v31, %v1925_v8 }
 0x3cf   : > { %10027 = vst [vmem:[#allocation74_spill] sm:$0xff] %v7453_v52  ;;  %v1926_v56 = vmul.f32 2.0, %v1512_v21  ;;  %v1928_v4 = vmul.f32 2.0, %v1769_v30  ;;  %v1514_v32 = vpop.f32.mrb[7].mxu1  ;;  %v1771_v17 = vpop.f32.mrb[95].mxu0  ;;  %10030 = vst [vmem:[#allocation77_spill] sm:$0xff] %v7463_v18 }
 0x3d0   : > { %10029 = vst [vmem:[#allocation76_spill] sm:$0xff] %v7459_v38  ;;  %v2215_v2 = vmin.f32 %v7453_v52, %v7459_v38  ;;  %v1927_v1 = vmul.f32 2.0, %v1514_v32  ;;  %v2212_v44 = vmin.f32 %v2211_v10, %v7456_v58  ;;  %10032 = vst [vmem:[#allocation79_spill] sm:$0xff] %v7472_v7  ;;  %v1929_v30 = vmul.f32 2.0, %v1771_v17 }
 0x3d1   : > { %v7469_v15 = vsub.f32 %v7161_v9, %v1926_v56  ;;  %v7479_v38 = vsub.f32 %v7171_v12, %v1928_v4 }
 0x3d2   : > { %v7475_v25 = vsub.f32 %v7164_v0, %v1927_v1  ;;  %2213 = vmin.xlane.f32.xlu1 %v2212_v44  ;;  %v1518_v21 = vpop.f32.mrb[8].mxu1  ;;  %v1775_v40 = vpop.f32.mrb[96].mxu0  ;;  %v2216_v62 = vmin.f32 %v2215_v2, %v7463_v18  ;;  %v7488_v44 = vsub.f32 %v7181_v31, %v1929_v30 }
 0x3d3   : > { %10031 = vst [vmem:[#allocation78_spill] sm:$0xff] %v7469_v15  ;;  %10034 = vst [vmem:[#allocation81_spill] sm:$0xff] %v7479_v38  ;;  %v1930_v32 = vmul.f32 2.0, %v1518_v21  ;;  %v1520_v10 = vpop.f32.mrb[9].mxu1  ;;  %v1777_v52 = vpop.f32.mrb[97].mxu0  ;;  %v1932_v8 = vmul.f32 2.0, %v1775_v40 }
 0x3d4   : > { %10033 = vst [vmem:[#allocation80_spill] sm:$0xff] %v7475_v25  ;;  %v2220_v56 = vmin.f32 %v7469_v15, %v7475_v25  ;;  %v1931_v58 = vmul.f32 2.0, %v1520_v10  ;;  %v2217_v1 = vmin.f32 %v2216_v62, %v7472_v7  ;;  %10036 = vst [vmem:[#allocation83_spill] sm:$0xff] %v7488_v44  ;;  %v1933_v4 = vmul.f32 2.0, %v1777_v52 }
 0x3d5   : > { %v7485_v17 = vsub.f32 %v7161_v9, %v1930_v32  ;;  %v7495_v62 = vsub.f32 %v7171_v12, %v1932_v8 }
 0x3d6   : > { %v7491_v2 = vsub.f32 %v7164_v0, %v1931_v58  ;;  %2218 = vmin.xlane.f32.xlu0 %v2217_v1  ;;  %v1524_v21 = vpop.f32.mrb[10].mxu1  ;;  %v1781_v18 = vpop.f32.mrb[98].mxu0  ;;  %v2221_v14 = vmin.f32 %v2220_v56, %v7479_v38  ;;  %v7504_v1 = vsub.f32 %v7181_v31, %v1933_v4 }
 0x3d7   : > { %10035 = vst [vmem:[#allocation82_spill] sm:$0xff] %v7485_v17  ;;  %v1934_v25 = vmul.f32 2.0, %v1524_v21  ;;  %v1936_v40 = vmul.f32 2.0, %v1781_v18  ;;  %v1526_v10 = vpop.f32.mrb[11].mxu1  ;;  %v1783_v15 = vpop.f32.mrb[99].mxu0  ;;  %10038 = vst [vmem:[#allocation85_spill] sm:$0xff] %v7495_v62 }
 0x3d8   : > { %10037 = vst [vmem:[#allocation84_spill] sm:$0xff] %v7491_v2  ;;  %v2225_v30 = vmin.f32 %v7485_v17, %v7491_v2  ;;  %v1935_v32 = vmul.f32 2.0, %v1526_v10  ;;  %v2222_v58 = vmin.f32 %v2221_v14, %v7488_v44  ;;  %10040 = vst [vmem:[#allocation87_spill] sm:$0xff] %v7504_v1  ;;  %v1937_v18 = vmul.f32 2.0, %v1783_v15 }
 0x3d9   : > { %v7501_v52 = vsub.f32 %v7161_v9, %v1934_v25  ;;  %v7511_v2 = vsub.f32 %v7171_v12, %v1936_v40 }
 0x3da   : > { %v7507_v56 = vsub.f32 %v7164_v0, %v1935_v32  ;;  %2223 = vmin.xlane.f32.xlu1 %v2222_v58  ;;  %v1530_v21 = vpop.f32.mrb[12].mxu1  ;;  %v1787_v8 = vpop.f32.mrb[100].mxu0  ;;  %v2226_v38 = vmin.f32 %v2225_v30, %v7495_v62  ;;  %v7520_v58 = vsub.f32 %v7181_v31, %v1937_v18 }
 0x3db   : > { %10039 = vst [vmem:[#allocation86_spill] sm:$0xff] %v7501_v52  ;;  %10042 = vst [vmem:[#allocation89_spill] sm:$0xff] %v7511_v2  ;;  %v1938_v10 = vmul.f32 2.0, %v1530_v21  ;;  %v1532_v14 = vpop.f32.mrb[13].mxu1  ;;  %v1789_v17 = vpop.f32.mrb[101].mxu0  ;;  %v1940_v4 = vmul.f32 2.0, %v1787_v8 }
 0x3dc   : > { %10041 = vst [vmem:[#allocation88_spill] sm:$0xff] %v7507_v56  ;;  %v2230_v25 = vmin.f32 %v7501_v52, %v7507_v56  ;;  %v1939_v44 = vmul.f32 2.0, %v1532_v14  ;;  %v2227_v32 = vmin.f32 %v2226_v38, %v7504_v1  ;;  %10044 = vst [vmem:[#allocation91_spill] sm:$0xff] %v7520_v58  ;;  %v1941_v40 = vmul.f32 2.0, %v1789_v17 }
 0x3dd   : > { %v7517_v15 = vsub.f32 %v7161_v9, %v1938_v10  ;;  %v7527_v38 = vsub.f32 %v7171_v12, %v1940_v4 }
 0x3de   : > { %v7523_v30 = vsub.f32 %v7164_v0, %v1939_v44  ;;  %2228 = vmin.xlane.f32.xlu0 %v2227_v32  ;;  %v1536_v21 = vpop.f32.mrb[14].mxu1  ;;  %v1793_v62 = vpop.f32.mrb[102].mxu0  ;;  %v2231_v7 = vmin.f32 %v2230_v25, %v7511_v2  ;;  %v7536_v32 = vsub.f32 %v7181_v31, %v1941_v40 }
 0x3df   : > { %10043 = vst [vmem:[#allocation90_spill] sm:$0xff] %v7517_v15  ;;  %v1942_v56 = vmul.f32 2.0, %v1536_v21  ;;  %v1944_v8 = vmul.f32 2.0, %v1793_v62  ;;  %v1538_v14 = vpop.f32.mrb[15].mxu1  ;;  %v1795_v52 = vpop.f32.mrb[103].mxu0  ;;  %10046 = vst [vmem:[#allocation93_spill] sm:$0xff] %v7527_v38 }
 0x3e0   : > { %10045 = vst [vmem:[#allocation92_spill] sm:$0xff] %v7523_v30  ;;  %v2235_v18 = vmin.f32 %v7517_v15, %v7523_v30  ;;  %v1943_v10 = vmul.f32 2.0, %v1538_v14  ;;  %v2232_v44 = vmin.f32 %v2231_v7, %v7520_v58  ;;  %10048 = vst [vmem:[#allocation95_spill] sm:$0xff] %v7536_v32  ;;  %v1945_v62 = vmul.f32 2.0, %v1795_v52 }
 0x3e1   : > { %v7533_v17 = vsub.f32 %v7161_v9, %v1942_v56  ;;  %v7543_v30 = vsub.f32 %v7171_v12, %v1944_v8 }
 0x3e2   : > { %v7539_v25 = vsub.f32 %v7164_v0, %v1943_v10  ;;  %2233 = vmin.xlane.f32.xlu1 %v2232_v44  ;;  %v1542_v21 = vpop.f32.mrb[16].mxu1  ;;  %v1799_v4 = vpop.f32.mrb[104].mxu0  ;;  %v2236_v2 = vmin.f32 %v2235_v18, %v7527_v38  ;;  %v7552_v44 = vsub.f32 %v7181_v31, %v1945_v62 }
 0x3e3   : > { %10047 = vst [vmem:[#allocation94_spill] sm:$0xff] %v7533_v17  ;;  %10050 = vst [vmem:[#allocation97_spill] sm:$0xff] %v7543_v30  ;;  %v1946_v14 = vmul.f32 2.0, %v1542_v21  ;;  %v1544_v7 = vpop.f32.mrb[17].mxu1  ;;  %v1801_v15 = vpop.f32.mrb[105].mxu0  ;;  %v1948_v40 = vmul.f32 2.0, %v1799_v4 }
 0x3e4   : > { %10049 = vst [vmem:[#allocation96_spill] sm:$0xff] %v7539_v25  ;;  %v2240_v56 = vmin.f32 %v7533_v17, %v7539_v25  ;;  %v1947_v58 = vmul.f32 2.0, %v1544_v7  ;;  %v2237_v10 = vmin.f32 %v2236_v2, %v7536_v32  ;;  %10052 = vst [vmem:[#allocation99_spill] sm:$0xff] %v7552_v44  ;;  %v1949_v8 = vmul.f32 2.0, %v1801_v15 }
 0x3e5   : > { %v7549_v52 = vsub.f32 %v7161_v9, %v1946_v14  ;;  %v7559_v2 = vsub.f32 %v7171_v12, %v1948_v40 }
 0x3e6   : > { %v7555_v18 = vsub.f32 %v7164_v0, %v1947_v58  ;;  %2238 = vmin.xlane.f32.xlu0 %v2237_v10  ;;  %v1548_v21 = vpop.f32.mrb[18].mxu1  ;;  %v1805_v38 = vpop.f32.mrb[106].mxu0  ;;  %v2241_v1 = vmin.f32 %v2240_v56, %v7543_v30  ;;  %v7568_v10 = vsub.f32 %v7181_v31, %v1949_v8  ;;  %v10058_v8 = vlaneseq }
 0x3e7   : > { %10051 = vst [vmem:[#allocation98_spill] sm:$0xff] %v7549_v52  ;;  %v1950_v25 = vmul.f32 2.0, %v1548_v21  ;;  %v1550_v4 = vpop.f32.mrb[19].mxu1  ;;  %v1807_v7 = vpop.f32.mrb[107].mxu0  ;;  %10054 = vst [vmem:[#allocation101_spill] sm:$0xff] %v7559_v2  ;;  %v1952_v15 = vmul.f32 2.0, %v1805_v38 }
 0x3e8   : > { %10053 = vst [vmem:[#allocation100_spill] sm:$0xff] %v7555_v18  ;;  %v2245_v14 = vmin.f32 %v7549_v52, %v7555_v18  ;;  %v1951_v62 = vmul.f32 2.0, %v1550_v4  ;;  %v2242_v17 = vmin.f32 %v2241_v1, %v7552_v44  ;;  %10056 = vst [vmem:[#allocation103_spill] sm:$0xff] %v7568_v10  ;;  %v7578_v44 = vand.u32 127, %v10058_v8 }
 0x3e9   : > { %v7565_v58 = vsub.f32 %v7161_v9, %v1950_v25  ;;  %v1953_v25 = vmul.f32 2.0, %v1807_v7 }
 0x3ea   : > { %v7571_v56 = vsub.f32 %v7164_v0, %v1951_v62  ;;  %2243 = vmin.xlane.f32.xlu1 %v2242_v17  ;;  %v1554_v21 = vpop.f32.mrb[20].mxu1  ;;  %v1811_v40 = vpop.f32.mrb[108].mxu0  ;;  %v2246_v30 = vmin.f32 %v2245_v14, %v7559_v2  ;;  %v7581_v62 = vsub.f32 %v7171_v12, %v1952_v15 }
 0x3eb   : > { %10055 = vst [vmem:[#allocation102_spill] sm:$0xff] %v7565_v58  ;;  %v1954_v32 = vmul.f32 2.0, %v1554_v21  ;;  %v1556_v18 = vpop.f32.mrb[21].mxu1  ;;  %v1813_v4 = vpop.f32.mrb[109].mxu0  ;;  %v1956_v14 = vmul.f32 2.0, %v1811_v40  ;;  %v7591_v8 = vsub.f32 %v7181_v31, %v1953_v25 }
 0x3ec   : > { %10057 = vst [vmem:[#allocation104_spill] sm:$0xff] %v7571_v56  ;;  %v2250_v1 = vmin.f32 %v7565_v58, %v7571_v56  ;;  %v1955_v52 = vmul.f32 2.0, %v1556_v18  ;;  %v2247_v38 = vmin.f32 %v2246_v30, %v7568_v10  ;;  %10059 = vst [vmem:[#allocation105_spill] sm:$0xff] %v7581_v62  ;;  %v1957_v58 = vmul.f32 2.0, %v1813_v4 }
 0x3ed   : > { %v7584_v17 = vsub.f32 %v7161_v9, %v1954_v32  ;;  %10062 = vst [vmem:[#allocation108_spill] sm:$0xff] %v7591_v8  ;;  %v7595_v32 = vpop.xlane.xlu0 %2138 }
 0x3ee   : > { %v7587_v21 = vsub.f32 %v7164_v0, %v1955_v52  ;;  %2248 = vmin.xlane.f32.xlu1 %v2247_v38  ;;  %v1560_v2 = vpop.f32.mrb[22].mxu1  ;;  %v1817_v56 = vpop.f32.mrb[110].mxu0  ;;  %v2251_v30 = vmin.f32 %v2250_v1, %v7581_v62  ;;  %v7598_v52 = vsub.f32 %v7171_v12, %v1956_v14  ;;  %v7601_v38 = vadd.s32 128, %v7578_v44 }
 0x3ef   : > { %10060 = vst [vmem:[#allocation106_spill] sm:$0xff] %v7584_v17  ;;  %v1958_v7 = vmul.f32 2.0, %v1560_v2  ;;  %v1562_v18 = vpop.f32.mrb[23].mxu1  ;;  %v1819_v10 = vpop.f32.mrb[111].mxu0  ;;  %v1960_v25 = vmul.f32 2.0, %v1817_v56  ;;  %vm2300_vm1 = vcmp.eq.f32.partialorder %v7174_v43, %v7595_v32  ;;  %vm2301_vm2 = vcmp.eq.f32.partialorder %v7177_v55, %v7595_v32 }
 0x3f0   : > { %10061 = vst [vmem:[#allocation107_spill] sm:$0xff] %v7587_v21  ;;  %v2255_v15 = vmin.f32 %v7584_v17, %v7587_v21  ;;  %v1959_v40 = vmul.f32 2.0, %v1562_v18  ;;  %10063 = vst [vmem:[#allocation109_spill] sm:$0xff] %v7598_v52  ;;  %v7603_v2 = vpop.xlane.xlu1 %2143  ;;  %v2252_v4 = vmin.f32 %v2251_v30, %v7591_v8  ;;  %v7621_v56 = vsub.f32 %v7181_v31, %v1957_v58 }
 0x3f1   : > { %v7606_v1 = vsub.f32 %v7161_v9, %v1958_v7  ;;  %v7618_v7 = vadd.s32 256, %v7578_v44  ;;  %vm2304_vm3 = vcmp.eq.f32.partialorder %v7188_v51, %v7603_v2  ;;  %v1961_v30 = vmul.f32 2.0, %v1819_v10 }
 0x3f2   : > { %v7609_v62 = vsub.f32 %v7164_v0, %v1959_v40  ;;  %v1566_v21 = vpop.f32.mrb[24].mxu1  ;;  %v1823_v18 = vpop.f32.mrb[112].mxu0  ;;  %v2256_v39 = vmin.f32 %v2255_v15, %v7598_v52  ;;  %10066 = vst [vmem:[#allocation112_spill] sm:$0xff] %v7621_v56  ;;  %2253 = vmin.xlane.f32.xlu1 %v2252_v4  ;;  %v7626_v40 = vadd.s32 384, %v7578_v44  ;;  %vm2305_vm4 = vcmp.eq.f32.partialorder %v7191_v19, %v7603_v2 }
 0x3f3   : > { %10064 = vst [vmem:[#allocation110_spill] sm:$0xff] %v7606_v1  ;;  %v1568_v14 = vpop.f32.mrb[25].mxu1  ;;  %v1825_v17 = vpop.f32.mrb[113].mxu0  ;;  %v1962_v8 = vmul.f32 2.0, %v1566_v21  ;;  %vm2302_vm5 = vcmp.eq.f32.partialorder %v7194_v57, %v7595_v32  ;;  %v2428_v51 = vsel %vm2300_vm1, %v7578_v44, 512  ;;  %v2429_v58 = vsel %vm2301_vm2, %v7601_v38, 512 }
 0x3f4   : > { %10065 = vst [vmem:[#allocation111_spill] sm:$0xff] %v7609_v62  ;;  %v1963_v61 = vmul.f32 2.0, %v1568_v14  ;;  %v7630_v15 = vpop.xlane.xlu0 %2148  ;;  %v7643_v10 = vsub.f32 %v7171_v12, %v1960_v25  ;;  %v2260_v21 = vmin.f32 %v7606_v1, %v7609_v62  ;;  %v2432_v52 = vsel %vm2304_vm3, %v7578_v44, 512 }
 0x3f5   : > { %v1964_v59 = vmul.f32 2.0, %v1823_v18  ;;  %v1965_v20 = vmul.f32 2.0, %v1825_v17  ;;  %v2257_v43 = vmin.f32 %v2256_v39, %v7621_v56  ;;  %v2433_v55 = vsel %vm2305_vm4, %v7601_v38, 512 }
 0x3f6   : > { %v1572_v4 = vpop.f32.mrb[26].mxu1  ;;  %v1829_v14 = vpop.f32.mrb[114].mxu0  ;;  %v7654_v25 = vsub.f32 %v7181_v31, %v1961_v30  ;;  %vm2303_vm6 = vcmp.eq.f32.partialorder %v7197_v23, %v7595_v32  ;;  %v2430_v17 = vsel %vm2302_vm5, %v7618_v7, 512  ;;  %v7663_v39 = vsub.f32 %v7161_v9, %v1962_v8 }
 0x3f7   : > { %v1574_v29 = vpop.f32.mrb[27].mxu1  ;;  %v1831_v45 = vpop.f32.mrb[115].mxu0  ;;  %v7666_v18 = vsub.f32 %v7164_v0, %v1963_v61  ;;  %vm2308_vm7 = vcmp.eq.f32.partialorder %v7200_v36, %v7630_v15  ;;  %vm2309_vm8 = vcmp.eq.f32.partialorder %v7204_v34, %v7630_v15  ;;  %2258 = vmin.xlane.f32.xlu1 %v2257_v43  ;;  %v1966_v30 = vmul.f32 2.0, %v1572_v4 }
 0x3f8   : > { %10067 = vst [vmem:[#allocation113_spill] sm:$0xff] %v7654_v25  ;;  %10068 = vst [vmem:[#allocation114_spill] sm:$0xff] %v7663_v39  ;;  %v7672_v19 = vpop.xlane.xlu1 %2153  ;;  %v1968_v62 = vmul.f32 2.0, %v1829_v14  ;;  %vm2556_vm9 = vcmp.lt.s32.totalorder %v2428_v51, %v2429_v58  ;;  %v2261_v57 = vmin.f32 %v2260_v21, %v7643_v10  ;;  %v7676_v56 = vsub.f32 %v7171_v12, %v1964_v59 }
 0x3f9   : > { %10069 = vst [vmem:[#allocation115_spill] sm:$0xff] %v7666_v18  ;;  %v7679_v61 = vsub.f32 %v7181_v31, %v1965_v20  ;;  %v1967_v54 = vmul.f32 2.0, %v1574_v29  ;;  %v2557_v5 = vsel %vm2556_vm9, %v2428_v51, %v2429_v58  ;;  %v7685_v4 = vsel %vm2308_vm7, %v7578_v44, 512 }
 0x3fa   : > { %v1578_v1 = vpop.f32.mrb[28].mxu1  ;;  %v1835_v8 = vpop.f32.mrb[116].mxu0  ;;  %10070 = vst [vmem:[#allocation116_spill] sm:$0xff] %v7676_v56  ;;  %v7691_v21 = vsel %vm2309_vm8, %v7601_v38, 512  ;;  %vm2558_vm10 = vcmp.lt.s32.totalorder %v2557_v5, %v2430_v17  ;;  %v2262_v20 = vmin.f32 %v2261_v57, %v7654_v25  ;;  %vm2312_vm11 = vcmp.eq.f32.partialorder %v7221_v3, %v7672_v19 }
 0x3fb   : > { %v1580_v27 = vpop.f32.mrb[29].mxu1  ;;  %v1837_v50 = vpop.f32.mrb[117].mxu0  ;;  %vm2313_vm12 = vcmp.eq.f32.partialorder %v7224_v35, %v7672_v19  ;;  %v2431_v36 = vsel %vm2303_vm6, %v7626_v40, 512  ;;  %v2559_v29 = vsel %vm2558_vm10, %v2557_v5, %v2430_v17  ;;  %v2265_v34 = vmin.f32 %v7663_v39, %v7666_v18 }
 0x3fc   : > { %v7705_v59 = vsub.f32 %v7161_v9, %v1966_v30  ;;  %v7708_v51 = vsub.f32 %v7171_v12, %v1968_v62  ;;  %vm2560_vm13 = vcmp.lt.s32.totalorder %v2559_v29, %v2431_v36  ;;  %2263 = vmin.xlane.f32.xlu1 %v2262_v20  ;;  %v7711_v43 = vsub.f32 %v7164_v0, %v1967_v54  ;;  %v7730_v17 = vpop.xlane.xlu0 %2158 }
 0x3fd   : > { %v1969_v57 = vmul.f32 2.0, %v1831_v45  ;;  %v7713_v23 = vsel %vm2560_vm13, %v2559_v29, %v2431_v36  ;;  %vm2306_vm14 = vcmp.eq.f32.partialorder %v7211_v47, %v7603_v2  ;;  %v7721_v62 = vsel %vm2312_vm11, %v7578_v44, 512 }
 0x3fe   : > { %10071 = vst [vmem:[#allocation117_spill] sm:$0xff] %v7705_v59  ;;  %10072 = vst [vmem:[#allocation118_spill] sm:$0xff] %v7708_v51  ;;  %v1584_v58 = vpop.f32.mrb[30].mxu1  ;;  %v1841_v14 = vpop.f32.mrb[118].mxu0  ;;  %v7727_v32 = vsel %vm2313_vm12, %v7601_v38, 512  ;;  %v2563_v45 = vshra.s32 %v7713_v23, 16  ;;  %vm2307_vm15 = vcmp.eq.f32.partialorder %v7215_v63, %v7603_v2  ;;  %vm2576_vm1 = vcmp.lt.s32.totalorder %v2432_v52, %v2433_v55 }
 0x3ff   : > { %10073 = vst [vmem:[#allocation119_spill] sm:$0xff] %v7711_v43  ;;  %v1586_v5 = vpop.f32.mrb[31].mxu1  ;;  %v1970_v54 = vmul.f32 2.0, %v1578_v1  ;;  %v1843_v30 = vpop.f32.mrb[119].mxu0  ;;  %v1972_v47 = vmul.f32 2.0, %v1835_v8  ;;  %v1971_v20 = vmul.f32 2.0, %v1580_v27  ;;  %v2577_v29 = vsel %vm2576_vm1, %v2432_v52, %v2433_v55 }
 0x400   : > { %v7734_v3 = vcvt.s32.f32 %v2563_v45  ;;  %v2434_v36 = vsel %vm2306_vm14, %v7618_v7, 512  ;;  %v2266_v35 = vmin.f32 %v2265_v34, %v7676_v56  ;;  %v2270_v1 = vmin.f32 %v7705_v59, %v7711_v43  ;;  %v7759_v43 = vpop.xlane.xlu1 %2163 }
 0x401   : > { %v7741_v25 = vsub.f32 %v7181_v31, %v1969_v57  ;;  %vm2316_vm2 = vcmp.eq.f32.partialorder %v7241_v28, %v7730_v17  ;;  %vm2578_vm3 = vcmp.lt.s32.totalorder %v2577_v29, %v2434_v36  ;;  %vm2317_vm4 = vcmp.eq.f32.partialorder %v7244_v22, %v7730_v17 }
 0x402   : > { %v1590_v18 = vpop.f32.mrb[32].mxu1  ;;  %v1847_v39 = vpop.f32.mrb[120].mxu0  ;;  %2566 = vmin.xlane.f32.xlu0 %v7734_v3  ;;  %v2435_v52 = vsel %vm2307_vm15, %v7626_v40, 512  ;;  %v2579_v55 = vsel %vm2578_vm3, %v2577_v29, %v2434_v36  ;;  %v2267_v34 = vmin.f32 %v2266_v35, %v7679_v61  ;;  %v7754_v57 = vsub.f32 %v7161_v9, %v1970_v54 }
 0x403   : > { %v1592_v27 = vpop.f32.mrb[33].mxu1  ;;  %v1849_v8 = vpop.f32.mrb[121].mxu0  ;;  %v7757_v28 = vsub.f32 %v7171_v12, %v1972_v47  ;;  %v1973_v45 = vmul.f32 2.0, %v1837_v50  ;;  %vm2580_vm5 = vcmp.lt.s32.totalorder %v2579_v55, %v2435_v52  ;;  %v7762_v59 = vsub.f32 %v7164_v0, %v1971_v20 }
 0x404   : > { %v7765_v56 = vsel %vm2316_vm2, %v7578_v44, 512  ;;  %v7767_v63 = vsel %vm2580_vm5, %v2579_v55, %v2435_v52  ;;  %2268 = vmin.xlane.f32.xlu1 %v2267_v34  ;;  %vm2310_vm6 = vcmp.eq.f32.partialorder %v7229_v11, %v7630_v15  ;;  %v7777_v50 = vsel %vm2317_vm4, %v7601_v38, 512 }
 0x405   : > { %v2583_v47 = vshra.s32 %v7767_v63, 16  ;;  %v1974_v20 = vmul.f32 2.0, %v1584_v58  ;;  %v1976_v36 = vmul.f32 2.0, %v1841_v14  ;;  %v1975_v35 = vmul.f32 2.0, %v1586_v5 }
 0x406   : > { %v1596_v2 = vpop.f32.mrb[34].mxu1  ;;  %v7771_v54 = vpop.f32.mrb[122].mxu0  ;;  %vm2311_vm7 = vcmp.eq.f32.partialorder %v7233_v49, %v7630_v15  ;;  %vm2596_vm8 = vcmp.lt.s32.totalorder %v7685_v4, %v7691_v21  ;;  %v2271_v11 = vmin.f32 %v2270_v1, %v7708_v51  ;;  %vm2320_vm9 = vcmp.eq.f32.partialorder %v7254_v24, %v7759_v43 }
 0x407   : > { %v1598_v29 = vpop.f32.mrb[35].mxu1  ;;  %v7785_v52 = vpop.f32.mrb[123].mxu0  ;;  %v7787_v55 = vcvt.s32.f32 %v2583_v47  ;;  %v2438_v22 = vsel %vm2310_vm6, %v7618_v7, 512  ;;  %v2597_v58 = vsel %vm2596_vm8, %v7685_v4, %v7691_v21  ;;  %vm2321_vm10 = vcmp.eq.f32.partialorder %v7258_v6, %v7759_v43 }
 0x408   : > { %v1977_v49 = vmul.f32 2.0, %v1843_v30  ;;  %vm2598_vm11 = vcmp.lt.s32.totalorder %v2597_v58, %v2438_v22  ;;  %v2272_v15 = vmin.f32 %v2271_v11, %v7741_v25  ;;  %v2439_v14 = vsel %vm2311_vm7, %v7626_v40, 512 }
 0x409   : > { %2586 = vmin.xlane.f32.xlu0 %v7787_v55  ;;  %v2599_v5 = vsel %vm2598_vm11, %v2597_v58, %v2438_v22  ;;  %v1978_v1 = vmul.f32 2.0, %v1590_v18  ;;  %v1979_v34 = vmul.f32 2.0, %v1592_v27  ;;  %v7800_v47 = vsub.f32 %v7161_v9, %v1974_v20  ;;  %v7818_v20 = vpop.xlane.xlu0 %2168 }
 0x40a   : > { %v7803_v51 = vsub.f32 %v7164_v0, %v1975_v35  ;;  %vm2600_vm12 = vcmp.lt.s32.totalorder %v2599_v5, %v2439_v14  ;;  %2273 = vmin.xlane.f32.xlu1 %v2272_v15  ;;  %v1980_v4 = vmul.f32 2.0, %v1847_v39  ;;  %v2275_v21 = vmin.f32 %v7754_v57, %v7762_v59 }
 0x40b   : > { %v7808_v30 = vsub.f32 %v7181_v31, %v1973_v45  ;;  %v7814_v18 = vsel %vm2320_vm9, %v7578_v44, 512  ;;  %v7816_v27 = vsel %vm2600_vm12, %v2599_v5, %v2439_v14  ;;  %v7821_v35 = vsub.f32 %v7171_v12, %v1976_v36 }
 0x40c   : > { %v7827_v39 = vsel %vm2321_vm10, %v7601_v38, 512  ;;  %v2603_v45 = vshra.s32 %v7816_v27, 16  ;;  %v1981_v11 = vmul.f32 2.0, %v1849_v8  ;;  %v7831_v24 = vsub.f32 %v7181_v31, %v1977_v49  ;;  %v7857_v8 = vpop.xlane.xlu1 %2173 }
 0x40d   : > { %v7834_v22 = vsub.f32 %v7161_v9, %v1978_v1  ;;  %v7837_v58 = vsub.f32 %v7164_v0, %v1979_v34  ;;  %vm2314_vm13 = vcmp.eq.f32.partialorder %v7247_v60, %v7672_v19  ;;  %v2280_v6 = vmin.f32 %v7800_v47, %v7803_v51 }
 0x40e   : > { %v7843_v36 = vcvt.s32.f32 %v2603_v45  ;;  %v7846_v15 = vsub.f32 %v7171_v12, %v1980_v4  ;;  %vm2324_vm14 = vcmp.eq.f32.partialorder %v7275_v41, %v7818_v20  ;;  %vm2325_vm15 = vcmp.eq.f32.partialorder %v7278_v48, %v7818_v20 }
 0x40f   : > { %vm2315_vm1 = vcmp.eq.f32.partialorder %v7251_v26, %v7672_v19  ;;  %vm2616_vm2 = vcmp.lt.s32.totalorder %v7721_v62, %v7727_v32  ;;  %v2276_v60 = vmin.f32 %v2275_v21, %v7757_v28  ;;  %v7861_v49 = vsub.f32 %v7181_v31, %v1981_v11 }
 0x410   : > { %2606 = vmin.xlane.f32.xlu0 %v7843_v36  ;;  %vm2326_vm3 = vcmp.eq.f32.partialorder %v7301_v46, %v7818_v20  ;;  %v2442_v41 = vsel %vm2314_vm13, %v7618_v7, 512  ;;  %v2617_v26 = vsel %vm2616_vm2, %v7721_v62, %v7727_v32  ;;  %v2285_v19 = vmin.f32 %v7834_v22, %v7837_v58 }
 0x411   : > { %vm2618_vm4 = vcmp.lt.s32.totalorder %v2617_v26, %v2442_v41  ;;  %v2277_v14 = vmin.f32 %v2276_v60, %v7808_v30  ;;  %v1982_v5 = vmul.f32 2.0, %v1596_v2  ;;  %v7872_v1 = vsel %vm2324_vm14, %v7578_v44, 512 }
 0x412   : > { %v2443_v34 = vsel %vm2315_vm1, %v7626_v40, 512  ;;  %v2619_v4 = vsel %vm2618_vm4, %v2617_v26, %v2442_v41  ;;  %vm2328_vm5 = vcmp.eq.f32.partialorder %v7295_v16, %v7857_v8  ;;  %v7881_v46 = vsel %vm2325_vm15, %v7601_v38, 512  ;;  %v10078_v26 = vld [vmem:[#allocation40_spill] sm:$0xff] }
 0x413   : > { %v7884_v62 = vsel %vm2326_vm3, %v7618_v7, 512  ;;  %vm2620_vm6 = vcmp.lt.s32.totalorder %v2619_v4, %v2443_v34  ;;  %2278 = vmin.xlane.f32.xlu1 %v2277_v14  ;;  %v1983_v32 = vmul.f32 2.0, %v1598_v29  ;;  %v1984_v21 = vmul.f32 2.0, %v7771_v54 }
 0x414   : > { %v7886_v2 = vsel %vm2620_vm6, %v2619_v4, %v2443_v34  ;;  %vm2329_vm7 = vcmp.eq.f32.partialorder %v7298_v42, %v7857_v8  ;;  %vm2318_vm8 = vcmp.eq.f32.partialorder %v7265_v37, %v7730_v17  ;;  %v7895_v16 = vsub.f32 %v7161_v9, %v1982_v5  ;;  %v7912_v9 = vpop.xlane.xlu0 %2178  ;;  %v10079_v5 = vld [vmem:[#allocation47_spill] sm:$0xff]  ;;  %v10080_v34 = vld [vmem:[#allocation41_spill] sm:$0xff]  ;;  %v10081_v4 = vld [vmem:[#allocation44_spill] sm:$0xff] }
 0x415   : > { %v2623_v48 = vshra.s32 %v7886_v2, 16  ;;  %vm2330_vm9 = vcmp.eq.f32.partialorder %v7319_v33, %v7857_v8  ;;  %v7900_v29 = vsel %vm2328_vm5, %v7578_v44, 512  ;;  %vm2676_vm10 = vcmp.lt.s32.totalorder %v7872_v1, %v7881_v46 }
 0x416   : > { %v7905_v54 = vsub.f32 %v7164_v0, %v1983_v32  ;;  %vm2319_vm11 = vcmp.eq.f32.partialorder %v7269_v13, %v7730_v17  ;;  %vm2636_vm12 = vcmp.lt.s32.totalorder %v7765_v56, %v7777_v50  ;;  %v2281_v37 = vmin.f32 %v2280_v6, %v7821_v35 }
 0x417   : > { %v7914_v33 = vcvt.s32.f32 %v2623_v48  ;;  %v7917_v42 = vsel %vm2329_vm7, %v7601_v38, 512  ;;  %v2446_v45 = vsel %vm2318_vm8, %v7618_v7, 512  ;;  %v2637_v0 = vsel %vm2636_vm12, %v7765_v56, %v7777_v50  ;;  %v10076_v56 = vld [vmem:[#allocation42_spill] sm:$0xff]  ;;  %v10077_v50 = vld [vmem:[#allocation43_spill] sm:$0xff] }
 0x418   : > { %10074 = vst [vmem:[#allocation120_spill] sm:$0xff] %v7905_v54  ;;  %vm2327_vm13 = vcmp.eq.f32.partialorder %v7305_v53, %v7818_v20  ;;  %v7925_v13 = vsub.f32 %v7171_v12, %v1984_v21  ;;  %v7928_v17 = vsel %vm2330_vm9, %v7618_v7, 512  ;;  %vm2638_vm14 = vcmp.lt.s32.totalorder %v2637_v0, %v2446_v45 }
 0x419   : > { %v2282_v11 = vmin.f32 %v2281_v37, %v7831_v24  ;;  %2626 = vmin.xlane.f32.xlu0 %v7914_v33  ;;  %v1985_v6 = vmul.f32 2.0, %v7785_v52  ;;  %v2447_v60 = vsel %vm2319_vm11, %v7626_v40, 512  ;;  %v2639_v41 = vsel %vm2638_vm14, %v2637_v0, %v2446_v45  ;;  %v7944_v52 = vpop.xlane.xlu1 %2183  ;;  %v10082_v0 = vld [vmem:[#allocation45_spill] sm:$0xff] }
 0x41a   : > { %10075 = vst [vmem:[#allocation121_spill] sm:$0xff] %v7925_v13  ;;  %vm2332_vm15 = vcmp.eq.f32.partialorder %v10076_v56, %v7912_v9  ;;  %vm2696_vm1 = vcmp.lt.s32.totalorder %v7900_v29, %v7917_v42  ;;  %v2290_v12 = vmin.f32 %v7895_v16, %v7905_v54  ;;  %vm2640_vm2 = vcmp.lt.s32.totalorder %v2639_v41, %v2447_v60  ;;  %v10083_v56 = vld [vmem:[#allocation46_spill] sm:$0xff] }
 0x41b   : > { %2283 = vmin.xlane.f32.xlu1 %v2282_v11  ;;  %vm2333_vm3 = vcmp.eq.f32.partialorder %v10077_v50, %v7912_v9  ;;  %vm2322_vm4 = vcmp.eq.f32.partialorder %v10078_v26, %v7759_v43  ;;  %v7946_v14 = vsel %vm2640_vm2, %v2639_v41, %v2447_v60  ;;  %vm2334_vm5 = vcmp.eq.f32.partialorder %v10079_v5, %v7912_v9  ;;  %v10085_v26 = vld [vmem:[#allocation48_spill] sm:$0xff] }
 0x41c   : > { %vm2323_vm6 = vcmp.eq.f32.partialorder %v10080_v34, %v7759_v43  ;;  %vm2656_vm7 = vcmp.lt.s32.totalorder %v7814_v18, %v7827_v39  ;;  %vm2331_vm8 = vcmp.eq.f32.partialorder %v10081_v4, %v7857_v8  ;;  %v2643_v32 = vshra.s32 %v7946_v14, 16 }
 0x41d   : > { %v7958_v21 = vsel %vm2332_vm15, %v7578_v44, 512  ;;  %v2450_v48 = vsel %vm2322_vm4, %v7618_v7, 512  ;;  %v2657_v37 = vsel %vm2656_vm7, %v7814_v18, %v7827_v39  ;;  %v7964_v45 = vsel %vm2333_vm3, %v7601_v38, 512 }
 0x41e   : > { %vm2658_vm9 = vcmp.lt.s32.totalorder %v2657_v37, %v2450_v48  ;;  %v2286_v43 = vmin.f32 %v2285_v19, %v7846_v15  ;;  %vm2336_vm11 = vcmp.eq.f32.partialorder %v10082_v0, %v7944_v52  ;;  %v7969_v11 = vcvt.s32.f32 %v2643_v32  ;;  %v7982_v19 = vpop.xlane.xlu0 %2188  ;;  %v10088_v0 = vld [vmem:[#allocation50_spill] sm:$0xff] }
 0x41f   : > { %v2451_v60 = vsel %vm2323_vm6, %v7626_v40, 512  ;;  %v2659_v41 = vsel %vm2658_vm9, %v2657_v37, %v2450_v48  ;;  %vm2337_vm12 = vcmp.eq.f32.partialorder %v10083_v56, %v7944_v52  ;;  %v7975_v50 = vsub.f32 %v7181_v31, %v1985_v6  ;;  %v10086_v6 = vld [vmem:[#allocation51_spill] sm:$0xff]  ;;  %v8019_v56 = vpop.xlane.xlu1 %2193 }
 0x420   : > { %v2462_v18 = vsel %vm2334_vm5, %v7618_v7, 512  ;;  %vm2660_vm14 = vcmp.lt.s32.totalorder %v2659_v41, %v2451_v60  ;;  %v2287_v39 = vmin.f32 %v2286_v43, %v7861_v49  ;;  %2646 = vmin.xlane.f32.xlu0 %v7969_v11  ;;  %vm2335_vm15 = vcmp.eq.f32.partialorder %v10085_v26, %v7912_v9  ;;  %v10087_v43 = vld [vmem:[#allocation49_spill] sm:$0xff] }
 0x421   : > { %10084 = vst [vmem:[#allocation42_spill] sm:$0xff] %v7975_v50  ;;  %vm2716_vm2 = vcmp.lt.s32.totalorder %v7958_v21, %v7964_v45  ;;  %v7989_v31 = vsel %vm2660_vm14, %v2659_v41, %v2451_v60  ;;  %vm2338_vm3 = vcmp.eq.f32.partialorder %v10086_v6, %v7944_v52  ;;  %v7994_v5 = vsel %vm2336_vm11, %v7578_v44, 512  ;;  %v10089_v60 = vld [vmem:[#allocation55_spill] sm:$0xff]  ;;  %v10103_v26 = vld [vmem:[#allocation61_spill] sm:$0xff] }
 0x422   : > { %v2663_v34 = vshra.s32 %v7989_v31, 16  ;;  %2288 = vmin.xlane.f32.xlu1 %v2287_v39  ;;  %v2465_v32 = vsel %vm2337_vm12, %v7601_v38, 512  ;;  %v2677_v48 = vsel %vm2676_vm10, %v7872_v1, %v7881_v46  ;;  %v2291_v37 = vmin.f32 %v2290_v12, %v7925_v13  ;;  %v10090_v39 = vld [vmem:[#allocation52_spill] sm:$0xff] }
 0x423   : > { %vm2678_vm4 = vcmp.lt.s32.totalorder %v2677_v48, %v7884_v62  ;;  %vm2340_vm5 = vcmp.eq.f32.partialorder %v10087_v43, %v7982_v19  ;;  %vm2341_vm6 = vcmp.eq.f32.partialorder %v10088_v0, %v7982_v19  ;;  %vm2342_vm7 = vcmp.eq.f32.partialorder %v10089_v60, %v7982_v19  ;;  %v10092_v0 = vld [vmem:[#allocation54_spill] sm:$0xff]  ;;  %v10093_v60 = vld [vmem:[#allocation56_spill] sm:$0xff] }
 0x424   : > { %v8011_v41 = vcvt.s32.f32 %v2663_v34  ;;  %v2455_v1 = vsel %vm2327_vm13, %v7626_v40, 512  ;;  %v2679_v46 = vsel %vm2678_vm4, %v2677_v48, %v7884_v62  ;;  %v2292_v12 = vmin.f32 %v2291_v37, %v7975_v50  ;;  %v10091_v37 = vld [vmem:[#allocation53_spill] sm:$0xff] }
 0x425   : > { %vm2339_vm10 = vcmp.eq.f32.partialorder %v10090_v39, %v7944_v52  ;;  %v2466_v34 = vsel %vm2338_vm3, %v7618_v7, 512  ;;  %vm2680_vm9 = vcmp.lt.s32.totalorder %v2679_v46, %v2455_v1  ;;  %v2468_v43 = vsel %vm2340_vm5, %v7578_v44, 512 }
 0x426   : > { %v2469_v53 = vsel %vm2341_vm6, %v7601_v38, 512  ;;  %2666 = vmin.xlane.f32.xlu0 %v8011_v41  ;;  %vm2736_vm13 = vcmp.lt.s32.totalorder %v7994_v5, %v2465_v32  ;;  %v8031_v20 = vsel %vm2680_vm9, %v2679_v46, %v2455_v1  ;;  %2293 = vmin.xlane.f32.xlu1 %v2292_v12  ;;  %v2470_v62 = vsel %vm2342_vm7, %v7618_v7, 512  ;;  %v2199_v12 = vpop.xlane.xlu0 %2198 }
 0x427   : > { %v2697_v6 = vsel %vm2696_vm1, %v7900_v29, %v7917_v42  ;;  %v2683_v48 = vshra.s32 %v8031_v20, 16  ;;  %vm2756_vm11 = vcmp.lt.s32.totalorder %v2468_v43, %v2469_v53  ;;  %vm2344_vm14 = vcmp.eq.f32.partialorder %v10091_v37, %v8019_v56  ;;  %v10094_v42 = vld [vmem:[#allocation59_spill] sm:$0xff] }
 0x428   : > { %vm2698_vm12 = vcmp.lt.s32.totalorder %v2697_v6, %v7928_v17  ;;  %vm2345_vm3 = vcmp.eq.f32.partialorder %v10092_v0, %v8019_v56  ;;  %vm2343_vm4 = vcmp.eq.f32.partialorder %v10093_v60, %v7982_v19  ;;  %v2459_v1 = vsel %vm2331_vm8, %v7626_v40, 512  ;;  %v10096_v0 = vld [vmem:[#allocation60_spill] sm:$0xff] }
 0x429   : > { %v2699_v29 = vsel %vm2698_vm12, %v2697_v6, %v7928_v17  ;;  %vm2346_vm1 = vcmp.eq.f32.partialorder %v10094_v42, %v8019_v56  ;;  %v2472_v46 = vsel %vm2344_vm14, %v7578_v44, 512  ;;  %v8055_v37 = vcvt.s32.f32 %v2683_v48  ;;  %v10098_v6 = vld [vmem:[#allocation57_spill] sm:$0xff]  ;;  %v10099_v48 = vld [vmem:[#allocation58_spill] sm:$0xff]  ;;  %v10100_v42 = vld [vmem:[#allocation63_spill] sm:$0xff] }
 0x42a   : > { %vm2700_vm5 = vcmp.lt.s32.totalorder %v2699_v29, %v2459_v1  ;;  %vm2347_vm6 = vcmp.eq.f32.partialorder %v10096_v0, %v8019_v56  ;;  %v2473_v50 = vsel %vm2345_vm3, %v7601_v38, 512  ;;  %v2474_v8 = vsel %vm2346_vm1, %v7618_v7, 512 }
 0x42b   : > { %10095 = vst [vmem:[#allocation43_spill] sm:$0xff] %v8055_v37  ;;  %v8060_v13 = vsel %vm2700_vm5, %v2699_v29, %v2459_v1  ;;  %vm2776_vm8 = vcmp.lt.s32.totalorder %v2472_v46, %v2473_v50  ;;  %v2717_v17 = vsel %vm2716_vm2, %v7958_v21, %v7964_v45  ;;  %2686 = vmin.xlane.f32.xlu0 %v8055_v37  ;;  %v2463_v1 = vsel %vm2335_vm15, %v7626_v40, 512  ;;  %v2204_v21 = vpop.xlane.xlu1 %2203  ;;  %v10102_v37 = vld [vmem:[#allocation64_spill] sm:$0xff] }
 0x42c   : > { %10097 = vst [vmem:[#allocation40_spill] sm:$0xff] %v8060_v13  ;;  %v2703_v4 = vshra.s32 %v8060_v13, 16  ;;  %vm2718_vm7 = vcmp.lt.s32.totalorder %v2717_v17, %v2462_v18  ;;  %vm2348_vm9 = vcmp.eq.f32.partialorder %v10098_v6, %v2199_v12  ;;  %vm2349_vm12 = vcmp.eq.f32.partialorder %v10099_v48, %v2199_v12 }
 0x42d   : > { %v2719_v29 = vsel %vm2718_vm7, %v2717_v17, %v2462_v18  ;;  %vm2350_vm14 = vcmp.eq.f32.partialorder %v10100_v42, %v2199_v12  ;;  %v2476_v54 = vsel %vm2348_vm9, %v7578_v44, 512  ;;  %vm2351_vm3 = vcmp.eq.f32.partialorder %v10102_v37, %v2199_v12  ;;  %v10104_v17 = vld [vmem:[#allocation62_spill] sm:$0xff] }
 0x42e   : > { %v8078_v45 = vcvt.s32.f32 %v2703_v4  ;;  %vm2720_vm2 = vcmp.lt.s32.totalorder %v2719_v29, %v2463_v1  ;;  %v2477_v6 = vsel %vm2349_vm12, %v7601_v38, 512  ;;  %v2478_v48 = vsel %vm2350_vm14, %v7618_v7, 512 }
 0x42f   : > { %v8082_v13 = vsel %vm2720_vm2, %v2719_v29, %v2463_v1  ;;  %vm2796_vm1 = vcmp.lt.s32.totalorder %v2476_v54, %v2477_v6  ;;  %v2737_v9 = vsel %vm2736_vm13, %v7994_v5, %v2465_v32  ;;  %vm2352_vm5 = vcmp.eq.f32.partialorder %v10103_v26, %v2204_v21  ;;  %v10105_v29 = vld [vmem:[#allocation65_spill] sm:$0xff]  ;;  %v10106_v32 = vld [vmem:[#allocation66_spill] sm:$0xff] }
 0x430   : > { %10101 = vst [vmem:[#allocation47_spill] sm:$0xff] %v8078_v45  ;;  %2706 = vmin.xlane.f32.xlu0 %v8078_v45  ;;  %v2723_v18 = vshra.s32 %v8082_v13, 16  ;;  %vm2738_vm15 = vcmp.lt.s32.totalorder %v2737_v9, %v2466_v34  ;;  %vm2353_vm7 = vcmp.eq.f32.partialorder %v10104_v17, %v2204_v21  ;;  %v2467_v4 = vsel %vm2339_vm10, %v7626_v40, 512 }
 0x431   : > { %v2739_v1 = vsel %vm2738_vm15, %v2737_v9, %v2466_v34  ;;  %vm2354_vm9 = vcmp.eq.f32.partialorder %v10105_v29, %v2204_v21  ;;  %v2480_v42 = vsel %vm2352_vm5, %v7578_v44, 512  ;;  %vm2355_vm12 = vcmp.eq.f32.partialorder %v10106_v32, %v2204_v21  ;;  %v3580_v21 = vld [vmem:[%s9780_s6] sm:$0xff]  ;;  %v3581_v32 = vld [vmem:[%s9780_s6 + $0x8] sm:$0xff] }
 0x432   : > { %v8098_v5 = vcvt.s32.f32 %v2723_v18  ;;  %vm2740_vm13 = vcmp.lt.s32.totalorder %v2739_v1, %v2467_v4  ;;  %v2481_v45 = vsel %vm2353_vm7, %v7601_v38, 512  ;;  %v2482_v17 = vsel %vm2354_vm9, %v7618_v7, 512 }
 0x433   : > { %v8102_v26 = vsel %vm2740_vm13, %v2739_v1, %v2467_v4  ;;  %vm2816_vm14 = vcmp.lt.s32.totalorder %v2480_v42, %v2481_v45  ;;  %v2757_v52 = vsel %vm2756_vm11, %v2468_v43, %v2469_v53  ;;  %v2471_v34 = vsel %vm2343_vm4, %v7626_v40, 512 }
 0x434   : > { %2726 = vmin.xlane.f32.xlu0 %v8098_v5  ;;  %v2743_v39 = vshra.s32 %v8102_v26, 16  ;;  %vm2758_vm10 = vcmp.lt.s32.totalorder %v2757_v52, %v2470_v62  ;;  %v2777_v9 = vsel %vm2776_vm8, %v2472_v46, %v2473_v50  ;;  %v2475_v4 = vsel %vm2347_vm6, %v7626_v40, 512 }
 0x435   : > { %v2759_v18 = vsel %vm2758_vm10, %v2757_v52, %v2470_v62  ;;  %vm2778_vm2 = vcmp.lt.s32.totalorder %v2777_v9, %v2474_v8  ;;  %v2797_v43 = vsel %vm2796_vm1, %v2476_v54, %v2477_v6  ;;  %v2479_v50 = vsel %vm2351_vm3, %v7626_v40, 512 }
 0x436   : > { %v8118_v53 = vcvt.s32.f32 %v2743_v39  ;;  %vm2760_vm11 = vcmp.lt.s32.totalorder %v2759_v18, %v2471_v34  ;;  %v2779_v1 = vsel %vm2778_vm2, %v2777_v9, %v2474_v8  ;;  %vm2798_vm15 = vcmp.lt.s32.totalorder %v2797_v43, %v2478_v48  ;;  %v3583_v9 = vld [vmem:[%s9780_s6 + $0x18] sm:$0xff] }
 0x437   : > { %v8120_v29 = vsel %vm2760_vm11, %v2759_v18, %v2471_v34  ;;  %vm2780_vm4 = vcmp.lt.s32.totalorder %v2779_v1, %v2475_v4  ;;  %v2799_v19 = vsel %vm2798_vm15, %v2797_v43, %v2478_v48  ;;  %v2817_v54 = vsel %vm2816_vm14, %v2480_v42, %v2481_v45  ;;  %v10113_v43 = vld [vmem:[#allocation67_spill] sm:$0xff] }
 0x438   : > { %2746 = vmin.xlane.f32.xlu0 %v8118_v53  ;;  %v2763_v56 = vshra.s32 %v8120_v29, 16  ;;  %v8127_v62 = vsel %vm2780_vm4, %v2779_v1, %v2475_v4  ;;  %vm2800_vm6 = vcmp.lt.s32.totalorder %v2799_v19, %v2479_v50  ;;  %vm2818_vm8 = vcmp.lt.s32.totalorder %v2817_v54, %v2482_v17  ;;  %v10114_v1 = vld [vmem:[#allocation68_spill] sm:$0xff] }
 0x439   : > { %v2783_v60 = vshra.s32 %v8127_v62, 16  ;;  %v8131_v46 = vsel %vm2800_vm6, %v2799_v19, %v2479_v50  ;;  %v2483_v37 = vsel %vm2355_vm12, %v7626_v40, 512  ;;  %v2819_v8 = vsel %vm2818_vm8, %v2817_v54, %v2482_v17  ;;  %v3582_v17 = vld [vmem:[%s9780_s6 + $0x10] sm:$0xff]  ;;  %v3584_v50 = vld [vmem:[%s9780_s6 + $0x20] sm:$0xff]  ;;  %v3585_v19 = vld [vmem:[%s9780_s6 + $0x28] sm:$0xff] }
 0x43a   : > { %10107 = vst [vmem:[#allocation41_spill] sm:$0xff] %v8131_v46  ;;  %v8133_v0 = vcvt.s32.f32 %v2763_v56  ;;  %v2803_v12 = vshra.s32 %v8131_v46, 16  ;;  %vm2820_vm3 = vcmp.lt.s32.totalorder %v2819_v8, %v2483_v37  ;;  %v9933_v39 = vmov 0.0|0.0   ;;  %v10115_v56 = vld [vmem:[#allocation69_spill] sm:$0xff]  ;;  %v8218_v46 = vld [vmem:[%s9780_s6 + $0x60] sm:$0xff] }
 0x43b   : > { %v8139_v6 = vcvt.s32.f32 %v2783_v60  ;;  %v8144_v48 = vsel %vm2820_vm3, %v2819_v8, %v2483_v37  ;;  %5667 = vmatprep.subr.bf16.mxu1 %v9933_v39  ;;  %v5668_v34 = vpack.c.bf16 %v3581_v32, %v3580_v21  ;;  %v5671_v4 = vpack.c.bf16 %v3583_v9, %v3582_v17  ;;  %v3586_v21 = vld [vmem:[%s9780_s6 + $0x30] sm:$0xff]  ;;  %v3587_v32 = vld [vmem:[%s9780_s6 + $0x38] sm:$0xff]  ;;  %v8187_v17 = vld [vmem:[%s9780_s6 + $0x40] sm:$0xff] }
 0x43c   : > { %10108 = vst [vmem:[#allocation44_spill] sm:$0xff] %v8133_v0  ;;  %2766 = vmin.xlane.f32.xlu0 %v8133_v0  ;;  %v8142_v45 = vcvt.s32.f32 %v2803_v12  ;;  %10111 = vst [vmem:[#allocation48_spill] sm:$0xff] %v8144_v48  ;;  %v2823_v42 = vshra.s32 %v8144_v48, 16  ;;  %v10116_v12 = vld [vmem:[#allocation71_spill] sm:$0xff]  ;;  %v10117_v9 = vld [vmem:[#allocation70_spill] sm:$0xff] }
 0x43d   : > { %10109 = vst [vmem:[#allocation45_spill] sm:$0xff] %v8139_v6  ;;  %2786 = vmin.xlane.f32.xlu1 %v8139_v6  ;;  %5669 = vmatpush1.bf16.msra.mxu1 %v5668_v34 }
 0x43e   : > { %10110 = vst [vmem:[#allocation46_spill] sm:$0xff] %v8142_v45  ;;  %v8148_v52 = vcvt.s32.f32 %v2823_v42  ;;  %5670 = vmatprep.subr.bf16.mxu1 %v9933_v39  ;;  %v5674_v42 = vpack.c.bf16 %v3585_v19, %v3584_v50  ;;  %v8204_v50 = vld [vmem:[%s9780_s6 + $0x58] sm:$0xff]  ;;  %v10119_v19 = vld [vmem:[#allocation73_spill] sm:$0xff] }
 0x440   : > { %10112 = vst [vmem:[#allocation51_spill] sm:$0xff] %v8148_v52  ;;  %2806 = vmin.xlane.f32.xlu0 %v8142_v45 }
 0x441   : > { %2826 = vmin.xlane.f32.xlu1 %v8148_v52  ;;  %5672 = vmatpush1.bf16.msra.mxu1 %v5671_v4  ;;  %v3589_v4 = vld [vmem:[%s9780_s6 + $0x48] sm:$0xff] }
 0x442   : > { %5673 = vmatprep.subr.bf16.mxu1 %v9933_v39  ;;  %v5680_v48 = vpack.c.bf16 %v3589_v4, %v8187_v17  ;;  %v10124_v17 = vld [vmem:[#allocation77_spill] sm:$0xff] }
 0x445   : > { %5675 = vmatpush1.bf16.msra.mxu1 %v5674_v42  ;;  %v10121_v42 = vld [vmem:[#allocation74_spill] sm:$0xff] }
 0x45a   : > { %v2209_v18 = vpop.xlane.xlu0 %2208 }
 0x45b   : > { %vm2356_vm1 = vcmp.eq.f32.partialorder %v10113_v43, %v2209_v18  ;;  %vm2357_vm5 = vcmp.eq.f32.partialorder %v10114_v1, %v2209_v18  ;;  %vm2358_vm7 = vcmp.eq.f32.partialorder %v10115_v56, %v2209_v18  ;;  %vm2359_vm13 = vcmp.eq.f32.partialorder %v10116_v12, %v2209_v18  ;;  %v10118_v43 = vld [vmem:[#allocation72_spill] sm:$0xff]  ;;  %v8199_v1 = vld [vmem:[%s9780_s6 + $0x50] sm:$0xff]  ;;  %v10120_v12 = vld [vmem:[#allocation75_spill] sm:$0xff] }
 0x45c   : > { %v2484_v54 = vsel %vm2356_vm1, %v7578_v44, 512  ;;  %v2485_v60 = vsel %vm2357_vm5, %v7601_v38, 512  ;;  %v2486_v34 = vsel %vm2358_vm7, %v7618_v7, 512  ;;  %v5683_v45 = vpack.c.bf16 %v8204_v50, %v8199_v1  ;;  %v8223_v18 = vld [vmem:[%s9780_s6 + $0x68] sm:$0xff] }
 0x45d   : > { %vm2836_vm9 = vcmp.lt.s32.totalorder %v2484_v54, %v2485_v60 }
 0x45e   : > { %v2837_v8 = vsel %vm2836_vm9, %v2484_v54, %v2485_v60  ;;  %v2487_v60 = vsel %vm2359_vm13, %v7626_v40, 512 }
 0x45f   : > { %v2214_v37 = vpop.xlane.xlu1 %2213  ;;  %vm2838_vm2 = vcmp.lt.s32.totalorder %v2837_v8, %v2486_v34 }
 0x460   : > { %vm2360_vm12 = vcmp.eq.f32.partialorder %v10117_v9, %v2214_v37  ;;  %vm2361_vm14 = vcmp.eq.f32.partialorder %v10118_v43, %v2214_v37  ;;  %vm2362_vm10 = vcmp.eq.f32.partialorder %v10119_v19, %v2214_v37  ;;  %v2839_v9 = vsel %vm2838_vm2, %v2837_v8, %v2486_v34  ;;  %v10126_v19 = vld [vmem:[#allocation79_spill] sm:$0xff] }
 0x461   : > { %v2488_v56 = vsel %vm2360_vm12, %v7578_v44, 512  ;;  %v2489_v54 = vsel %vm2361_vm14, %v7601_v38, 512  ;;  %v5677_v43 = vpack.c.bf16 %v3587_v32, %v3586_v21  ;;  %vm2840_vm15 = vcmp.lt.s32.totalorder %v2839_v9, %v2487_v60  ;;  %v10122_v21 = vld [vmem:[#allocation76_spill] sm:$0xff] }
 0x462   : > { %vm2856_vm11 = vcmp.lt.s32.totalorder %v2488_v56, %v2489_v54  ;;  %vm2363_vm4 = vcmp.eq.f32.partialorder %v10120_v12, %v2214_v37  ;;  %v2490_v8 = vsel %vm2362_vm10, %v7618_v7, 512  ;;  %v10123_v32 = vmov 0.0|0.0  }
 0x463   : > { %v2219_v39 = vpop.xlane.xlu0 %2218  ;;  %v2857_v52 = vsel %vm2856_vm11, %v2488_v56, %v2489_v54  ;;  %5676 = vmatprep.subr.bf16.mxu1 %v10123_v32  ;;  %v8235_v1 = vsel %vm2840_vm15, %v2839_v9, %v2487_v60  ;;  %v2491_v54 = vsel %vm2363_vm4, %v7626_v40, 512  ;;  %v10128_v60 = vld [vmem:[#allocation80_spill] sm:$0xff]  ;;  %v10129_v9 = vld [vmem:[#allocation81_spill] sm:$0xff] }
 0x464   : > { %vm2364_vm6 = vcmp.eq.f32.partialorder %v10121_v42, %v2219_v39  ;;  %vm2365_vm8 = vcmp.eq.f32.partialorder %v10122_v21, %v2219_v39  ;;  %vm2366_vm3 = vcmp.eq.f32.partialorder %v10124_v17, %v2219_v39  ;;  %10125 = vst [vmem:[#allocation49_spill] sm:$0xff] %v8235_v1  ;;  %v2843_v50 = vshra.s32 %v8235_v1, 16  ;;  %5678 = vmatpush1.bf16.msra.mxu1 %v5677_v43  ;;  %v10127_v17 = vld [vmem:[#allocation78_spill] sm:$0xff]  ;;  %v10130_v1 = vld [vmem:[#allocation83_spill] sm:$0xff] }
 0x465   : > { %v2492_v34 = vsel %vm2364_vm6, %v7578_v44, 512  ;;  %v2493_v4 = vsel %vm2365_vm8, %v7601_v38, 512  ;;  %vm2858_vm5 = vcmp.lt.s32.totalorder %v2857_v52, %v2490_v8  ;;  %vm2367_vm7 = vcmp.eq.f32.partialorder %v10126_v19, %v2219_v39  ;;  %5679 = vmatprep.subr.bf16.mxu1 %v10123_v32  ;;  %v10136_v19 = vld [vmem:[#allocation87_spill] sm:$0xff] }
 0x466   : > { %vm2876_vm1 = vcmp.lt.s32.totalorder %v2492_v34, %v2493_v4  ;;  %v2859_v12 = vsel %vm2858_vm5, %v2857_v52, %v2490_v8  ;;  %v2494_v21 = vsel %vm2366_vm3, %v7618_v7, 512  ;;  %v8250_v0 = vcvt.s32.f32 %v2843_v50  ;;  %v10134_v50 = vld [vmem:[#allocation84_spill] sm:$0xff] }
 0x467   : > { %v2224_v56 = vpop.xlane.xlu1 %2223  ;;  %v2877_v42 = vsel %vm2876_vm1, %v2492_v34, %v2493_v4  ;;  %vm2860_vm2 = vcmp.lt.s32.totalorder %v2859_v12, %v2491_v54  ;;  %v2495_v52 = vsel %vm2367_vm7, %v7626_v40, 512 }
 0x468   : > { %vm2368_vm9 = vcmp.eq.f32.partialorder %v10127_v17, %v2224_v56  ;;  %vm2369_vm13 = vcmp.eq.f32.partialorder %v10128_v60, %v2224_v56  ;;  %vm2370_vm12 = vcmp.eq.f32.partialorder %v10129_v9, %v2224_v56  ;;  %vm2371_vm14 = vcmp.eq.f32.partialorder %v10130_v1, %v2224_v56  ;;  %10131 = vst [vmem:[#allocation50_spill] sm:$0xff] %v8250_v0  ;;  %v10133_v60 = vld [vmem:[#allocation82_spill] sm:$0xff]  ;;  %v10135_v9 = vld [vmem:[#allocation85_spill] sm:$0xff] }
 0x469   : > { %v2496_v37 = vsel %vm2368_vm9, %v7578_v44, 512  ;;  %v2497_v6 = vsel %vm2369_vm13, %v7601_v38, 512  ;;  %vm2878_vm11 = vcmp.lt.s32.totalorder %v2877_v42, %v2494_v21  ;;  %v2498_v43 = vsel %vm2370_vm12, %v7618_v7, 512  ;;  %2846 = vmin.xlane.f32.xlu0 %v8250_v0  ;;  %5681 = vmatpush1.bf16.msra.mxu1 %v5680_v48  ;;  %v10163_v0 = vld [vmem:[#allocation104_spill] sm:$0xff] }
 0x46a   : > { %vm2896_vm10 = vcmp.lt.s32.totalorder %v2496_v37, %v2497_v6  ;;  %v8257_v34 = vsel %vm2860_vm2, %v2859_v12, %v2491_v54  ;;  %v2879_v4 = vsel %vm2878_vm11, %v2877_v42, %v2494_v21  ;;  %v2499_v39 = vsel %vm2371_vm14, %v7626_v40, 512  ;;  %5682 = vmatprep.subr.bf16.mxu1 %v10123_v32 }
 0x46b   : > { %v2229_v8 = vpop.xlane.xlu0 %2228  ;;  %10132 = vst [vmem:[#allocation55_spill] sm:$0xff] %v8257_v34  ;;  %v2897_v17 = vsel %vm2896_vm10, %v2496_v37, %v2497_v6  ;;  %v2863_v6 = vshra.s32 %v8257_v34, 16  ;;  %vm2880_vm1 = vcmp.lt.s32.totalorder %v2879_v4, %v2495_v52 }
 0x46c   : > { %vm2372_vm15 = vcmp.eq.f32.partialorder %v10133_v60, %v2229_v8  ;;  %vm2373_vm4 = vcmp.eq.f32.partialorder %v10134_v50, %v2229_v8  ;;  %vm2374_vm6 = vcmp.eq.f32.partialorder %v10135_v9, %v2229_v8  ;;  %vm2375_vm8 = vcmp.eq.f32.partialorder %v10136_v19, %v2229_v8  ;;  %v10139_v60 = vld [vmem:[#allocation86_spill] sm:$0xff]  ;;  %v10140_v50 = vld [vmem:[#allocation88_spill] sm:$0xff]  ;;  %v10141_v9 = vld [vmem:[#allocation89_spill] sm:$0xff] }
 0x46d   : > { %v2500_v54 = vsel %vm2372_vm15, %v7578_v44, 512  ;;  %v2501_v12 = vsel %vm2373_vm4, %v7601_v38, 512  ;;  %v2502_v48 = vsel %vm2374_vm6, %v7618_v7, 512  ;;  %vm2898_vm5 = vcmp.lt.s32.totalorder %v2897_v17, %v2498_v43  ;;  %5684 = vmatpush1.bf16.msra.mxu1 %v5683_v45 }
 0x46e   : > { %vm2916_vm3 = vcmp.lt.s32.totalorder %v2500_v54, %v2501_v12  ;;  %v8271_v37 = vcvt.s32.f32 %v2863_v6  ;;  %v8273_v1 = vsel %vm2880_vm1, %v2879_v4, %v2495_v52  ;;  %v2899_v56 = vsel %vm2898_vm5, %v2897_v17, %v2498_v43  ;;  %5685 = vmatprep.subr.bf16.mxu1 %v10123_v32  ;;  %v10142_v6 = vld [vmem:[#allocation91_spill] sm:$0xff] }
 0x46f   : > { %v2234_v42 = vpop.xlane.xlu1 %2233  ;;  %10138 = vst [vmem:[#allocation53_spill] sm:$0xff] %v8273_v1  ;;  %v2917_v21 = vsel %vm2916_vm3, %v2500_v54, %v2501_v12  ;;  %v2503_v34 = vsel %vm2375_vm8, %v7626_v40, 512  ;;  %v2883_v43 = vshra.s32 %v8273_v1, 16  ;;  %vm2900_vm10 = vcmp.lt.s32.totalorder %v2899_v56, %v2499_v39  ;;  %v10162_v1 = vld [vmem:[#allocation102_spill] sm:$0xff] }
 0x470   : > { %10137 = vst [vmem:[#allocation52_spill] sm:$0xff] %v8271_v37  ;;  %vm2376_vm7 = vcmp.eq.f32.partialorder %v10139_v60, %v2234_v42  ;;  %vm2377_vm9 = vcmp.eq.f32.partialorder %v10140_v50, %v2234_v42  ;;  %vm2378_vm13 = vcmp.eq.f32.partialorder %v10141_v9, %v2234_v42  ;;  %2866 = vmin.xlane.f32.xlu1 %v8271_v37  ;;  %v10146_v50 = vld [vmem:[#allocation90_spill] sm:$0xff]  ;;  %v10147_v9 = vld [vmem:[#allocation92_spill] sm:$0xff]  ;;  %v10148_v37 = vld [vmem:[#allocation93_spill] sm:$0xff] }
 0x471   : > { %vm2379_vm12 = vcmp.eq.f32.partialorder %v10142_v6, %v2234_v42  ;;  %v2504_v52 = vsel %vm2376_vm7, %v7578_v44, 512  ;;  %v2505_v45 = vsel %vm2377_vm9, %v7601_v38, 512  ;;  %v2506_v4 = vsel %vm2378_vm13, %v7618_v7, 512 }
 0x472   : > { %vm2936_vm14 = vcmp.lt.s32.totalorder %v2504_v52, %v2505_v45  ;;  %vm2918_vm2 = vcmp.lt.s32.totalorder %v2917_v21, %v2502_v48  ;;  %v8288_v17 = vcvt.s32.f32 %v2883_v43  ;;  %v8290_v19 = vsel %vm2900_vm10, %v2899_v56, %v2499_v39  ;;  %v10149_v39 = vld [vmem:[#allocation95_spill] sm:$0xff] }
 0x473   : > { %v2239_v8 = vpop.xlane.xlu0 %2238  ;;  %10144 = vst [vmem:[#allocation56_spill] sm:$0xff] %v8290_v19  ;;  %v2919_v54 = vsel %vm2918_vm2, %v2917_v21, %v2502_v48  ;;  %v2937_v12 = vsel %vm2936_vm14, %v2504_v52, %v2505_v45  ;;  %v10145_v60 = vpack.c.bf16 %v8223_v18, %v8218_v46  ;;  %v2507_v43 = vsel %vm2379_vm12, %v7626_v40, 512  ;;  %v10152_v45 = vld [vmem:[#allocation94_spill] sm:$0xff] }
 0x474   : > { %10143 = vst [vmem:[#allocation54_spill] sm:$0xff] %v8288_v17  ;;  %vm2380_vm11 = vcmp.eq.f32.partialorder %v10146_v50, %v2239_v8  ;;  %vm2381_vm15 = vcmp.eq.f32.partialorder %v10147_v9, %v2239_v8  ;;  %vm2382_vm4 = vcmp.eq.f32.partialorder %v10148_v37, %v2239_v8  ;;  %2886 = vmin.xlane.f32.xlu0 %v8288_v17  ;;  %v2903_v18 = vshra.s32 %v8290_v19, 16  ;;  %v10154_v50 = vld [vmem:[#allocation97_spill] sm:$0xff]  ;;  %v10155_v17 = vld [vmem:[#allocation99_spill] sm:$0xff] }
 0x475   : > { %5687 = vmatpush1.bf16.msra.mxu1 %v10145_v60  ;;  %vm2383_vm6 = vcmp.eq.f32.partialorder %v10149_v39, %v2239_v8  ;;  %v2508_v48 = vsel %vm2380_vm11, %v7578_v44, 512  ;;  %v2509_v46 = vsel %vm2381_vm15, %v7601_v38, 512  ;;  %v2510_v56 = vsel %vm2382_vm4, %v7618_v7, 512  ;;  %v10153_v60 = vld [vmem:[#allocation96_spill] sm:$0xff] }
 0x476   : > { %5688 = vmatprep.subr.bf16.mxu1 %v10123_v32  ;;  %vm2956_vm8 = vcmp.lt.s32.totalorder %v2508_v48, %v2509_v46  ;;  %vm2920_vm3 = vcmp.lt.s32.totalorder %v2919_v54, %v2503_v34  ;;  %vm2938_vm1 = vcmp.lt.s32.totalorder %v2937_v12, %v2506_v4  ;;  %v8308_v37 = vcvt.s32.f32 %v2903_v18 }
 0x477   : > { %v2244_v42 = vpop.xlane.xlu1 %2243  ;;  %v8310_v21 = vsel %vm2920_vm3, %v2919_v54, %v2503_v34  ;;  %v2939_v6 = vsel %vm2938_vm1, %v2937_v12, %v2506_v4  ;;  %v2957_v52 = vsel %vm2956_vm8, %v2508_v48, %v2509_v46  ;;  %v2511_v9 = vsel %vm2383_vm6, %v7626_v40, 512 }
 0x478   : > { %10150 = vst [vmem:[#allocation59_spill] sm:$0xff] %v8308_v37  ;;  %10151 = vst [vmem:[#allocation60_spill] sm:$0xff] %v8310_v21  ;;  %vm2384_vm5 = vcmp.eq.f32.partialorder %v10152_v45, %v2244_v42  ;;  %vm2385_vm7 = vcmp.eq.f32.partialorder %v10153_v60, %v2244_v42  ;;  %vm2386_vm9 = vcmp.eq.f32.partialorder %v10154_v50, %v2244_v42  ;;  %2906 = vmin.xlane.f32.xlu1 %v8308_v37  ;;  %v10158_v45 = vld [vmem:[#allocation98_spill] sm:$0xff]  ;;  %v10159_v60 = vld [vmem:[#allocation100_spill] sm:$0xff] }
 0x479   : > { %vm2387_vm13 = vcmp.eq.f32.partialorder %v10155_v17, %v2244_v42  ;;  %v2512_v18 = vsel %vm2384_vm5, %v7578_v44, 512  ;;  %v2513_v34 = vsel %vm2385_vm7, %v7601_v38, 512  ;;  %v2923_v4 = vshra.s32 %v8310_v21, 16  ;;  %v10160_v50 = vld [vmem:[#allocation101_spill] sm:$0xff]  ;;  %v10161_v21 = vld [vmem:[#allocation103_spill] sm:$0xff] }
 0x47a   : > { %v2514_v54 = vsel %vm2386_vm9, %v7618_v7, 512  ;;  %vm2976_vm12 = vcmp.lt.s32.totalorder %v2512_v18, %v2513_v34  ;;  %vm2940_vm14 = vcmp.lt.s32.totalorder %v2939_v6, %v2507_v43  ;;  %vm2958_vm10 = vcmp.lt.s32.totalorder %v2957_v52, %v2510_v56 }
 0x47b   : > { %v8324_v12 = vcvt.s32.f32 %v2923_v4  ;;  %v2249_v48 = vpop.xlane.xlu1 %2248  ;;  %v8326_v8 = vsel %vm2940_vm14, %v2939_v6, %v2507_v43  ;;  %v2959_v39 = vsel %vm2958_vm10, %v2957_v52, %v2510_v56  ;;  %v2977_v46 = vsel %vm2976_vm12, %v2512_v18, %v2513_v34  ;;  %v3594_v6 = vld [vmem:[%s9780_s6 + $0x70] sm:$0xff]  ;;  %v3595_v52 = vld [vmem:[%s9780_s6 + $0x78] sm:$0xff] }
 0x47c   : > { %10157 = vst [vmem:[#allocation58_spill] sm:$0xff] %v8326_v8  ;;  %vm2388_vm2 = vcmp.eq.f32.partialorder %v10158_v45, %v2249_v48  ;;  %vm2389_vm11 = vcmp.eq.f32.partialorder %v10159_v60, %v2249_v48  ;;  %vm2390_vm15 = vcmp.eq.f32.partialorder %v10160_v50, %v2249_v48  ;;  %v2515_v37 = vsel %vm2387_vm13, %v7626_v40, 512 }
 0x47d   : > { %10156 = vst [vmem:[#allocation57_spill] sm:$0xff] %v8324_v12  ;;  %2926 = vmin.xlane.f32.xlu0 %v8324_v12  ;;  %vm2391_vm4 = vcmp.eq.f32.partialorder %v10161_v21, %v2249_v48  ;;  %v2516_v4 = vsel %vm2388_vm2, %v7578_v44, 512  ;;  %v2517_v43 = vsel %vm2389_vm11, %v7601_v38, 512  ;;  %v2943_v56 = vshra.s32 %v8326_v8, 16  ;;  %v3598_v48 = vld [vmem:[%s9780_s6 + $0x90] sm:$0xff] }
 0x47e   : > { %v2518_v17 = vsel %vm2390_vm15, %v7618_v7, 512  ;;  %vm2996_vm6 = vcmp.lt.s32.totalorder %v2516_v4, %v2517_v43  ;;  %vm2960_vm8 = vcmp.lt.s32.totalorder %v2959_v39, %v2511_v9  ;;  %vm2978_vm3 = vcmp.lt.s32.totalorder %v2977_v46, %v2514_v54 }
 0x47f   : > { %v8346_v42 = vcvt.s32.f32 %v2943_v56  ;;  %v8348_v18 = vsel %vm2960_vm8, %v2959_v39, %v2511_v9  ;;  %v2979_v34 = vsel %vm2978_vm3, %v2977_v46, %v2514_v54  ;;  %v2997_v45 = vsel %vm2996_vm6, %v2516_v4, %v2517_v43  ;;  %v2254_v12 = vpop.xlane.xlu1 %2253  ;;  %v10164_v56 = vld [vmem:[#allocation105_spill] sm:$0xff]  ;;  %v3596_v9 = vld [vmem:[%s9780_s6 + $0x80] sm:$0xff]  ;;  %v3597_v54 = vld [vmem:[%s9780_s6 + $0x88] sm:$0xff] }
 0x480   : > { %v2963_v60 = vshra.s32 %v8348_v18, 16  ;;  %vm2980_vm1 = vcmp.lt.s32.totalorder %v2979_v34, %v2515_v37  ;;  %vm2998_vm5 = vcmp.lt.s32.totalorder %v2997_v45, %v2518_v17  ;;  %v5689_v50 = vpack.c.bf16 %v3595_v52, %v3594_v6 }
 0x481   : > { %2946 = vmin.xlane.f32.xlu0 %v8346_v42  ;;  %v8352_v8 = vsel %vm2980_vm1, %v2979_v34, %v2515_v37  ;;  %v2999_v19 = vsel %vm2998_vm5, %v2997_v45, %v2518_v17  ;;  %vm2392_vm7 = vcmp.eq.f32.partialorder %v10162_v1, %v2254_v12  ;;  %vm2393_vm9 = vcmp.eq.f32.partialorder %v10163_v0, %v2254_v12  ;;  %v10165_v1 = vld [vmem:[#allocation108_spill] sm:$0xff] }
 0x482   : > { %vm2394_vm13 = vcmp.eq.f32.partialorder %v10164_v56, %v2254_v12  ;;  %5690 = vmatpush1.bf16.msra.mxu1 %v5689_v50  ;;  %v2520_v39 = vsel %vm2392_vm7, %v7578_v44, 512  ;;  %v2521_v37 = vsel %vm2393_vm9, %v7601_v38, 512  ;;  %v8365_v46 = vcvt.s32.f32 %v2963_v60  ;;  %v3599_v60 = vld [vmem:[%s9780_s6 + $0x98] sm:$0xff]  ;;  %v10170_v56 = vld [vmem:[#allocation109_spill] sm:$0xff] }
 0x483   : > { %v2519_v0 = vsel %vm2391_vm4, %v7626_v40, 512  ;;  %5691 = vmatprep.subr.bf16.mxu1 %v10123_v32  ;;  %vm2395_vm12 = vcmp.eq.f32.partialorder %v10165_v1, %v2254_v12  ;;  %vm3016_vm14 = vcmp.lt.s32.totalorder %v2520_v39, %v2521_v37  ;;  %v2983_v4 = vshra.s32 %v8352_v8, 16  ;;  %v10168_v50 = vld [vmem:[#allocation106_spill] sm:$0xff] }
 0x484   : > { %vm3000_vm10 = vcmp.lt.s32.totalorder %v2999_v19, %v2519_v0  ;;  %v2522_v43 = vsel %vm2394_vm13, %v7618_v7, 512  ;;  %v3017_v52 = vsel %vm3016_vm14, %v2520_v39, %v2521_v37  ;;  %v5692_v17 = vpack.c.bf16 %v3597_v54, %v3596_v9  ;;  %v2259_v34 = vpop.xlane.xlu1 %2258 }
 0x485   : > { %2966 = vmin.xlane.f32.xlu0 %v8365_v46  ;;  %v8375_v6 = vsel %vm3000_vm10, %v2999_v19, %v2519_v0  ;;  %v8377_v45 = vcvt.s32.f32 %v2983_v4  ;;  %vm3018_vm2 = vcmp.lt.s32.totalorder %v3017_v52, %v2522_v43  ;;  %vm2396_vm11 = vcmp.eq.f32.partialorder %v10168_v50, %v2259_v34  ;;  %v10169_v19 = vld [vmem:[#allocation107_spill] sm:$0xff]  ;;  %v3601_v50 = vld [vmem:[%s9780_s6 + $0xa8] sm:$0xff] }
 0x486   : > { %10166 = vst [vmem:[#allocation63_spill] sm:$0xff] %v8375_v6  ;;  %v3003_v21 = vshra.s32 %v8375_v6, 16  ;;  %vm2397_vm15 = vcmp.eq.f32.partialorder %v10169_v19, %v2259_v34  ;;  %vm2398_vm4 = vcmp.eq.f32.partialorder %v10170_v56, %v2259_v34  ;;  %5693 = vmatpush1.bf16.msra.mxu1 %v5692_v17  ;;  %v2524_v9 = vsel %vm2396_vm11, %v7578_v44, 512  ;;  %v3600_v17 = vld [vmem:[%s9780_s6 + $0xa0] sm:$0xff]  ;;  %v10172_v19 = vld [vmem:[#allocation112_spill] sm:$0xff] }
 0x487   : > { %10167 = vst [vmem:[#allocation64_spill] sm:$0xff] %v8377_v45  ;;  %v2525_v54 = vsel %vm2397_vm15, %v7601_v38, 512  ;;  %v2523_v39 = vsel %vm2395_vm12, %v7626_v40, 512  ;;  %5694 = vmatprep.subr.bf16.mxu1 %v10123_v32  ;;  %v3019_v0 = vsel %vm3018_vm2, %v3017_v52, %v2522_v43  ;;  %v5695_v4 = vpack.c.bf16 %v3599_v60, %v3598_v48  ;;  %v10174_v52 = vld [vmem:[#allocation110_spill] sm:$0xff] }
 0x488   : > { %vm3036_vm6 = vcmp.lt.s32.totalorder %v2524_v9, %v2525_v54  ;;  %v8396_v37 = vcvt.s32.f32 %v3003_v21  ;;  %v2526_v12 = vsel %vm2398_vm4, %v7618_v7, 512  ;;  %vm3020_vm8 = vcmp.lt.s32.totalorder %v3019_v0, %v2523_v39  ;;  %v10175_v21 = vld [vmem:[#allocation111_spill] sm:$0xff] }
 0x489   : > { %2986 = vmin.xlane.f32.xlu0 %v8377_v45  ;;  %v3037_v1 = vsel %vm3036_vm6, %v2524_v9, %v2525_v54  ;;  %vm2399_vm3 = vcmp.eq.f32.partialorder %v10172_v19, %v2259_v34  ;;  %v2264_v56 = vpop.xlane.xlu1 %2263  ;;  %v8406_v45 = vsel %vm3020_vm8, %v3019_v0, %v2523_v39  ;;  %v5698_v43 = vpack.c.bf16 %v3601_v50, %v3600_v17  ;;  %v3602_v39 = vld [vmem:[%s9780_s6 + $0xb0] sm:$0xff]  ;;  %v3604_v19 = vld [vmem:[%s9780_s6 + $0xc0] sm:$0xff] }
 0x48a   : > { %10171 = vst [vmem:[#allocation61_spill] sm:$0xff] %v8396_v37  ;;  %10173 = vst [vmem:[#allocation62_spill] sm:$0xff] %v8406_v45  ;;  %vm3038_vm1 = vcmp.lt.s32.totalorder %v3037_v1, %v2526_v12  ;;  %5696 = vmatpush1.bf16.msra.mxu1 %v5695_v4  ;;  %vm2400_vm5 = vcmp.eq.f32.partialorder %v10174_v52, %v2264_v56  ;;  %vm2401_vm7 = vcmp.eq.f32.partialorder %v10175_v21, %v2264_v56  ;;  %v10176_v0 = vld [vmem:[#allocation113_spill] sm:$0xff] }
 0x48b   : > { %vm2402_vm9 = vcmp.eq.f32.partialorder %v7643_v10, %v2264_v56  ;;  %5697 = vmatprep.subr.bf16.mxu1 %v10123_v32  ;;  %v2562_v48 = vand.u32 65535, %v7713_v23  ;;  %v2528_v60 = vsel %vm2400_vm5, %v7578_v44, 512  ;;  %v2529_v9 = vsel %vm2401_vm7, %v7601_v38, 512  ;;  %v3603_v10 = vld [vmem:[%s9780_s6 + $0xb8] sm:$0xff] }
 0x48c   : > { %v3023_v54 = vshra.s32 %v8406_v45, 16  ;;  %vm2403_vm13 = vcmp.eq.f32.partialorder %v10176_v0, %v2264_v56  ;;  %vm3056_vm12 = vcmp.lt.s32.totalorder %v2528_v60, %v2529_v9  ;;  %v2527_v23 = vsel %vm2399_vm3, %v7626_v40, 512  ;;  %v10178_v0 = vld [vmem:[#allocation115_spill] sm:$0xff] }
 0x48d   : > { %3006 = vmin.xlane.f32.xlu0 %v8396_v37  ;;  %v3039_v4 = vsel %vm3038_vm1, %v3037_v1, %v2526_v12  ;;  %v2530_v17 = vsel %vm2402_vm9, %v7618_v7, 512  ;;  %v3057_v52 = vsel %vm3056_vm12, %v2528_v60, %v2529_v9  ;;  %v5701_v37 = vpack.c.bf16 %v3603_v10, %v3602_v39  ;;  %v10177_v10 = vld [vmem:[#allocation114_spill] sm:$0xff] }
 0x48e   : > { %v8429_v50 = vcvt.s32.f32 %v3023_v54  ;;  %vm3040_vm14 = vcmp.lt.s32.totalorder %v3039_v4, %v2527_v23  ;;  %5699 = vmatpush1.bf16.msra.mxu1 %v5698_v43  ;;  %vm3058_vm10 = vcmp.lt.s32.totalorder %v3057_v52, %v2530_v17  ;;  %v2564_v6 = vcvt.s32.f32 %v2562_v48  ;;  %v3605_v43 = vld [vmem:[%s9780_s6 + $0xc8] sm:$0xff] }
 0x48f   : > { %v8431_v21 = vsel %vm3040_vm14, %v3039_v4, %v2527_v23  ;;  %5700 = vmatprep.subr.bf16.mxu1 %v10123_v32  ;;  %v8434_v45 = vpop.xlane.xlu0 %2566  ;;  %v2531_v12 = vsel %vm2403_vm13, %v7626_v40, 512  ;;  %v3059_v1 = vsel %vm3058_vm10, %v3057_v52, %v2530_v17  ;;  %v5704_v56 = vpack.c.bf16 %v3605_v43, %v3604_v19  ;;  %v10179_v23 = vld [vmem:[#allocation116_spill] sm:$0xff] }
 0x490   : > { %v3043_v34 = vshra.s32 %v8431_v21, 16  ;;  %vm2568_vm2 = vcmp.eq.f32.partialorder %v7734_v3, %v8434_v45  ;;  %vm3060_vm11 = vcmp.lt.s32.totalorder %v3059_v1, %v2531_v12  ;;  %v2582_v39 = vand.u32 65535, %v7767_v63  ;;  %v3607_v63 = vld [vmem:[%s9780_s6 + $0xd8] sm:$0xff] }
 0x491   : > { %3026 = vmin.xlane.f32.xlu0 %v8429_v50  ;;  %v2569_v48 = vsel %vm2568_vm2, %v2564_v6, inf  ;;  %v2269_v60 = vpop.xlane.xlu1 %2268  ;;  %v8451_v54 = vsel %vm3060_vm11, %v3059_v1, %v2531_v12 }
 0x492   : > { %v8449_v9 = vcvt.s32.f32 %v3043_v34  ;;  %5702 = vmatpush1.bf16.msra.mxu1 %v5701_v37  ;;  %2570 = vmin.xlane.f32.xlu1 %v2569_v48  ;;  %vm2404_vm15 = vcmp.eq.f32.partialorder %v10177_v10, %v2269_v60  ;;  %vm2405_vm4 = vcmp.eq.f32.partialorder %v10178_v0, %v2269_v60  ;;  %vm2406_vm6 = vcmp.eq.f32.partialorder %v10179_v23, %v2269_v60  ;;  %v3606_v37 = vld [vmem:[%s9780_s6 + $0xd0] sm:$0xff]  ;;  %v10182_v23 = vld [vmem:[#allocation118_spill] sm:$0xff] }
 0x493   : > { %5703 = vmatprep.subr.bf16.mxu1 %v10123_v32  ;;  %v2532_v3 = vsel %vm2404_vm15, %v7578_v44, 512  ;;  %v2533_v6 = vsel %vm2405_vm4, %v7601_v38, 512  ;;  %v3063_v4 = vshra.s32 %v8451_v54, 16  ;;  %v2534_v17 = vsel %vm2406_vm6, %v7618_v7, 512  ;;  %v10180_v0 = vld [vmem:[#allocation117_spill] sm:$0xff] }
 0x494   : > { %vm3076_vm8 = vcmp.lt.s32.totalorder %v2532_v3, %v2533_v6  ;;  %v5707_v34 = vpack.c.bf16 %v3607_v63, %v3606_v37  ;;  %vm2407_vm3 = vcmp.eq.f32.partialorder %v7679_v61, %v2269_v60  ;;  %v2584_v1 = vcvt.s32.f32 %v2582_v39  ;;  %v3608_v39 = vld [vmem:[%s9780_s6 + $0xe0] sm:$0xff] }
 0x495   : > { %3046 = vmin.xlane.f32.xlu0 %v8449_v9  ;;  %v3077_v52 = vsel %vm3076_vm8, %v2532_v3, %v2533_v6  ;;  %v8472_v19 = vcvt.s32.f32 %v3063_v4  ;;  %v3609_v3 = vld [vmem:[%s9780_s6 + $0xe8] sm:$0xff]  ;;  %v2535_v6 = vsel %vm2407_vm3, %v7626_v40, 512 }
 0x496   : > { %5705 = vmatpush1.bf16.msra.mxu1 %v5704_v56  ;;  %v8469_v12 = vpop.xlane.xlu0 %2586  ;;  %vm3078_vm1 = vcmp.lt.s32.totalorder %v3077_v52, %v2534_v17  ;;  %v10181_v56 = vld [vmem:[#allocation119_spill] sm:$0xff] }
 0x497   : > { %5706 = vmatprep.subr.bf16.mxu1 %v10123_v32  ;;  %vm2588_vm5 = vcmp.eq.f32.partialorder %v7787_v55, %v8469_v12  ;;  %v2274_v43 = vpop.xlane.xlu1 %2273  ;;  %v3079_v48 = vsel %vm3078_vm1, %v3077_v52, %v2534_v17  ;;  %v2602_v55 = vand.u32 65535, %v7816_v27  ;;  %v5710_v52 = vpack.c.bf16 %v3609_v3, %v3608_v39 }
 0x498   : > { %v2589_v10 = vsel %vm2588_vm5, %v2584_v1, inf  ;;  %vm2408_vm7 = vcmp.eq.f32.partialorder %v10180_v0, %v2274_v43  ;;  %vm2409_vm9 = vcmp.eq.f32.partialorder %v10181_v56, %v2274_v43  ;;  %vm2410_vm13 = vcmp.eq.f32.partialorder %v10182_v23, %v2274_v43 }
 0x499   : > { %3066 = vmin.xlane.f32.xlu0 %v8472_v19  ;;  %2590 = vmin.xlane.f32.xlu1 %v2589_v10  ;;  %v2536_v37 = vsel %vm2408_vm7, %v7578_v44, 512  ;;  %v2537_v63 = vsel %vm2409_vm9, %v7601_v38, 512  ;;  %vm2411_vm12 = vcmp.eq.f32.partialorder %v7741_v25, %v2274_v43  ;;  %vm3080_vm10 = vcmp.lt.s32.totalorder %v3079_v48, %v2535_v6 }
 0x49a   : > { %5708 = vmatpush1.bf16.msra.mxu1 %v5707_v34  ;;  %vm3096_vm14 = vcmp.lt.s32.totalorder %v2536_v37, %v2537_v63  ;;  %v2538_v4 = vsel %vm2410_vm13, %v7618_v7, 512  ;;  %v8496_v27 = vsel %vm3080_vm10, %v3079_v48, %v2535_v6  ;;  %v2539_v1 = vsel %vm2411_vm12, %v7626_v40, 512 }
 0x49b   : > { %5709 = vmatprep.subr.bf16.mxu1 %v10123_v32  ;;  %v3097_v17 = vsel %vm3096_vm14, %v2536_v37, %v2537_v63  ;;  %v3083_v61 = vshra.s32 %v8496_v27, 16  ;;  %v2604_v34 = vcvt.s32.f32 %v2602_v55 }
 0x49c   : > { %vm3098_vm2 = vcmp.lt.s32.totalorder %v3097_v17, %v2538_v4 }
 0x49d   : > { %v8499_v60 = vpop.xlane.xlu0 %2606  ;;  %v3099_v10 = vsel %vm3098_vm2, %v3097_v17, %v2538_v4  ;;  %v8504_v25 = vcvt.s32.f32 %v3083_v61 }
 0x49e   : > { %5711 = vmatpush1.bf16.msra.mxu1 %v5710_v52  ;;  %vm2608_vm11 = vcmp.eq.f32.partialorder %v7843_v36, %v8499_v60  ;;  %vm3100_vm15 = vcmp.lt.s32.totalorder %v3099_v10, %v2539_v1  ;;  %v2622_v36 = vand.u32 65535, %v7886_v2  ;;  %v2642_v52 = vand.u32 65535, %v7946_v14 }
 0x49f   : > { %5712 = vmatprep.subr.bf16.mxu1 %v10123_v32  ;;  %v2609_v43 = vsel %vm2608_vm11, %v2604_v34, inf  ;;  %v8507_v48 = vsel %vm3100_vm15, %v3099_v10, %v2539_v1  ;;  %3086 = vmin.xlane.f32.xlu0 %v8504_v25 }
 0x4a0   : > { %2610 = vmin.xlane.f32.xlu1 %v2609_v43  ;;  %v2279_v0 = vpop.xlane.xlu1 %2278  ;;  %v3103_v56 = vshra.s32 %v8507_v48, 16  ;;  %v2624_v37 = vcvt.s32.f32 %v2622_v36  ;;  %v2644_v43 = vcvt.s32.f32 %v2642_v52 }
 0x4a1   : > { %vm2412_vm4 = vcmp.eq.f32.partialorder %v7754_v57, %v2279_v0  ;;  %vm2413_vm6 = vcmp.eq.f32.partialorder %v7762_v59, %v2279_v0  ;;  %vm2414_vm8 = vcmp.eq.f32.partialorder %v7757_v28, %v2279_v0  ;;  %vm2415_vm3 = vcmp.eq.f32.partialorder %v7808_v30, %v2279_v0  ;;  %v3610_v59 = vld [vmem:[%s9780_s6 + $0xf0] sm:$0xff]  ;;  %v3611_v57 = vld [vmem:[%s9780_s6 + $0xf8] sm:$0xff] }
 0x4a2   : > { %v2540_v23 = vsel %vm2412_vm4, %v7578_v44, 512  ;;  %v2541_v39 = vsel %vm2413_vm6, %v7601_v38, 512  ;;  %v8518_v3 = vcvt.s32.f32 %v3103_v56  ;;  %v2542_v55 = vsel %vm2414_vm8, %v7618_v7, 512 }
 0x4a3   : > { %vm3116_vm1 = vcmp.lt.s32.totalorder %v2540_v23, %v2541_v39  ;;  %v5713_v28 = vpack.c.bf16 %v3611_v57, %v3610_v59  ;;  %v2543_v30 = vsel %vm2415_vm3, %v7626_v40, 512  ;;  %v2682_v59 = vand.u32 65535, %v8031_v20 }
 0x4a4   : > { %v3117_v6 = vsel %vm3116_vm1, %v2540_v23, %v2541_v39  ;;  %3106 = vmin.xlane.f32.xlu0 %v8518_v3 }
 0x4a5   : > { %vm3118_vm5 = vcmp.lt.s32.totalorder %v3117_v6, %v2542_v55  ;;  %5714 = vmatpush1.bf16.msra.mxu1 %v5713_v28  ;;  %v10183_v28 = vld [vmem:[#allocation120_spill] sm:$0xff] }
 0x4a6   : > { %v8528_v2 = vpop.xlane.xlu0 %2626  ;;  %v3119_v63 = vsel %vm3118_vm5, %v3117_v6, %v2542_v55  ;;  %5715 = vmatprep.subr.bf16.mxu1 %v10123_v32 }
 0x4a7   : > { %vm2628_vm7 = vcmp.eq.f32.partialorder %v7914_v33, %v8528_v2  ;;  %vm3120_vm9 = vcmp.lt.s32.totalorder %v3119_v63, %v2543_v30 }
 0x4a8   : > { %v2284_v4 = vpop.xlane.xlu1 %2283  ;;  %v2629_v17 = vsel %vm2628_vm7, %v2624_v37, inf  ;;  %v8541_v33 = vsel %vm3120_vm9, %v3119_v63, %v2543_v30  ;;  %v10184_v30 = vld [vmem:[#allocation121_spill] sm:$0xff] }
 0x4a9   : > { %vm2416_vm13 = vcmp.eq.f32.partialorder %v7800_v47, %v2284_v4  ;;  %vm2417_vm12 = vcmp.eq.f32.partialorder %v7803_v51, %v2284_v4  ;;  %vm2418_vm14 = vcmp.eq.f32.partialorder %v7821_v35, %v2284_v4  ;;  %2630 = vmin.xlane.f32.xlu1 %v2629_v17  ;;  %vm2419_vm10 = vcmp.eq.f32.partialorder %v7831_v24, %v2284_v4  ;;  %v10185_v4 = vld [vmem:[#allocation40_spill] sm:$0xff] }
 0x4aa   : > { %v2544_v61 = vsel %vm2416_vm13, %v7578_v44, 512  ;;  %v2545_v1 = vsel %vm2417_vm12, %v7601_v38, 512  ;;  %v2546_v47 = vsel %vm2418_vm14, %v7618_v7, 512  ;;  %v3123_v51 = vshra.s32 %v8541_v33, 16 }
 0x4ab   : > { %vm3136_vm2 = vcmp.lt.s32.totalorder %v2544_v61, %v2545_v1  ;;  %v2662_v35 = vand.u32 65535, %v7989_v31  ;;  %v2547_v14 = vsel %vm2419_vm10, %v7626_v40, 512  ;;  %v2702_v17 = vand.u32 65535, %v10185_v4 }
 0x4ac   : > { %v3137_v34 = vsel %vm3136_vm2, %v2544_v61, %v2545_v1  ;;  %v8549_v0 = vcvt.s32.f32 %v3123_v51  ;;  %v2782_v4 = vand.u32 65535, %v8127_v62  ;;  %v10192_v62 = vld [vmem:[#allocation46_spill] sm:$0xff] }
 0x4ad   : > { %vm3138_vm11 = vcmp.lt.s32.totalorder %v3137_v34, %v2546_v47  ;;  %v8546_v10 = vpop.xlane.xlu0 %2646  ;;  %v2664_v39 = vcvt.s32.f32 %v2662_v35 }
 0x4ae   : > { %v3139_v56 = vsel %vm3138_vm11, %v3137_v34, %v2546_v47  ;;  %vm2648_vm15 = vcmp.eq.f32.partialorder %v7969_v11, %v8546_v10  ;;  %3126 = vmin.xlane.f32.xlu0 %v8549_v0  ;;  %v2684_v47 = vcvt.s32.f32 %v2682_v59  ;;  %v10187_v34 = vld [vmem:[#allocation43_spill] sm:$0xff] }
 0x4af   : > { %v2289_v24 = vpop.xlane.xlu1 %2288  ;;  %vm3140_vm4 = vcmp.lt.s32.totalorder %v3139_v56, %v2547_v14  ;;  %v2649_v36 = vsel %vm2648_vm15, %v2644_v43, inf }
 0x4b0   : > { %vm2420_vm6 = vcmp.eq.f32.partialorder %v7834_v22, %v2289_v24  ;;  %vm2421_vm8 = vcmp.eq.f32.partialorder %v7837_v58, %v2289_v24  ;;  %vm2422_vm3 = vcmp.eq.f32.partialorder %v7846_v15, %v2289_v24  ;;  %2650 = vmin.xlane.f32.xlu1 %v2649_v36  ;;  %v8559_v55 = vsel %vm3140_vm4, %v3139_v56, %v2547_v14 }
 0x4b1   : > { %v2548_v31 = vsel %vm2420_vm6, %v7578_v44, 512  ;;  %v2549_v23 = vsel %vm2421_vm8, %v7601_v38, 512  ;;  %vm2423_vm5 = vcmp.eq.f32.partialorder %v7861_v49, %v2289_v24  ;;  %v2550_v22 = vsel %vm2422_vm3, %v7618_v7, 512 }
 0x4b2   : > { %vm3156_vm1 = vcmp.lt.s32.totalorder %v2548_v31, %v2549_v23  ;;  %v3143_v15 = vshra.s32 %v8559_v55, 16  ;;  %v2551_v49 = vsel %vm2423_vm5, %v7626_v40, 512  ;;  %v2704_v36 = vcvt.s32.f32 %v2702_v17 }
 0x4b3   : > { %v8561_v11 = vpop.xlane.xlu0 %2666  ;;  %v3157_v58 = vsel %vm3156_vm1, %v2548_v31, %v2549_v23  ;;  %v2294_v6 = vpop.xlane.xlu1 %2293  ;;  %v2722_v23 = vand.u32 65535, %v8082_v13 }
 0x4b4   : > { %vm2668_vm7 = vcmp.eq.f32.partialorder %v8011_v41, %v8561_v11  ;;  %vm3158_vm9 = vcmp.lt.s32.totalorder %v3157_v58, %v2550_v22  ;;  %vm2424_vm13 = vcmp.eq.f32.partialorder %v7895_v16, %v2294_v6  ;;  %vm2425_vm12 = vcmp.eq.f32.partialorder %v10183_v28, %v2294_v6  ;;  %v10186_v41 = vld [vmem:[#allocation42_spill] sm:$0xff] }
 0x4b5   : > { %v2669_v57 = vsel %vm2668_vm7, %v2664_v39, inf  ;;  %vm2426_vm14 = vcmp.eq.f32.partialorder %v10184_v30, %v2294_v6  ;;  %v2552_v37 = vsel %vm2424_vm13, %v7578_v44, 512  ;;  %v2553_v63 = vsel %vm2425_vm12, %v7601_v38, 512 }
 0x4b6   : > { %2670 = vmin.xlane.f32.xlu1 %v2669_v57  ;;  %vm2427_vm10 = vcmp.eq.f32.partialorder %v10186_v41, %v2294_v6  ;;  %vm3176_vm2 = vcmp.lt.s32.totalorder %v2552_v37, %v2553_v63  ;;  %v8577_v16 = vcvt.s32.f32 %v3143_v15  ;;  %v3159_v20 = vsel %vm3158_vm9, %v3157_v58, %v2550_v22  ;;  %v10188_v22 = vld [vmem:[#allocation47_spill] sm:$0xff] }
 0x4b7   : > { %v2554_v61 = vsel %vm2426_vm14, %v7618_v7, 512  ;;  %v3177_v1 = vsel %vm3176_vm2, %v2552_v37, %v2553_v63  ;;  %vm3160_vm11 = vcmp.lt.s32.totalorder %v3159_v20, %v2551_v49  ;;  %v2555_v35 = vsel %vm2427_vm10, %v7626_v40, 512 }
 0x4b8   : > { %v8579_v52 = vpop.xlane.xlu0 %2686  ;;  %vm3178_vm4 = vcmp.lt.s32.totalorder %v3177_v1, %v2554_v61  ;;  %3146 = vmin.xlane.f32.xlu0 %v8577_v16  ;;  %v8585_v51 = vsel %vm3160_vm11, %v3159_v20, %v2551_v49  ;;  %v2724_v57 = vcvt.s32.f32 %v2722_v23  ;;  %v2742_v28 = vand.u32 65535, %v8102_v26  ;;  %v10194_v23 = vld [vmem:[#allocation51_spill] sm:$0xff] }
 0x4b9   : > { %vm2688_vm15 = vcmp.eq.f32.partialorder %v10187_v34, %v8579_v52  ;;  %v3163_v43 = vshra.s32 %v8585_v51, 16  ;;  %v3179_v56 = vsel %vm3178_vm4, %v3177_v1, %v2554_v61  ;;  %v2762_v37 = vand.u32 65535, %v8120_v29  ;;  %v10190_v61 = vld [vmem:[#allocation45_spill] sm:$0xff] }
 0x4ba   : > { %v2689_v14 = vsel %vm2688_vm15, %v2684_v47, inf  ;;  %vm3180_vm6 = vcmp.lt.s32.totalorder %v3179_v56, %v2555_v35  ;;  %v2744_v49 = vcvt.s32.f32 %v2742_v28  ;;  %v2784_v29 = vcvt.s32.f32 %v2782_v4  ;;  %v10191_v1 = vld [vmem:[#allocation41_spill] sm:$0xff] }
 0x4bb   : > { %2690 = vmin.xlane.f32.xlu1 %v2689_v14  ;;  %v8591_v31 = vcvt.s32.f32 %v3163_v43  ;;  %v8594_v39 = vsel %vm3180_vm6, %v3179_v56, %v2555_v35  ;;  %v2764_v17 = vcvt.s32.f32 %v2762_v37  ;;  %v2802_v47 = vand.u32 65535, %v10191_v1  ;;  %v10193_v43 = vld [vmem:[#allocation48_spill] sm:$0xff] }
 0x4bc   : > { %v3183_v58 = vshra.s32 %v8594_v39, 16  ;;  %v2822_v56 = vand.u32 65535, %v10193_v43  ;;  %v10201_v43 = vld [vmem:[#allocation54_spill] sm:$0xff] }
 0x4bd   : > { %v8589_v24 = vpop.xlane.xlu0 %2706  ;;  %3166 = vmin.xlane.f32.xlu0 %v8591_v31  ;;  %v2804_v35 = vcvt.s32.f32 %v2802_v47 }
 0x4be   : > { %vm2708_vm8 = vcmp.eq.f32.partialorder %v10188_v22, %v8589_v24  ;;  %v8600_v15 = vcvt.s32.f32 %v3183_v58  ;;  %v2824_v22 = vcvt.s32.f32 %v2822_v56 }
 0x4bf   : > { %v2709_v6 = vsel %vm2708_vm8, %v2704_v36, inf }
 0x4c0   : > { %2710 = vmin.xlane.f32.xlu1 %v2709_v6  ;;  %v10195_v6 = vld [vmem:[#allocation49_spill] sm:$0xff] }
 0x4c1   : > { %v8602_v59 = vpop.xlane.xlu0 %2726  ;;  %3186 = vmin.xlane.f32.xlu0 %v8600_v15 }
 0x4c2   : > { %vm2728_vm3 = vcmp.eq.f32.partialorder %v8098_v5, %v8602_v59  ;;  %v10189_v5 = vld [vmem:[#allocation44_spill] sm:$0xff] }
 0x4c3   : > { %v2729_v13 = vsel %vm2728_vm3, %v2724_v57, inf  ;;  %v2842_v57 = vand.u32 65535, %v10195_v6  ;;  %v10203_v6 = vld [vmem:[#allocation59_spill] sm:$0xff] }
 0x4c4   : > { %2730 = vmin.xlane.f32.xlu1 %v2729_v13 }
 0x4c5   : > { %v8608_v30 = vpop.xlane.xlu0 %2746  ;;  %v2844_v13 = vcvt.s32.f32 %v2842_v57 }
 0x4c6   : > { %vm2748_vm1 = vcmp.eq.f32.partialorder %v8118_v53, %v8608_v30 }
 0x4c7   : > { %v2749_v63 = vsel %vm2748_vm1, %v2744_v49, inf  ;;  %v10196_v49 = vld [vmem:[#allocation50_spill] sm:$0xff]  ;;  %vm4455_vm1 = vcmask 7168  }
 0x4c8   : > { %2750 = vmin.xlane.f32.xlu1 %v2749_v63  ;;  %v10197_v63 = vld [vmem:[#allocation55_spill] sm:$0xff] }
 0x4c9   : > { %v8614_v26 = vpop.xlane.xlu0 %2766  ;;  %v2862_v4 = vand.u32 65535, %v10197_v63 }
 0x4ca   : > { %vm2768_vm5 = vcmp.eq.f32.partialorder %v10189_v5, %v8614_v26  ;;  %v8618_v41 = vpop.xlane.xlu1 %2786 }
 0x4cb   : > { %v2769_v20 = vsel %vm2768_vm5, %v2764_v17, inf  ;;  %vm2788_vm7 = vcmp.eq.f32.partialorder %v10190_v61, %v8618_v41  ;;  %v2864_v5 = vcvt.s32.f32 %v2862_v4  ;;  %v10205_v4 = vld [vmem:[#allocation57_spill] sm:$0xff] }
 0x4cc   : > { %2770 = vmin.xlane.f32.xlu1 %v2769_v20  ;;  %v2789_v53 = vsel %vm2788_vm7, %v2784_v29, inf  ;;  %v10198_v20 = vld [vmem:[#allocation53_spill] sm:$0xff]  ;;  %v10199_v29 = vld [vmem:[#allocation52_spill] sm:$0xff] }
 0x4cd   : > { %v8623_v34 = vpop.xlane.xlu0 %2806  ;;  %v2882_v61 = vand.u32 65535, %v10198_v20 }
 0x4ce   : > { %vm2808_vm9 = vcmp.eq.f32.partialorder %v10192_v62, %v8623_v34  ;;  %v8627_v14 = vpop.xlane.xlu1 %2826  ;;  %v10200_v62 = vld [vmem:[#allocation56_spill] sm:$0xff] }
 0x4cf   : > { %v2809_v36 = vsel %vm2808_vm9, %v2804_v35, inf  ;;  %vm2828_vm13 = vcmp.eq.f32.partialorder %v10194_v23, %v8627_v14  ;;  %v2902_v35 = vand.u32 65535, %v10200_v62 }
 0x4d0   : > { %2790 = vmin.xlane.f32.xlu1 %v2789_v53  ;;  %v2829_v58 = vsel %vm2828_vm13, %v2824_v22, inf  ;;  %v2884_v53 = vcvt.s32.f32 %v2882_v61  ;;  %v10202_v22 = vld [vmem:[#allocation60_spill] sm:$0xff] }
 0x4d1   : > { %v2904_v23 = vcvt.s32.f32 %v2902_v35  ;;  %v2982_v35 = vand.u32 65535, %v8352_v8 }
 0x4d4   : > { %2810 = vmin.xlane.f32.xlu1 %v2809_v36 }
 0x4d8   : > { %2830 = vmin.xlane.f32.xlu1 %v2829_v58  ;;  %v2922_v58 = vand.u32 65535, %v10202_v22  ;;  %v10206_v22 = vld [vmem:[#allocation63_spill] sm:$0xff] }
 0x4f6   : > { %v8633_v28 = vpop.xlane.xlu0 %2846 }
 0x4f7   : > { %vm2848_vm12 = vcmp.eq.f32.partialorder %v10196_v49, %v8633_v28  ;;  %v2924_v49 = vcvt.s32.f32 %v2922_v58  ;;  %v10207_v58 = vld [vmem:[#allocation64_spill] sm:$0xff] }
 0x4f8   : > { %v2849_v37 = vsel %vm2848_vm12, %v2844_v13, inf }
 0x4f9   : > { %2850 = vmin.xlane.f32.xlu0 %v2849_v37  ;;  %v10204_v37 = vld [vmem:[#allocation58_spill] sm:$0xff] }
 0x4fa   : > { %v2942_v63 = vand.u32 65535, %v10204_v37  ;;  %v10209_v37 = vld [vmem:[#allocation61_spill] sm:$0xff] }
 0x4fc   : > { %v2944_v61 = vcvt.s32.f32 %v2942_v63  ;;  %v2573_v63 = vcvt.f32.s32 %v8434_v45  ;;  %v3612_v45 = vld [vmem:[%s9780_s6 + $0x100] sm:$0xff] }
 0x4fd   : > { %v8638_v17 = vpop.xlane.xlu1 %2866 }
 0x4fe   : > { %vm2868_vm14 = vcmp.eq.f32.partialorder %v10199_v29, %v8638_v17  ;;  %v2962_v29 = vand.u32 65535, %v8348_v18  ;;  %v3002_v18 = vand.u32 65535, %v10206_v22  ;;  %v3613_v22 = vld [vmem:[%s9780_s6 + $0x108] sm:$0xff] }
 0x4ff   : > { %v2869_v1 = vsel %vm2868_vm14, %v2864_v5, inf }
 0x500   : > { %2870 = vmin.xlane.f32.xlu1 %v2869_v1  ;;  %v2964_v62 = vcvt.s32.f32 %v2962_v29 }
 0x501   : > { %v8643_v47 = vpop.xlane.xlu0 %2886 }
 0x502   : > { %vm2888_vm10 = vcmp.eq.f32.partialorder %v10201_v43, %v8643_v47 }
 0x503   : > { %v2889_v56 = vsel %vm2888_vm10, %v2884_v53, inf }
 0x504   : > { %2890 = vmin.xlane.f32.xlu0 %v2889_v56 }
 0x505   : > { %v8648_v36 = vpop.xlane.xlu1 %2906 }
 0x506   : > { %vm2908_vm2 = vcmp.eq.f32.partialorder %v10203_v6, %v8648_v36 }
 0x507   : > { %v2909_v57 = vsel %vm2908_vm2, %v2904_v23, inf  ;;  %v2984_v23 = vcvt.s32.f32 %v2982_v35 }
 0x508   : > { %2910 = vmin.xlane.f32.xlu1 %v2909_v57  ;;  %v3004_v57 = vcvt.s32.f32 %v3002_v18 }
 0x50a   : > { %v8653_v13 = vpop.xlane.xlu0 %2926 }
 0x50b   : > { %vm2928_vm11 = vcmp.eq.f32.partialorder %v10205_v4, %v8653_v13 }
 0x50c   : > { %v2929_v5 = vsel %vm2928_vm11, %v2924_v49, inf  ;;  %v10208_v49 = vld [vmem:[#allocation62_spill] sm:$0xff] }
 0x50d   : > { %2930 = vmin.xlane.f32.xlu0 %v2929_v5  ;;  %v3022_v8 = vand.u32 65535, %v10208_v49 }
 0x50e   : > { %v8658_v20 = vpop.xlane.xlu0 %2946 }
 0x50f   : > { %vm2948_vm15 = vcmp.eq.f32.partialorder %v8346_v42, %v8658_v20  ;;  %v3024_v5 = vcvt.s32.f32 %v3022_v8 }
 0x510   : > { %v2949_v1 = vsel %vm2948_vm15, %v2944_v61, inf  ;;  %v3042_v61 = vand.u32 65535, %v8431_v21 }
 0x511   : > { %2950 = vmin.xlane.f32.xlu1 %v2949_v1 }
 0x512   : > { %v8663_v53 = vpop.xlane.xlu0 %2966 }
 0x513   : > { %vm2968_vm4 = vcmp.eq.f32.partialorder %v8365_v46, %v8663_v53 }
 0x514   : > { %v2969_v43 = vsel %vm2968_vm4, %v2964_v62, inf  ;;  %v2574_v62 = vshll.u32 %v2573_v63, 16 }
 0x515   : > { %2970 = vmin.xlane.f32.xlu0 %v2969_v43 }
 0x516   : > { %v8668_v56 = vpop.xlane.xlu0 %2986 }
 0x517   : > { %vm2988_vm6 = vcmp.eq.f32.partialorder %v10207_v58, %v8668_v56  ;;  %v2593_v58 = vcvt.f32.s32 %v8469_v12  ;;  %v6025_v12 = vmov 1.0  }
 0x518   : > { %v2989_v42 = vsel %vm2988_vm6, %v2984_v23, inf  ;;  %v3044_v23 = vcvt.s32.f32 %v3042_v61  ;;  %v3616_v61 = vld [vmem:[%s9780_s6 + $0x120] sm:$0xff] }
 0x519   : > { %2990 = vmin.xlane.f32.xlu1 %v2989_v42  ;;  %v5716_v42 = vpack.c.bf16 %v3613_v22, %v3612_v45 }
 0x51a   : > { %v8673_v6 = vpop.xlane.xlu0 %3006 }
 0x51b   : > { %vm3008_vm8 = vcmp.eq.f32.partialorder %v10209_v37, %v8673_v6  ;;  %v2594_v37 = vshll.u32 %v2593_v58, 16  ;;  %v3102_v58 = vand.u32 65535, %v8507_v48 }
 0x51c   : > { %v3009_v46 = vsel %vm3008_vm8, %v3004_v57, inf }
 0x51d   : > { %3010 = vmin.xlane.f32.xlu0 %v3009_v46  ;;  %v3104_v48 = vcvt.s32.f32 %v3102_v58 }
 0x51e   : > { %v8679_v4 = vpop.xlane.xlu0 %3026 }
 0x51f   : > { %vm3028_vm3 = vcmp.eq.f32.partialorder %v8429_v50, %v8679_v4  ;;  %v2571_v1 = vpop.xlane.xlu1 %2570  ;;  %v3062_v50 = vand.u32 65535, %v8451_v54  ;;  %v3615_v54 = vld [vmem:[%s9780_s6 + $0x118] sm:$0xff] }
 0x520   : > { %v3029_v29 = vsel %vm3028_vm3, %v3024_v5, inf  ;;  %v2572_v35 = vcvt.f32.s32 %v2571_v1 }
 0x521   : > { %3030 = vmin.xlane.f32.xlu1 %v3029_v29  ;;  %v3064_v49 = vcvt.s32.f32 %v3062_v50  ;;  %v3617_v29 = vld [vmem:[%s9780_s6 + $0x128] sm:$0xff] }
 0x522   : > { %v8684_v43 = vpop.xlane.xlu0 %3046  ;;  %v8702_v21 = vadd.s32 %v2574_v62, %v2572_v35  ;;  %v2613_v62 = vcvt.f32.s32 %v8499_v60  ;;  %v5722_v35 = vpack.c.bf16 %v3617_v29, %v3616_v61  ;;  %v3619_v60 = vld [vmem:[%s9780_s6 + $0x138] sm:$0xff] }
 0x523   : > { %vm3048_vm5 = vcmp.eq.f32.partialorder %v8449_v9, %v8684_v43  ;;  %v3614_v9 = vld [vmem:[%s9780_s6 + $0x110] sm:$0xff] }
 0x524   : > { %v3049_v18 = vsel %vm3048_vm5, %v3044_v23, inf  ;;  %4825 = vst.msk [vmem:[%s8697_s23] sm:$0xff] %vm4455_vm1, %v8702_v21  ;;  %vm3197_vm7 = vcmp.eq.s32.totalorder %v7601_v38, %v8702_v21  ;;  %vm3196_vm9 = vcmp.eq.s32.totalorder %v7578_v44, %v8702_v21  ;;  %v5719_v5 = vpack.c.bf16 %v3615_v54, %v3614_v9 }
 0x525   : > { %3050 = vmin.xlane.f32.xlu0 %v3049_v18  ;;  %5203 = vmatprep.mubr.msk.f32.mxu1 %vm3197_vm7, %v6025_v12  ;;  %v2614_v50 = vshll.u32 %v2613_v62, 16  ;;  %v3122_v62 = vand.u32 65535, %v8541_v33 }
 0x526   : > { %v8719_v57 = vpop.xlane.xlu0 %3066  ;;  %v2591_v8 = vpop.xlane.xlu1 %2590  ;;  %5204 = vmatmul.mubr.msk.f32.vlgmr.msra.gmra.mrb[36].mxu1 %vm3196_vm9, %v6025_v12 }
 0x527   : > { %vm3068_vm13 = vcmp.eq.f32.partialorder %v8472_v19, %v8719_v57  ;;  %v2592_v46 = vcvt.f32.s32 %v2591_v8  ;;  %5717 = vmatpush1.bf16.msra.mxu1 %v5716_v42  ;;  %v3082_v19 = vand.u32 65535, %v8496_v27  ;;  %v3618_v27 = vld [vmem:[%s9780_s6 + $0x130] sm:$0xff]  ;;  %v3621_v8 = vld [vmem:[%s9780_s6 + $0x148] sm:$0xff] }
 0x528   : > { %v3069_v63 = vsel %vm3068_vm13, %v3064_v49, inf  ;;  %5718 = vmatprep.subr.bf16.mxu1 %v10123_v32  ;;  %v5725_v9 = vpack.c.bf16 %v3619_v60, %v3618_v27  ;;  %v3620_v49 = vld [vmem:[%s9780_s6 + $0x140] sm:$0xff]  ;;  %v3625_v27 = vld [vmem:[%s9780_s6 + $0x168] sm:$0xff] }
 0x529   : > { %3070 = vmin.xlane.f32.xlu1 %v3069_v63  ;;  %v8731_v1 = vadd.s32 %v2594_v37, %v2592_v46  ;;  %v3084_v22 = vcvt.s32.f32 %v3082_v19  ;;  %v2633_v37 = vcvt.f32.s32 %v8528_v2  ;;  %v5728_v46 = vpack.c.bf16 %v3621_v8, %v3620_v49  ;;  %v3623_v2 = vld [vmem:[%s9780_s6 + $0x158] sm:$0xff] }
 0x52a   : > { %v2673_v8 = vcvt.f32.s32 %v8561_v11 }
 0x52b   : > { %4826 = vst.msk [vmem:[%s8697_s23 + $0x8] sm:$0xff] %vm4455_vm1, %v8731_v1  ;;  %vm3201_vm12 = vcmp.eq.s32.totalorder %v7601_v38, %v8731_v1  ;;  %vm3200_vm14 = vcmp.eq.s32.totalorder %v7578_v44, %v8731_v1  ;;  %5720 = vmatpush1.bf16.msra.mxu1 %v5719_v5  ;;  %v3622_v5 = vld [vmem:[%s9780_s6 + $0x150] sm:$0xff]  ;;  %v2634_v29 = vshll.u32 %v2633_v37, 16 }
 0x52c   : > { %5205 = vmatprep.mubr.msk.f32.mxu1 %vm3201_vm12, %v6025_v12  ;;  %5721 = vmatprep.subr.bf16.mxu1 %v10123_v32  ;;  %v8751_v45 = vpop.xlane.xlu0 %3086  ;;  %v5731_v19 = vpack.c.bf16 %v3623_v2, %v3622_v5  ;;  %v2674_v5 = vshll.u32 %v2673_v8, 16  ;;  %v2733_v8 = vcvt.f32.s32 %v8602_v59  ;;  %v3635_v59 = vld [vmem:[%s9780_s6 + $0x1b8] sm:$0xff] }
 0x52d   : > { %v2611_v23 = vpop.xlane.xlu1 %2610  ;;  %5206 = vmatmul.mubr.msk.f32.gmra.mrb[38].mxu1 %vm3200_vm14, %v6025_v12  ;;  %vm3088_vm10 = vcmp.eq.f32.partialorder %v8504_v25, %v8751_v45 }
 0x52e   : > { %v2612_v18 = vcvt.f32.s32 %v2611_v23  ;;  %v3089_v42 = vsel %vm3088_vm10, %v3084_v22, inf  ;;  %v2653_v23 = vcvt.f32.s32 %v8546_v10  ;;  %v3626_v10 = vld [vmem:[%s9780_s6 + $0x170] sm:$0xff] }
 0x52f   : > { %5723 = vmatpush1.bf16.msra.mxu1 %v5722_v35  ;;  %3090 = vmin.xlane.f32.xlu0 %v3089_v42  ;;  %v3624_v35 = vld [vmem:[%s9780_s6 + $0x160] sm:$0xff] }
 0x530   : > { %v8756_v54 = vadd.s32 %v2614_v50, %v2612_v18  ;;  %5724 = vmatprep.subr.bf16.mxu1 %v10123_v32  ;;  %v5734_v33 = vpack.c.bf16 %v3625_v27, %v3624_v35  ;;  %v3124_v50 = vcvt.s32.f32 %v3122_v62  ;;  %v3627_v18 = vld [vmem:[%s9780_s6 + $0x178] sm:$0xff]  ;;  %v2654_v42 = vshll.u32 %v2653_v23, 16 }
 0x531   : > { %v8772_v25 = vpop.xlane.xlu0 %3106  ;;  %v2713_v27 = vcvt.f32.s32 %v8589_v24 }
 0x532   : > { %4827 = vst.msk [vmem:[%s8697_s23 + $0x10] sm:$0xff] %vm4455_vm1, %v8756_v54  ;;  %vm3205_vm2 = vcmp.eq.s32.totalorder %v7601_v38, %v8756_v54  ;;  %vm3204_vm11 = vcmp.eq.s32.totalorder %v7578_v44, %v8756_v54  ;;  %vm3108_vm15 = vcmp.eq.f32.partialorder %v8518_v3, %v8772_v25 }
 0x533   : > { %5207 = vmatprep.mubr.msk.f32.mxu1 %vm3205_vm2, %v6025_v12  ;;  %5726 = vmatpush1.bf16.msra.mxu1 %v5725_v9  ;;  %v3109_v63 = vsel %vm3108_vm15, %v3104_v48, inf  ;;  %v5737_v48 = vpack.c.bf16 %v3627_v18, %v3626_v10 }
 0x534   : > { %5208 = vmatmul.mubr.msk.f32.gmra.mrb[40].mxu1 %vm3204_vm11, %v6025_v12  ;;  %5727 = vmatprep.subr.bf16.mxu1 %v10123_v32 }
 0x535   : > { %3110 = vmin.xlane.f32.xlu1 %v3109_v63  ;;  %v3142_v63 = vand.u32 65535, %v8559_v55  ;;  %v3630_v55 = vld [vmem:[%s9780_s6 + $0x190] sm:$0xff] }
 0x536   : > { %v2631_v61 = vpop.xlane.xlu1 %2630 }
 0x537   : > { %v2632_v3 = vcvt.f32.s32 %v2631_v61  ;;  %5729 = vmatpush1.bf16.msra.mxu1 %v5728_v46  ;;  %v3628_v46 = vld [vmem:[%s9780_s6 + $0x180] sm:$0xff]  ;;  %v3144_v35 = vcvt.s32.f32 %v3142_v63 }
 0x538   : > { %5730 = vmatprep.subr.bf16.mxu1 %v10123_v32 }
 0x539   : > { %v8794_v60 = vadd.s32 %v2634_v29, %v2632_v3  ;;  %v2693_v29 = vcvt.f32.s32 %v8579_v52  ;;  %v3631_v3 = vld [vmem:[%s9780_s6 + $0x198] sm:$0xff]  ;;  %v3162_v52 = vand.u32 65535, %v8585_v51  ;;  %v3633_v51 = vld [vmem:[%s9780_s6 + $0x1a8] sm:$0xff] }
 0x53b   : > { %4828 = vst.msk [vmem:[%s8697_s23 + $0x18] sm:$0xff] %vm4455_vm1, %v8794_v60  ;;  %vm3209_vm4 = vcmp.eq.s32.totalorder %v7601_v38, %v8794_v60  ;;  %vm3208_vm6 = vcmp.eq.s32.totalorder %v7578_v44, %v8794_v60  ;;  %5732 = vmatpush1.bf16.msra.mxu1 %v5731_v19  ;;  %v8805_v22 = vpop.xlane.xlu0 %3126  ;;  %v2694_v10 = vshll.u32 %v2693_v29, 16 }
 0x53c   : > { %5209 = vmatprep.mubr.msk.f32.mxu1 %vm3209_vm4, %v6025_v12  ;;  %5733 = vmatprep.subr.bf16.mxu1 %v10123_v32  ;;  %vm3128_vm8 = vcmp.eq.f32.partialorder %v8549_v0, %v8805_v22  ;;  %v3629_v0 = vld [vmem:[%s9780_s6 + $0x188] sm:$0xff] }
 0x53d   : > { %v2651_v58 = vpop.xlane.xlu1 %2650  ;;  %5210 = vmatmul.mubr.msk.f32.gmra.mrb[42].mxu1 %vm3208_vm6, %v6025_v12  ;;  %v3129_v49 = vsel %vm3128_vm8, %v3124_v50, inf  ;;  %v5740_v61 = vpack.c.bf16 %v3629_v0, %v3628_v46  ;;  %v5743_v50 = vpack.c.bf16 %v3631_v3, %v3630_v55 }
 0x53e   : > { %v2652_v9 = vcvt.f32.s32 %v2651_v58  ;;  %3130 = vmin.xlane.f32.xlu0 %v3129_v49  ;;  %v2714_v49 = vshll.u32 %v2713_v27, 16 }
 0x53f   : > { %5735 = vmatpush1.bf16.msra.mxu1 %v5734_v33 }
 0x540   : > { %v8818_v37 = vadd.s32 %v2654_v42, %v2652_v9  ;;  %5736 = vmatprep.subr.bf16.mxu1 %v10123_v32  ;;  %v3164_v42 = vcvt.s32.f32 %v3162_v52  ;;  %v3182_v9 = vand.u32 65535, %v8594_v39 }
 0x542   : > { %4829 = vst.msk [vmem:[%s8697_s23 + $0x20] sm:$0xff] %vm4455_vm1, %v8818_v37  ;;  %vm3213_vm3 = vcmp.eq.s32.totalorder %v7601_v38, %v8818_v37  ;;  %vm3212_vm5 = vcmp.eq.s32.totalorder %v7578_v44, %v8818_v37 }
 0x543   : > { %v2671_v11 = vpop.xlane.xlu1 %2670  ;;  %5211 = vmatprep.mubr.msk.f32.mxu1 %vm3213_vm3, %v6025_v12  ;;  %5738 = vmatpush1.bf16.msra.mxu1 %v5737_v48 }
 0x544   : > { %v2672_v2 = vcvt.f32.s32 %v2671_v11  ;;  %5212 = vmatmul.mubr.msk.f32.gmra.mrb[44].mxu1 %vm3212_vm5, %v6025_v12  ;;  %5739 = vmatprep.subr.bf16.mxu1 %v10123_v32 }
 0x545   : > { %v8847_v62 = vpop.xlane.xlu0 %3146 }
 0x546   : > { %v8845_v19 = vadd.s32 %v2674_v5, %v2672_v2  ;;  %vm3148_vm7 = vcmp.eq.f32.partialorder %v8577_v16, %v8847_v62  ;;  %v3632_v16 = vld [vmem:[%s9780_s6 + $0x1a0] sm:$0xff]  ;;  %v3184_v5 = vcvt.s32.f32 %v3182_v9  ;;  %v2734_v2 = vshll.u32 %v2733_v8, 16 }
 0x547   : > { %v3149_v33 = vsel %vm3148_vm7, %v3144_v35, inf  ;;  %5741 = vmatpush1.bf16.msra.mxu1 %v5740_v61  ;;  %v5746_v46 = vpack.c.bf16 %v3633_v51, %v3632_v16  ;;  %v2753_v61 = vcvt.f32.s32 %v8608_v30  ;;  %v3637_v30 = vld [vmem:[%s9780_s6 + $0x1c8] sm:$0xff]  ;;  %v2793_v51 = vcvt.f32.s32 %v8618_v41 }
 0x548   : > { %4830 = vst.msk [vmem:[%s8697_s23 + $0x28] sm:$0xff] %vm4455_vm1, %v8845_v19  ;;  %v2691_v23 = vpop.xlane.xlu1 %2690  ;;  %vm3217_vm9 = vcmp.eq.s32.totalorder %v7601_v38, %v8845_v19  ;;  %vm3216_vm13 = vcmp.eq.s32.totalorder %v7578_v44, %v8845_v19  ;;  %3150 = vmin.xlane.f32.xlu1 %v3149_v33  ;;  %5742 = vmatprep.subr.bf16.mxu1 %v10123_v32 }
 0x549   : > { %v2692_v24 = vcvt.f32.s32 %v2691_v23  ;;  %5213 = vmatprep.mubr.msk.f32.mxu1 %vm3217_vm9, %v6025_v12  ;;  %v2754_v52 = vshll.u32 %v2753_v61, 16 }
 0x54a   : > { %5214 = vmatmul.mubr.msk.f32.gmra.mrb[46].mxu1 %vm3216_vm13, %v6025_v12  ;;  %v8871_v58 = vpop.xlane.xlu0 %3166 }
 0x54b   : > { %v8869_v18 = vadd.s32 %v2694_v10, %v2692_v24  ;;  %vm3168_vm12 = vcmp.eq.f32.partialorder %v8591_v31, %v8871_v58  ;;  %5744 = vmatpush1.bf16.msra.mxu1 %v5743_v50  ;;  %v3634_v31 = vld [vmem:[%s9780_s6 + $0x1b0] sm:$0xff]  ;;  %v2773_v50 = vcvt.f32.s32 %v8614_v26  ;;  %v3639_v26 = vld [vmem:[%s9780_s6 + $0x1d8] sm:$0xff] }
 0x54c   : > { %v3169_v39 = vsel %vm3168_vm12, %v3164_v42, inf  ;;  %5745 = vmatprep.subr.bf16.mxu1 %v10123_v32  ;;  %v5749_v55 = vpack.c.bf16 %v3635_v59, %v3634_v31  ;;  %v3638_v24 = vld [vmem:[%s9780_s6 + $0x1d0] sm:$0xff]  ;;  %v2813_v59 = vcvt.f32.s32 %v8623_v34  ;;  %v2833_v34 = vcvt.f32.s32 %v8627_v14 }
 0x54d   : > { %v2711_v48 = vpop.xlane.xlu1 %2710  ;;  %4831 = vst.msk [vmem:[%s8697_s23 + $0x30] sm:$0xff] %vm4455_vm1, %v8869_v18  ;;  %vm3221_vm14 = vcmp.eq.s32.totalorder %v7601_v38, %v8869_v18  ;;  %vm3220_vm10 = vcmp.eq.s32.totalorder %v7578_v44, %v8869_v18  ;;  %3170 = vmin.xlane.f32.xlu0 %v3169_v39  ;;  %v5755_v9 = vpack.c.bf16 %v3639_v26, %v3638_v24  ;;  %v2873_v26 = vcvt.f32.s32 %v8638_v17 }
 0x54e   : > { %v2712_v0 = vcvt.f32.s32 %v2711_v48  ;;  %5215 = vmatprep.mubr.msk.f32.mxu1 %vm3221_vm14, %v6025_v12  ;;  %v8895_v11 = vpop.xlane.xlu0 %3186  ;;  %v3640_v48 = vld [vmem:[%s9780_s6 + $0x1e0] sm:$0xff] }
 0x54f   : > { %5216 = vmatmul.mubr.msk.f32.gmra.mrb[48].mxu1 %vm3220_vm10, %v6025_v12  ;;  %vm3188_vm2 = vcmp.eq.f32.partialorder %v8600_v15, %v8895_v11  ;;  %v3636_v15 = vld [vmem:[%s9780_s6 + $0x1c0] sm:$0xff] }
 0x550   : > { %v8892_v63 = vadd.s32 %v2714_v49, %v2712_v0  ;;  %5747 = vmatpush1.bf16.msra.mxu1 %v5746_v46  ;;  %v3189_v35 = vsel %vm3188_vm2, %v3184_v5, inf  ;;  %v5752_v33 = vpack.c.bf16 %v3637_v30, %v3636_v15  ;;  %v2774_v49 = vshll.u32 %v2773_v50, 16  ;;  %v3641_v46 = vld [vmem:[%s9780_s6 + $0x1e8] sm:$0xff]  ;;  %v3642_v15 = vld [vmem:[%s9780_s6 + $0x1f0] sm:$0xff]  ;;  %v3643_v30 = vld [vmem:[%s9780_s6 + $0x1f8] sm:$0xff] }
 0x551   : > { %v2731_v29 = vpop.xlane.xlu1 %2730  ;;  %5748 = vmatprep.subr.bf16.mxu1 %v10123_v32  ;;  %3190 = vmin.xlane.f32.xlu1 %v3189_v35  ;;  %v2794_v0 = vshll.u32 %v2793_v51, 16  ;;  %v5758_v31 = vpack.c.bf16 %v3641_v46, %v3640_v48 }
 0x552   : > { %4832 = vst.msk [vmem:[%s8697_s23 + $0x38] sm:$0xff] %vm4455_vm1, %v8892_v63  ;;  %v2732_v3 = vcvt.f32.s32 %v2731_v29  ;;  %vm3225_vm11 = vcmp.eq.s32.totalorder %v7601_v38, %v8892_v63  ;;  %vm3224_vm15 = vcmp.eq.s32.totalorder %v7578_v44, %v8892_v63  ;;  %v2814_v29 = vshll.u32 %v2813_v59, 16 }
 0x553   : > { %5217 = vmatprep.mubr.msk.f32.mxu1 %vm3225_vm11, %v6025_v12 }
 0x554   : > { %v8915_v27 = vadd.s32 %v2734_v2, %v2732_v3  ;;  %5218 = vmatmul.mubr.msk.f32.gmra.mrb[50].mxu1 %vm3224_vm15, %v6025_v12  ;;  %v2834_v3 = vshll.u32 %v2833_v34, 16  ;;  %v2953_v34 = vcvt.f32.s32 %v8658_v20 }
 0x555   : > { %v2751_v23 = vpop.xlane.xlu1 %2750  ;;  %5750 = vmatpush1.bf16.msra.mxu1 %v5749_v55 }
 0x556   : > { %4833 = vst.msk [vmem:[%s8697_s23 + $0x40] sm:$0xff] %vm4455_vm1, %v8915_v27  ;;  %v2752_v10 = vcvt.f32.s32 %v2751_v23  ;;  %vm3229_vm4 = vcmp.eq.s32.totalorder %v7601_v38, %v8915_v27  ;;  %vm3228_vm6 = vcmp.eq.s32.totalorder %v7578_v44, %v8915_v27  ;;  %5751 = vmatprep.subr.bf16.mxu1 %v10123_v32  ;;  %v2954_v20 = vshll.u32 %v2953_v34, 16 }
 0x557   : > { %5219 = vmatprep.mubr.msk.f32.mxu1 %vm3229_vm4, %v6025_v12 }
 0x558   : > { %v8934_v16 = vadd.s32 %v2754_v52, %v2752_v10  ;;  %5220 = vmatmul.mubr.msk.f32.gmra.mrb[52].mxu1 %vm3228_vm6, %v6025_v12  ;;  %v5761_v52 = vpack.c.bf16 %v3643_v30, %v3642_v15 }
 0x559   : > { %v2771_v42 = vpop.xlane.xlu1 %2770  ;;  %5753 = vmatpush1.bf16.msra.mxu1 %v5752_v33  ;;  %v2853_v33 = vcvt.f32.s32 %v8633_v28  ;;  %v2874_v28 = vshll.u32 %v2873_v26, 16 }
 0x55a   : > { %4834 = vst.msk [vmem:[%s8697_s23 + $0x48] sm:$0xff] %vm4455_vm1, %v8934_v16  ;;  %v2772_v8 = vcvt.f32.s32 %v2771_v42  ;;  %vm3233_vm8 = vcmp.eq.s32.totalorder %v7601_v38, %v8934_v16  ;;  %vm3232_vm3 = vcmp.eq.s32.totalorder %v7578_v44, %v8934_v16  ;;  %5754 = vmatprep.subr.bf16.mxu1 %v10123_v32 }
 0x55b   : > { %5221 = vmatprep.mubr.msk.f32.mxu1 %vm3233_vm8, %v6025_v12  ;;  %v2854_v10 = vshll.u32 %v2853_v33, 16 }
 0x55c   : > { %v8947_v41 = vadd.s32 %v2774_v49, %v2772_v8  ;;  %5222 = vmatmul.mubr.msk.f32.gmra.mrb[54].mxu1 %vm3232_vm3, %v6025_v12  ;;  %v2913_v8 = vcvt.f32.s32 %v8648_v36 }
 0x55d   : > { %v2791_v39 = vpop.xlane.xlu1 %2790  ;;  %5756 = vmatpush1.bf16.msra.mxu1 %v5755_v9  ;;  %v2893_v9 = vcvt.f32.s32 %v8643_v47 }
 0x55e   : > { %4835 = vst.msk [vmem:[%s8697_s23 + $0x50] sm:$0xff] %vm4455_vm1, %v8947_v41  ;;  %v2792_v5 = vcvt.f32.s32 %v2791_v39  ;;  %vm3237_vm5 = vcmp.eq.s32.totalorder %v7601_v38, %v8947_v41  ;;  %vm3236_vm7 = vcmp.eq.s32.totalorder %v7578_v44, %v8947_v41  ;;  %5757 = vmatprep.subr.bf16.mxu1 %v10123_v32  ;;  %v2914_v36 = vshll.u32 %v2913_v8, 16 }
 0x55f   : > { %5223 = vmatprep.mubr.msk.f32.mxu1 %vm3237_vm5, %v6025_v12  ;;  %v2894_v46 = vshll.u32 %v2893_v9, 16 }
 0x560   : > { %v8966_v2 = vadd.s32 %v2794_v0, %v2792_v5  ;;  %5224 = vmatmul.mubr.msk.f32.gmra.mrb[56].mxu1 %vm3236_vm7, %v6025_v12 }
 0x561   : > { %v2811_v61 = vpop.xlane.xlu1 %2810  ;;  %5759 = vmatpush1.bf16.msra.mxu1 %v5758_v31  ;;  %v2933_v31 = vcvt.f32.s32 %v8653_v13 }
 0x562   : > { %4836 = vst.msk [vmem:[%s8697_s23 + $0x58] sm:$0xff] %vm4455_vm1, %v8966_v2  ;;  %v2812_v55 = vcvt.f32.s32 %v2811_v61  ;;  %vm3241_vm9 = vcmp.eq.s32.totalorder %v7601_v38, %v8966_v2  ;;  %vm3240_vm13 = vcmp.eq.s32.totalorder %v7578_v44, %v8966_v2  ;;  %5760 = vmatprep.subr.bf16.mxu1 %v10123_v32 }
 0x563   : > { %5225 = vmatprep.mubr.msk.f32.mxu1 %vm3241_vm9, %v6025_v12  ;;  %v2934_v61 = vshll.u32 %v2933_v31, 16 }
 0x564   : > { %v8979_v14 = vadd.s32 %v2814_v29, %v2812_v55  ;;  %5226 = vmatmul.mubr.msk.f32.gmra.mrb[58].mxu1 %vm3240_vm13, %v6025_v12 }
 0x565   : > { %v2831_v35 = vpop.xlane.xlu1 %2830  ;;  %5762 = vmatpush1.bf16.msra.mxu1 %v5761_v52 }
 0x566   : > { %4837 = vst.msk [vmem:[%s8697_s23 + $0x60] sm:$0xff] %vm4455_vm1, %v8979_v14  ;;  %v2832_v32 = vcvt.f32.s32 %v2831_v35  ;;  %vm3245_vm12 = vcmp.eq.s32.totalorder %v7601_v38, %v8979_v14  ;;  %vm3244_vm14 = vcmp.eq.s32.totalorder %v7578_v44, %v8979_v14  ;;  %v2973_v35 = vcvt.f32.s32 %v8663_v53 }
 0x567   : > { %5227 = vmatprep.mubr.msk.f32.mxu1 %vm3245_vm12, %v6025_v12 }
 0x568   : > { %v8996_v23 = vadd.s32 %v2834_v3, %v2832_v32  ;;  %5228 = vmatmul.mubr.msk.f32.gmra.mrb[60].mxu1 %vm3244_vm14, %v6025_v12  ;;  %v2993_v32 = vcvt.f32.s32 %v8668_v56  ;;  %v2974_v52 = vshll.u32 %v2973_v35, 16 }
 0x56a   : > { %4838 = vst.msk [vmem:[%s8697_s23 + $0x68] sm:$0xff] %vm4455_vm1, %v8996_v23  ;;  %vm3249_vm10 = vcmp.eq.s32.totalorder %v7601_v38, %v8996_v23  ;;  %vm3248_vm2 = vcmp.eq.s32.totalorder %v7578_v44, %v8996_v23  ;;  %v2994_v56 = vshll.u32 %v2993_v32, 16  ;;  %v3113_v32 = vcvt.f32.s32 %v8772_v25 }
 0x56b   : > { %5229 = vmatprep.mubr.msk.f32.mxu1 %vm3249_vm10, %v6025_v12 }
 0x56c   : > { %5230 = vmatmul.mubr.msk.f32.gmra.mrb[62].mxu1 %vm3248_vm2, %v6025_v12 }
 0x586   : > { %v2851_v50 = vpop.xlane.xlu0 %2850 }
 0x587   : > { %v2852_v24 = vcvt.f32.s32 %v2851_v50 }
 0x589   : > { %v9010_v51 = vadd.s32 %v2854_v10, %v2852_v24  ;;  %v3013_v24 = vcvt.f32.s32 %v8673_v6 }
 0x58b   : > { %4839 = vst.msk [vmem:[%s8697_s23 + $0x70] sm:$0xff] %vm4455_vm1, %v9010_v51  ;;  %vm3253_vm11 = vcmp.eq.s32.totalorder %v7601_v38, %v9010_v51  ;;  %vm3252_vm15 = vcmp.eq.s32.totalorder %v7578_v44, %v9010_v51  ;;  %v3014_v9 = vshll.u32 %v3013_v24, 16 }
 0x58c   : > { %5231 = vmatprep.mubr.msk.f32.mxu1 %vm3253_vm11, %v6025_v12 }
 0x58d   : > { %v2871_v42 = vpop.xlane.xlu1 %2870  ;;  %5232 = vmatmul.mubr.msk.f32.gmra.mrb[64].mxu1 %vm3252_vm15, %v6025_v12 }
 0x58e   : > { %v2872_v49 = vcvt.f32.s32 %v2871_v42 }
 0x590   : > { %v9022_v17 = vadd.s32 %v2874_v28, %v2872_v49  ;;  %v3033_v28 = vcvt.f32.s32 %v8679_v4 }
 0x591   : > { %v2891_v48 = vpop.xlane.xlu0 %2890 }
 0x592   : > { %4840 = vst.msk [vmem:[%s8697_s23 + $0x78] sm:$0xff] %vm4455_vm1, %v9022_v17  ;;  %v2892_v0 = vcvt.f32.s32 %v2891_v48  ;;  %vm3257_vm4 = vcmp.eq.s32.totalorder %v7601_v38, %v9022_v17  ;;  %vm3256_vm6 = vcmp.eq.s32.totalorder %v7578_v44, %v9022_v17  ;;  %v3034_v4 = vshll.u32 %v3033_v28, 16 }
 0x593   : > { %5233 = vmatprep.mubr.msk.f32.mxu1 %vm3257_vm4, %v6025_v12 }
 0x594   : > { %v9033_v47 = vadd.s32 %v2894_v46, %v2892_v0  ;;  %5234 = vmatmul.mubr.msk.f32.gmra.mrb[66].mxu1 %vm3256_vm6, %v6025_v12  ;;  %v3053_v46 = vcvt.f32.s32 %v8684_v43 }
 0x595   : > { %v2911_v39 = vpop.xlane.xlu1 %2910 }
 0x596   : > { %4841 = vst.msk [vmem:[%s8697_s23 + $0x80] sm:$0xff] %vm4455_vm1, %v9033_v47  ;;  %v2912_v59 = vcvt.f32.s32 %v2911_v39  ;;  %vm3261_vm8 = vcmp.eq.s32.totalorder %v7601_v38, %v9033_v47  ;;  %vm3260_vm3 = vcmp.eq.s32.totalorder %v7578_v44, %v9033_v47  ;;  %v3054_v31 = vshll.u32 %v3053_v46, 16 }
 0x597   : > { %5235 = vmatprep.mubr.msk.f32.mxu1 %vm3261_vm8, %v6025_v12 }
 0x598   : > { %v9045_v5 = vadd.s32 %v2914_v36, %v2912_v59  ;;  %5236 = vmatmul.mubr.msk.f32.gmra.mrb[68].mxu1 %vm3260_vm3, %v6025_v12  ;;  %v3073_v59 = vcvt.f32.s32 %v8719_v57 }
 0x59a   : > { %v2931_v13 = vpop.xlane.xlu0 %2930  ;;  %4842 = vst.msk [vmem:[%s8697_s23 + $0x88] sm:$0xff] %vm4455_vm1, %v9045_v5  ;;  %vm3265_vm5 = vcmp.eq.s32.totalorder %v7601_v38, %v9045_v5  ;;  %vm3264_vm7 = vcmp.eq.s32.totalorder %v7578_v44, %v9045_v5 }
 0x59b   : > { %v2932_v29 = vcvt.f32.s32 %v2931_v13  ;;  %5237 = vmatprep.mubr.msk.f32.mxu1 %vm3265_vm5, %v6025_v12 }
 0x59c   : > { %5238 = vmatmul.mubr.msk.f32.gmra.mrb[70].mxu1 %vm3264_vm7, %v6025_v12 }
 0x59d   : > { %v9057_v55 = vadd.s32 %v2934_v61, %v2932_v29  ;;  %v3074_v61 = vshll.u32 %v3073_v59, 16 }
 0x59e   : > { %v2951_v3 = vpop.xlane.xlu1 %2950 }
 0x59f   : > { %4843 = vst.msk [vmem:[%s8697_s23 + $0x90] sm:$0xff] %vm4455_vm1, %v9057_v55  ;;  %v2952_v15 = vcvt.f32.s32 %v2951_v3  ;;  %vm3269_vm9 = vcmp.eq.s32.totalorder %v7601_v38, %v9057_v55  ;;  %vm3268_vm13 = vcmp.eq.s32.totalorder %v7578_v44, %v9057_v55 }
 0x5a0   : > { %5239 = vmatprep.mubr.msk.f32.mxu1 %vm3269_vm9, %v6025_v12 }
 0x5a1   : > { %v9069_v30 = vadd.s32 %v2954_v20, %v2952_v15  ;;  %5240 = vmatmul.mubr.msk.f32.gmra.mrb[72].mxu1 %vm3268_vm13, %v6025_v12  ;;  %v3093_v20 = vcvt.f32.s32 %v8751_v45 }
 0x5a2   : > { %v2971_v53 = vpop.xlane.xlu0 %2970 }
 0x5a3   : > { %4844 = vst.msk [vmem:[%s8697_s23 + $0x98] sm:$0xff] %vm4455_vm1, %v9069_v30  ;;  %v2972_v33 = vcvt.f32.s32 %v2971_v53  ;;  %vm3273_vm12 = vcmp.eq.s32.totalorder %v7601_v38, %v9069_v30  ;;  %vm3272_vm14 = vcmp.eq.s32.totalorder %v7578_v44, %v9069_v30  ;;  %v3094_v35 = vshll.u32 %v3093_v20, 16 }
 0x5a4   : > { %5241 = vmatprep.mubr.msk.f32.mxu1 %vm3273_vm12, %v6025_v12 }
 0x5a5   : > { %v9081_v50 = vadd.s32 %v2974_v52, %v2972_v33  ;;  %5242 = vmatmul.mubr.msk.f32.gmra.mrb[74].mxu1 %vm3272_vm14, %v6025_v12  ;;  %v3114_v52 = vshll.u32 %v3113_v32, 16 }
 0x5a6   : > { %v2991_v10 = vpop.xlane.xlu1 %2990 }
 0x5a7   : > { %4845 = vst.msk [vmem:[%s8697_s23 + $0xa0] sm:$0xff] %vm4455_vm1, %v9081_v50  ;;  %v2992_v26 = vcvt.f32.s32 %v2991_v10  ;;  %vm3277_vm10 = vcmp.eq.s32.totalorder %v7601_v38, %v9081_v50  ;;  %vm3276_vm2 = vcmp.eq.s32.totalorder %v7578_v44, %v9081_v50 }
 0x5a8   : > { %5243 = vmatprep.mubr.msk.f32.mxu1 %vm3277_vm10, %v6025_v12 }
 0x5a9   : > { %v9093_v42 = vadd.s32 %v2994_v56, %v2992_v26  ;;  %5244 = vmatmul.mubr.msk.f32.gmra.mrb[76].mxu1 %vm3276_vm2, %v6025_v12  ;;  %v3133_v56 = vcvt.f32.s32 %v8805_v22 }
 0x5aa   : > { %v3011_v6 = vpop.xlane.xlu0 %3010 }
 0x5ab   : > { %4846 = vst.msk [vmem:[%s8697_s23 + $0xa8] sm:$0xff] %vm4455_vm1, %v9093_v42  ;;  %v3012_v49 = vcvt.f32.s32 %v3011_v6  ;;  %vm3281_vm11 = vcmp.eq.s32.totalorder %v7601_v38, %v9093_v42  ;;  %vm3280_vm15 = vcmp.eq.s32.totalorder %v7578_v44, %v9093_v42  ;;  %v3134_v24 = vshll.u32 %v3133_v56, 16 }
 0x5ac   : > { %5245 = vmatprep.mubr.msk.f32.mxu1 %vm3281_vm11, %v6025_v12  ;;  %v3153_v6 = vcvt.f32.s32 %v8847_v62 }
 0x5ad   : > { %v9105_v8 = vadd.s32 %v3014_v9, %v3012_v49  ;;  %5246 = vmatmul.mubr.msk.f32.gmra.mrb[78].mxu1 %vm3280_vm15, %v6025_v12 }
 0x5ae   : > { %v3031_v48 = vpop.xlane.xlu1 %3030  ;;  %v3154_v9 = vshll.u32 %v3153_v6, 16 }
 0x5af   : > { %4847 = vst.msk [vmem:[%s8697_s23 + $0xb0] sm:$0xff] %vm4455_vm1, %v9105_v8  ;;  %v3032_v0 = vcvt.f32.s32 %v3031_v48  ;;  %vm3285_vm4 = vcmp.eq.s32.totalorder %v7601_v38, %v9105_v8  ;;  %vm3284_vm6 = vcmp.eq.s32.totalorder %v7578_v44, %v9105_v8 }
 0x5b0   : > { %5247 = vmatprep.mubr.msk.f32.mxu1 %vm3285_vm4, %v6025_v12 }
 0x5b1   : > { %v9117_v36 = vadd.s32 %v3034_v4, %v3032_v0  ;;  %5248 = vmatmul.mubr.msk.f32.gmra.mrb[80].mxu1 %vm3284_vm6, %v6025_v12  ;;  %v3173_v4 = vcvt.f32.s32 %v8871_v58  ;;  %v3193_v0 = vcvt.f32.s32 %v8895_v11 }
 0x5b2   : > { %v3051_v39 = vpop.xlane.xlu0 %3050 }
 0x5b3   : > { %4848 = vst.msk [vmem:[%s8697_s23 + $0xb8] sm:$0xff] %vm4455_vm1, %v9117_v36  ;;  %v3052_v43 = vcvt.f32.s32 %v3051_v39  ;;  %vm3289_vm8 = vcmp.eq.s32.totalorder %v7601_v38, %v9117_v36  ;;  %vm3288_vm3 = vcmp.eq.s32.totalorder %v7578_v44, %v9117_v36  ;;  %v3174_v62 = vshll.u32 %v3173_v4, 16 }
 0x5b4   : > { %5249 = vmatprep.mubr.msk.f32.mxu1 %vm3289_vm8, %v6025_v12 }
 0x5b5   : > { %v9129_v34 = vadd.s32 %v3054_v31, %v3052_v43  ;;  %5250 = vmatmul.mubr.msk.f32.gmra.mrb[82].mxu1 %vm3288_vm3, %v6025_v12  ;;  %v3194_v43 = vshll.u32 %v3193_v0, 16 }
 0x5b6   : > { %v3071_v13 = vpop.xlane.xlu1 %3070 }
 0x5b7   : > { %4849 = vst.msk [vmem:[%s8697_s23 + $0xc0] sm:$0xff] %vm4455_vm1, %v9129_v34  ;;  %vm3293_vm5 = vcmp.eq.s32.totalorder %v7601_v38, %v9129_v34  ;;  %vm3292_vm7 = vcmp.eq.s32.totalorder %v7578_v44, %v9129_v34  ;;  %v3072_v29 = vcvt.f32.s32 %v3071_v13  ;;  %v4457_v13 = vld [vmem:[%s9782_s8] sm:$0xff] }
 0x5b8   : > { %5251 = vmatprep.mubr.msk.f32.mxu1 %vm3293_vm5, %v6025_v12 }
 0x5b9   : > { %5252 = vmatmul.mubr.msk.f32.gmra.mrb[84].mxu1 %vm3292_vm7, %v6025_v12  ;;  %v9141_v57 = vadd.s32 %v3074_v61, %v3072_v29  ;;  %v4458_v61 = vld [vmem:[%s9782_s8 + $0x8] sm:$0xff]  ;;  %v4460_v29 = vld [vmem:[%s9782_s8 + $0x18] sm:$0xff] }
 0x5bb   : > { %4850 = vst.msk [vmem:[%s8697_s23 + $0xc8] sm:$0xff] %vm4455_vm1, %v9141_v57  ;;  %vm3297_vm9 = vcmp.eq.s32.totalorder %v7601_v38, %v9141_v57  ;;  %vm3296_vm13 = vcmp.eq.s32.totalorder %v7578_v44, %v9141_v57 }
 0x5bc   : > { %5253 = vmatprep.mubr.msk.f32.mxu1 %vm3297_vm9, %v6025_v12  ;;  %v3091_v3 = vpop.xlane.xlu0 %3090  ;;  %vm3199_vm9 = vcmp.eq.s32.totalorder %v7626_v40, %v8702_v21 }
 0x5bd   : > { %5254 = vmatmul.mubr.msk.f32.gmra.mrb[86].mxu1 %vm3296_vm13, %v6025_v12  ;;  %v3092_v15 = vcvt.f32.s32 %v3091_v3  ;;  %v4461_v3 = vld [vmem:[%s9782_s8 + $0x20] sm:$0xff]  ;;  %vm3198_vm13 = vcmp.eq.s32.totalorder %v7618_v7, %v8702_v21  ;;  %v4463_v21 = vld [vmem:[%s9782_s8 + $0x30] sm:$0xff] }
 0x5bf   : > { %v9154_v45 = vadd.s32 %v3094_v35, %v3092_v15  ;;  %v4462_v35 = vld [vmem:[%s9782_s8 + $0x28] sm:$0xff] }
 0x5c0   : > { %v5771_v15 = vpack.c.bf16 %v4462_v35, %v4461_v3 }
 0x5c1   : > { %4851 = vst.msk [vmem:[%s8697_s23 + $0xd0] sm:$0xff] %vm4455_vm1, %v9154_v45  ;;  %vm3301_vm12 = vcmp.eq.s32.totalorder %v7601_v38, %v9154_v45  ;;  %vm3300_vm14 = vcmp.eq.s32.totalorder %v7578_v44, %v9154_v45 }
 0x5c2   : > { %v3111_v53 = vpop.xlane.xlu1 %3110  ;;  %5255 = vmatprep.mubr.msk.f32.mxu1 %vm3301_vm12, %v6025_v12  ;;  %vm3203_vm12 = vcmp.eq.s32.totalorder %v7626_v40, %v8731_v1 }
 0x5c3   : > { %v3112_v33 = vcvt.f32.s32 %v3111_v53  ;;  %5256 = vmatmul.mubr.msk.f32.gmra.mrb[88].mxu1 %vm3300_vm14, %v6025_v12  ;;  %vm3202_vm14 = vcmp.eq.s32.totalorder %v7618_v7, %v8731_v1  ;;  %v4464_v1 = vld [vmem:[%s9782_s8 + $0x38] sm:$0xff] }
 0x5c5   : > { %v9165_v25 = vadd.s32 %v3114_v52, %v3112_v33  ;;  %v10216_v33 = vld [vmem:[#allocation12_spill] sm:$0xff] }
 0x5c7   : > { %4852 = vst.msk [vmem:[%s8697_s23 + $0xd8] sm:$0xff] %vm4455_vm1, %v9165_v25  ;;  %vm3305_vm10 = vcmp.eq.s32.totalorder %v7601_v38, %v9165_v25  ;;  %vm3304_vm2 = vcmp.eq.s32.totalorder %v7578_v44, %v9165_v25 }
 0x5c8   : > { %5257 = vmatprep.mubr.msk.f32.mxu1 %vm3305_vm10, %v6025_v12  ;;  %vm3207_vm10 = vcmp.eq.s32.totalorder %v7626_v40, %v8756_v54 }
 0x5c9   : > { %5258 = vmatmul.mubr.msk.f32.gmra.mrb[90].mxu1 %vm3304_vm2, %v6025_v12  ;;  %vm3206_vm2 = vcmp.eq.s32.totalorder %v7618_v7, %v8756_v54  ;;  %v5775_v54 = vpack.c.bf16 %v4464_v1, %v4463_v21 }
 0x5cb   : > { %v3131_v10 = vpop.xlane.xlu0 %3130 }
 0x5cc   : > { %v3132_v26 = vcvt.f32.s32 %v3131_v10 }
 0x5ce   : > { %v9177_v28 = vadd.s32 %v3134_v24, %v3132_v26 }
 0x5d0   : > { %4853 = vst.msk [vmem:[%s8697_s23 + $0xe0] sm:$0xff] %vm4455_vm1, %v9177_v28  ;;  %vm3309_vm11 = vcmp.eq.s32.totalorder %v7601_v38, %v9177_v28  ;;  %vm3308_vm15 = vcmp.eq.s32.totalorder %v7578_v44, %v9177_v28 }
 0x5d1   : > { %5259 = vmatprep.mubr.msk.f32.mxu1 %vm3309_vm11, %v6025_v12  ;;  %vm3211_vm11 = vcmp.eq.s32.totalorder %v7626_v40, %v8794_v60 }
 0x5d2   : > { %5260 = vmatmul.mubr.msk.f32.gmra.mrb[92].mxu1 %vm3308_vm15, %v6025_v12  ;;  %vm3210_vm15 = vcmp.eq.s32.totalorder %v7618_v7, %v8794_v60 }
 0x5d5   : > { %v3151_v22 = vpop.xlane.xlu1 %3150 }
 0x5d6   : > { %v3152_v49 = vcvt.f32.s32 %v3151_v22 }
 0x5d8   : > { %v9190_v48 = vadd.s32 %v3154_v9, %v3152_v49 }
 0x5da   : > { %4854 = vst.msk [vmem:[%s8697_s23 + $0xe8] sm:$0xff] %vm4455_vm1, %v9190_v48  ;;  %v3171_v46 = vpop.xlane.xlu0 %3170  ;;  %vm3313_vm4 = vcmp.eq.s32.totalorder %v7601_v38, %v9190_v48  ;;  %vm3312_vm6 = vcmp.eq.s32.totalorder %v7578_v44, %v9190_v48 }
 0x5db   : > { %v3172_v39 = vcvt.f32.s32 %v3171_v46  ;;  %5261 = vmatprep.mubr.msk.f32.mxu1 %vm3313_vm4, %v6025_v12  ;;  %vm3215_vm4 = vcmp.eq.s32.totalorder %v7626_v40, %v8818_v37 }
 0x5dc   : > { %5262 = vmatmul.mubr.msk.f32.gmra.mrb[94].mxu1 %vm3312_vm6, %v6025_v12  ;;  %vm3214_vm6 = vcmp.eq.s32.totalorder %v7618_v7, %v8818_v37  ;;  %v10211_v37 = vld [vmem:[#allocation7_spill] sm:$0xff] }
 0x5dd   : > { %v9202_v58 = vadd.s32 %v3174_v62, %v3172_v39 }
 0x5de   : > { %v3191_v31 = vpop.xlane.xlu1 %3190 }
 0x5df   : > { %4855 = vst.msk [vmem:[%s8697_s23 + $0xf0] sm:$0xff] %vm4455_vm1, %v9202_v58  ;;  %v3192_v59 = vcvt.f32.s32 %v3191_v31  ;;  %vm3317_vm8 = vcmp.eq.s32.totalorder %v7601_v38, %v9202_v58  ;;  %vm3316_vm3 = vcmp.eq.s32.totalorder %v7578_v44, %v9202_v58  ;;  %v10219_v31 = vld [vmem:[#allocation15_spill] sm:$0xff] }
 0x5e0   : > { %5263 = vmatprep.mubr.msk.f32.mxu1 %vm3317_vm8, %v6025_v12  ;;  %vm3219_vm8 = vcmp.eq.s32.totalorder %v7626_v40, %v8845_v19 }
 0x5e1   : > { %v9212_v11 = vadd.s32 %v3194_v43, %v3192_v59  ;;  %5264 = vmatmul.mubr.msk.f32.gmra.mrb[96].mxu1 %vm3316_vm3, %v6025_v12  ;;  %vm3218_vm3 = vcmp.eq.s32.totalorder %v7618_v7, %v8845_v19 }
 0x5e3   : > { %4856 = vst.msk [vmem:[%s8697_s23 + $0xf8] sm:$0xff] %vm4455_vm1, %v9212_v11  ;;  %vm3321_vm5 = vcmp.eq.s32.totalorder %v7601_v38, %v9212_v11  ;;  %vm3320_vm7 = vcmp.eq.s32.totalorder %v7578_v44, %v9212_v11  ;;  %v4459_v38 = vld [vmem:[%s9782_s8 + $0x10] sm:$0xff]  ;;  %v5763_v44 = vpack.c.bf16 %v4458_v61, %v4457_v13  ;;  %s432_s23 = scalar_lea.vmem %s9785_s11, %s5005_s17  ;;  %s5959_s17 = scalar_lea.vmem %s9726_s18, 4096 }
 0x5e4   : > { %5265 = vmatprep.mubr.msk.f32.mxu1 %vm3321_vm5, %v6025_v12  ;;  %v5767_v20 = vpack.c.bf16 %v4460_v29, %v4459_v38  ;;  %vm3223_vm5 = vcmp.eq.s32.totalorder %v7626_v40, %v8869_v18  ;;  %v10220_v38 = vld [vmem:[#allocation16_spill] sm:$0xff]  ;;  %p5960_p12 = scmp.ne.s32.totalorder %s9726_s18, %s5959_s17 }
 0x5e5   : > { %5266 = vmatmul.mubr.msk.f32.gmra.mrb[98].mxu1 %vm3320_vm7, %v6025_v12  ;;  %5764 = vmatprep.subr.bf16.mxu0 %v5763_v44  ;;  %vm3222_vm7 = vcmp.eq.s32.totalorder %v7618_v7, %v8869_v18 }
 0x5e6   : > { %5267 = vmatprep.mubr.msk.f32.mxu1 %vm3199_vm9, %v6025_v12  ;;  %5766 = vmatpush3.bf16.msra.mxu0 %v5763_v44  ;;  %vm3227_vm9 = vcmp.eq.s32.totalorder %v7626_v40, %v8892_v63  ;;  %p5961_p13 = pnand %p5960_p12, %p6132_p5 }
 0x5e7   : > { %5768 = vmatprep.subr.bf16.mxu0 %v5767_v20 }
 0x5e8   : > { %p5962_p0 = pneg %p5961_p13 }
 0x5e9   : > { %5268 = vmatmul.mubr.msk.f32.vlgmr.msra.gmra.mrb[36].mxu1 %vm3198_vm13, %v6025_v12  ;;  %vm3226_vm13 = vcmp.eq.s32.totalorder %v7618_v7, %v8892_v63 }
 0x5ea   : > { %5269 = vmatprep.mubr.msk.f32.mxu1 %vm3203_vm12, %v6025_v12  ;;  %5770 = vmatpush3.bf16.msra.mxu0 %v5767_v20  ;;  %vm3231_vm12 = vcmp.eq.s32.totalorder %v7626_v40, %v8915_v27 }
 0x5eb   : > { %5772 = vmatprep.subr.bf16.mxu0 %v5771_v15 }
 0x5ed   : > { %5270 = vmatmul.mubr.msk.f32.gmra.mrb[38].mxu1 %vm3202_vm14, %v6025_v12  ;;  %vm3230_vm14 = vcmp.eq.s32.totalorder %v7618_v7, %v8915_v27 }
 0x5ee   : > { %5271 = vmatprep.mubr.msk.f32.mxu1 %vm3207_vm10, %v6025_v12  ;;  %5774 = vmatpush3.bf16.msra.mxu0 %v5771_v15  ;;  %vm3235_vm10 = vcmp.eq.s32.totalorder %v7626_v40, %v8934_v16  ;;  %v10221_v15 = vld [vmem:[#allocation17_spill] sm:$0xff] }
 0x5ef   : > { %5776 = vmatprep.subr.bf16.mxu0 %v5775_v54 }
 0x5f1   : > { %5272 = vmatmul.mubr.msk.f32.gmra.mrb[40].mxu1 %vm3206_vm2, %v6025_v12  ;;  %vm3234_vm2 = vcmp.eq.s32.totalorder %v7618_v7, %v8934_v16  ;;  %v10212_v16 = vld [vmem:[#allocation8_spill] sm:$0xff] }
 0x5f2   : > { %5273 = vmatprep.mubr.msk.f32.mxu1 %vm3211_vm11, %v6025_v12  ;;  %vm3239_vm11 = vcmp.eq.s32.totalorder %v7626_v40, %v8947_v41  ;;  %5778 = vmatpush3.bf16.msra.mxu0 %v5775_v54 }
 0x5f5   : > { %5274 = vmatmul.mubr.msk.f32.gmra.mrb[42].mxu1 %vm3210_vm15, %v6025_v12  ;;  %vm3238_vm15 = vcmp.eq.s32.totalorder %v7618_v7, %v8947_v41 }
 0x5f6   : > { %5275 = vmatprep.mubr.msk.f32.mxu1 %vm3215_vm4, %v6025_v12  ;;  %vm3243_vm4 = vcmp.eq.s32.totalorder %v7626_v40, %v8966_v2 }
 0x5f9   : > { %5276 = vmatmul.mubr.msk.f32.gmra.mrb[44].mxu1 %vm3214_vm6, %v6025_v12  ;;  %vm3242_vm6 = vcmp.eq.s32.totalorder %v7618_v7, %v8966_v2 }
 0x5fa   : > { %5277 = vmatprep.mubr.msk.f32.mxu1 %vm3219_vm8, %v6025_v12  ;;  %vm3247_vm8 = vcmp.eq.s32.totalorder %v7626_v40, %v8979_v14 }
 0x5fd   : > { %5278 = vmatmul.mubr.msk.f32.gmra.mrb[46].mxu1 %vm3218_vm3, %v6025_v12  ;;  %vm3246_vm3 = vcmp.eq.s32.totalorder %v7618_v7, %v8979_v14 }
 0x5fe   : > { %5279 = vmatprep.mubr.msk.f32.mxu1 %vm3223_vm5, %v6025_v12  ;;  %vm3251_vm5 = vcmp.eq.s32.totalorder %v7626_v40, %v8996_v23 }
 0x601   : > { %5280 = vmatmul.mubr.msk.f32.gmra.mrb[48].mxu1 %vm3222_vm7, %v6025_v12  ;;  %vm3250_vm7 = vcmp.eq.s32.totalorder %v7618_v7, %v8996_v23  ;;  %v10213_v23 = vld [vmem:[#allocation9_spill] sm:$0xff] }
 0x602   : > { %5281 = vmatprep.mubr.msk.f32.mxu1 %vm3227_vm9, %v6025_v12  ;;  %vm3255_vm9 = vcmp.eq.s32.totalorder %v7626_v40, %v9010_v51 }
 0x605   : > { %5282 = vmatmul.mubr.msk.f32.gmra.mrb[50].mxu1 %vm3226_vm13, %v6025_v12  ;;  %vm3254_vm13 = vcmp.eq.s32.totalorder %v7618_v7, %v9010_v51 }
 0x606   : > { %5283 = vmatprep.mubr.msk.f32.mxu1 %vm3231_vm12, %v6025_v12  ;;  %vm3259_vm12 = vcmp.eq.s32.totalorder %v7626_v40, %v9022_v17 }
 0x609   : > { %5284 = vmatmul.mubr.msk.f32.gmra.mrb[52].mxu1 %vm3230_vm14, %v6025_v12  ;;  %vm3258_vm14 = vcmp.eq.s32.totalorder %v7618_v7, %v9022_v17 }
 0x60a   : > { %5285 = vmatprep.mubr.msk.f32.mxu1 %vm3235_vm10, %v6025_v12  ;;  %vm3263_vm10 = vcmp.eq.s32.totalorder %v7626_v40, %v9033_v47 }
 0x60d   : > { %5286 = vmatmul.mubr.msk.f32.gmra.mrb[54].mxu1 %vm3234_vm2, %v6025_v12  ;;  %vm3262_vm2 = vcmp.eq.s32.totalorder %v7618_v7, %v9033_v47 }
 0x60e   : > { %5287 = vmatprep.mubr.msk.f32.mxu1 %vm3239_vm11, %v6025_v12  ;;  %vm3267_vm11 = vcmp.eq.s32.totalorder %v7626_v40, %v9045_v5 }
 0x611   : > { %5288 = vmatmul.mubr.msk.f32.gmra.mrb[56].mxu1 %vm3238_vm15, %v6025_v12  ;;  %vm3266_vm15 = vcmp.eq.s32.totalorder %v7618_v7, %v9045_v5 }
 0x612   : > { %5289 = vmatprep.mubr.msk.f32.mxu1 %vm3243_vm4, %v6025_v12  ;;  %vm3271_vm4 = vcmp.eq.s32.totalorder %v7626_v40, %v9057_v55 }
 0x615   : > { %5290 = vmatmul.mubr.msk.f32.gmra.mrb[58].mxu1 %vm3242_vm6, %v6025_v12  ;;  %vm3270_vm6 = vcmp.eq.s32.totalorder %v7618_v7, %v9057_v55  ;;  %v10214_v55 = vld [vmem:[#allocation10_spill] sm:$0xff] }
 0x616   : > { %5291 = vmatprep.mubr.msk.f32.mxu1 %vm3247_vm8, %v6025_v12  ;;  %vm3275_vm8 = vcmp.eq.s32.totalorder %v7626_v40, %v9069_v30 }
 0x619   : > { %5292 = vmatmul.mubr.msk.f32.gmra.mrb[60].mxu1 %vm3246_vm3, %v6025_v12  ;;  %vm3274_vm3 = vcmp.eq.s32.totalorder %v7618_v7, %v9069_v30 }
 0x61a   : > { %5293 = vmatprep.mubr.msk.f32.mxu1 %vm3251_vm5, %v6025_v12  ;;  %vm3279_vm5 = vcmp.eq.s32.totalorder %v7626_v40, %v9081_v50 }
 0x61d   : > { %5294 = vmatmul.mubr.msk.f32.gmra.mrb[62].mxu1 %vm3250_vm7, %v6025_v12  ;;  %vm3278_vm7 = vcmp.eq.s32.totalorder %v7618_v7, %v9081_v50 }
 0x61e   : > { %5295 = vmatprep.mubr.msk.f32.mxu1 %vm3255_vm9, %v6025_v12  ;;  %vm3283_vm9 = vcmp.eq.s32.totalorder %v7626_v40, %v9093_v42 }
 0x621   : > { %5296 = vmatmul.mubr.msk.f32.gmra.mrb[64].mxu1 %vm3254_vm13, %v6025_v12  ;;  %vm3282_vm13 = vcmp.eq.s32.totalorder %v7618_v7, %v9093_v42 }
 0x622   : > { %5297 = vmatprep.mubr.msk.f32.mxu1 %vm3259_vm12, %v6025_v12  ;;  %vm3287_vm12 = vcmp.eq.s32.totalorder %v7626_v40, %v9105_v8 }
 0x625   : > { %5298 = vmatmul.mubr.msk.f32.gmra.mrb[66].mxu1 %vm3258_vm14, %v6025_v12  ;;  %vm3286_vm14 = vcmp.eq.s32.totalorder %v7618_v7, %v9105_v8 }
 0x626   : > { %5299 = vmatprep.mubr.msk.f32.mxu1 %vm3263_vm10, %v6025_v12  ;;  %vm3291_vm10 = vcmp.eq.s32.totalorder %v7626_v40, %v9117_v36 }
 0x629   : > { %5300 = vmatmul.mubr.msk.f32.gmra.mrb[68].mxu1 %vm3262_vm2, %v6025_v12  ;;  %vm3290_vm2 = vcmp.eq.s32.totalorder %v7618_v7, %v9117_v36 }
 0x62a   : > { %5301 = vmatprep.mubr.msk.f32.mxu1 %vm3267_vm11, %v6025_v12  ;;  %vm3295_vm11 = vcmp.eq.s32.totalorder %v7626_v40, %v9129_v34 }
 0x62d   : > { %5302 = vmatmul.mubr.msk.f32.gmra.mrb[70].mxu1 %vm3266_vm15, %v6025_v12  ;;  %vm3294_vm15 = vcmp.eq.s32.totalorder %v7618_v7, %v9129_v34  ;;  %v10215_v34 = vld [vmem:[#allocation11_spill] sm:$0xff] }
 0x62e   : > { %5303 = vmatprep.mubr.msk.f32.mxu1 %vm3271_vm4, %v6025_v12  ;;  %vm3299_vm4 = vcmp.eq.s32.totalorder %v7626_v40, %v9141_v57 }
 0x631   : > { %5304 = vmatmul.mubr.msk.f32.gmra.mrb[72].mxu1 %vm3270_vm6, %v6025_v12  ;;  %vm3298_vm6 = vcmp.eq.s32.totalorder %v7618_v7, %v9141_v57 }
 0x632   : > { %5305 = vmatprep.mubr.msk.f32.mxu1 %vm3275_vm8, %v6025_v12  ;;  %vm3303_vm8 = vcmp.eq.s32.totalorder %v7626_v40, %v9154_v45 }
 0x635   : > { %5306 = vmatmul.mubr.msk.f32.gmra.mrb[74].mxu1 %vm3274_vm3, %v6025_v12  ;;  %vm3302_vm3 = vcmp.eq.s32.totalorder %v7618_v7, %v9154_v45 }
 0x636   : > { %5307 = vmatprep.mubr.msk.f32.mxu1 %vm3279_vm5, %v6025_v12  ;;  %vm3307_vm5 = vcmp.eq.s32.totalorder %v7626_v40, %v9165_v25 }
 0x639   : > { %5308 = vmatmul.mubr.msk.f32.gmra.mrb[76].mxu1 %vm3278_vm7, %v6025_v12  ;;  %vm3306_vm7 = vcmp.eq.s32.totalorder %v7618_v7, %v9165_v25 }
 0x63a   : > { %5309 = vmatprep.mubr.msk.f32.mxu1 %vm3283_vm9, %v6025_v12  ;;  %vm3311_vm9 = vcmp.eq.s32.totalorder %v7626_v40, %v9177_v28 }
 0x63d   : > { %5310 = vmatmul.mubr.msk.f32.gmra.mrb[78].mxu1 %vm3282_vm13, %v6025_v12  ;;  %vm3310_vm13 = vcmp.eq.s32.totalorder %v7618_v7, %v9177_v28  ;;  %v10217_v28 = vld [vmem:[#allocation13_spill] sm:$0xff] }
 0x63e   : > { %5311 = vmatprep.mubr.msk.f32.mxu1 %vm3287_vm12, %v6025_v12  ;;  %vm3315_vm12 = vcmp.eq.s32.totalorder %v7626_v40, %v9190_v48 }
 0x641   : > { %5312 = vmatmul.mubr.msk.f32.gmra.mrb[80].mxu1 %vm3286_vm14, %v6025_v12  ;;  %vm3314_vm14 = vcmp.eq.s32.totalorder %v7618_v7, %v9190_v48  ;;  %v10218_v48 = vld [vmem:[#allocation14_spill] sm:$0xff] }
 0x642   : > { %5313 = vmatprep.mubr.msk.f32.mxu1 %vm3291_vm10, %v6025_v12  ;;  %vm3319_vm10 = vcmp.eq.s32.totalorder %v7626_v40, %v9202_v58 }
 0x645   : > { %5314 = vmatmul.mubr.msk.f32.gmra.mrb[82].mxu1 %vm3290_vm2, %v6025_v12  ;;  %vm3318_vm2 = vcmp.eq.s32.totalorder %v7618_v7, %v9202_v58 }
 0x646   : > { %5315 = vmatprep.mubr.msk.f32.mxu1 %vm3295_vm11, %v6025_v12  ;;  %vm3323_vm11 = vcmp.eq.s32.totalorder %v7626_v40, %v9212_v11 }
 0x649   : > { %5316 = vmatmul.mubr.msk.f32.gmra.mrb[84].mxu1 %vm3294_vm15, %v6025_v12  ;;  %vm3322_vm15 = vcmp.eq.s32.totalorder %v7618_v7, %v9212_v11 }
 0x64a   : > { %5317 = vmatprep.mubr.msk.f32.mxu1 %vm3299_vm4, %v6025_v12 }
 0x64d   : > { %5318 = vmatmul.mubr.msk.f32.gmra.mrb[86].mxu1 %vm3298_vm6, %v6025_v12 }
 0x64e   : > { %5319 = vmatprep.mubr.msk.f32.mxu1 %vm3303_vm8, %v6025_v12 }
 0x651   : > { %5320 = vmatmul.mubr.msk.f32.gmra.mrb[88].mxu1 %vm3302_vm3, %v6025_v12 }
 0x652   : > { %5321 = vmatprep.mubr.msk.f32.mxu1 %vm3307_vm5, %v6025_v12 }
 0x655   : > { %5322 = vmatmul.mubr.msk.f32.gmra.mrb[90].mxu1 %vm3306_vm7, %v6025_v12 }
 0x656   : > { %5323 = vmatprep.mubr.msk.f32.mxu1 %vm3311_vm9, %v6025_v12 }
 0x659   : > { %5324 = vmatmul.mubr.msk.f32.gmra.mrb[92].mxu1 %vm3310_vm13, %v6025_v12 }
 0x65a   : > { %5325 = vmatprep.mubr.msk.f32.mxu1 %vm3315_vm12, %v6025_v12 }
 0x65d   : > { %5326 = vmatmul.mubr.msk.f32.gmra.mrb[94].mxu1 %vm3314_vm14, %v6025_v12 }
 0x65e   : > { %5327 = vmatprep.mubr.msk.f32.mxu1 %vm3319_vm10, %v6025_v12 }
 0x661   : > { %5328 = vmatmul.mubr.msk.f32.gmra.mrb[96].mxu1 %vm3318_vm2, %v6025_v12 }
 0x662   : > { %5329 = vmatprep.mubr.msk.f32.mxu1 %vm3323_vm11, %v6025_v12 }
 0x665   : > { %5330 = vmatmul.mubr.msk.f32.gmra.mrb[98].mxu1 %vm3322_vm15, %v6025_v12 }
 0x6bc   : > { %v3935_v60 = vpop.f32.mrb[36].mxu1 }
 0x6bd   : > { %v4225_v19 = vsub.f32 %v3935_v60, %v10211_v37  ;;  %v3937_v18 = vpop.f32.mrb[37].mxu1  ;;  %5555 = vmatprep.mubr.msk.f32.mxu0 %vm719_vm0, %v3935_v60 }
 0x6bf   : > { %v4257_v63 = vmul.f32 %v4225_v19, %v4225_v19  ;;  %v10222_v19 = vld [vmem:[#allocation18_spill] sm:$0xff] }
 0x6c0   : > { %v3940_v27 = vpop.f32.mrb[38].mxu1 }
 0x6c1   : > { %v4226_v41 = vsub.f32 %v3940_v27, %v10212_v16  ;;  %v3942_v2 = vpop.f32.mrb[39].mxu1  ;;  %5556 = vmatmul.mubr.msk.f32.vlgmr.msra.gmra.mrb[124].mxu0 %vm719_vm0, %v3940_v27  ;;  %v4289_v40 = vsel %vm719_vm0, %v4257_v63, 0.0 }
 0x6c2   : > { %4290 = vadd.xlane.f32.xlu0 %v4289_v40  ;;  %v10223_v2 = vld [vmem:[#allocation19_spill] sm:$0xff] }
 0x6c3   : > { %v4258_v14 = vmul.f32 %v4226_v41, %v4226_v41 }
 0x6c4   : > { %v3945_v7 = vpop.f32.mrb[40].mxu1 }
 0x6c5   : > { %v4227_v12 = vsub.f32 %v3945_v7, %v10213_v23  ;;  %v3947_v51 = vpop.f32.mrb[41].mxu1  ;;  %5558 = vmatprep.mubr.msk.f32.mxu0 %vm719_vm0, %v3945_v7  ;;  %v4292_v17 = vsel %vm719_vm0, %v4258_v14, 0.0 }
 0x6c6   : > { %4293 = vadd.xlane.f32.xlu1 %v4292_v17  ;;  %v10224_v51 = vld [vmem:[#allocation20_spill] sm:$0xff] }
 0x6c7   : > { %v4259_v47 = vmul.f32 %v4227_v12, %v4227_v12 }
 0x6c8   : > { %v3950_v5 = vpop.f32.mrb[42].mxu1 }
 0x6c9   : > { %v4228_v30 = vsub.f32 %v3950_v5, %v10214_v55  ;;  %v3952_v50 = vpop.f32.mrb[43].mxu1  ;;  %5559 = vmatmul.mubr.msk.f32.gmra.mrb[126].mxu0 %vm719_vm0, %v3950_v5  ;;  %v4295_v42 = vsel %vm719_vm0, %v4259_v47, 0.0 }
 0x6ca   : > { %4296 = vadd.xlane.f32.xlu0 %v4295_v42  ;;  %v10225_v50 = vld [vmem:[#allocation21_spill] sm:$0xff] }
 0x6cb   : > { %v4260_v8 = vmul.f32 %v4228_v30, %v4228_v30 }
 0x6cc   : > { %v3955_v36 = vpop.f32.mrb[44].mxu1 }
 0x6cd   : > { %v4229_v57 = vsub.f32 %v3955_v36, %v10215_v34  ;;  %v3957_v32 = vpop.f32.mrb[45].mxu1  ;;  %5561 = vmatprep.mubr.msk.f32.mxu0 %vm719_vm0, %v3955_v36  ;;  %v4298_v45 = vsel %vm719_vm0, %v4260_v8, 0.0 }
 0x6ce   : > { %4299 = vadd.xlane.f32.xlu1 %v4298_v45  ;;  %v10226_v32 = vld [vmem:[#allocation22_spill] sm:$0xff] }
 0x6cf   : > { %v4261_v53 = vmul.f32 %v4229_v57, %v4229_v57 }
 0x6d0   : > { %v3960_v52 = vpop.f32.mrb[46].mxu1 }
 0x6d1   : > { %v4230_v25 = vsub.f32 %v3960_v52, %v10216_v33  ;;  %v3962_v56 = vpop.f32.mrb[47].mxu1  ;;  %5562 = vmatmul.mubr.msk.f32.gmra.mrb[128].mxu0 %vm719_vm0, %v3960_v52  ;;  %v4301_v10 = vsel %vm719_vm0, %v4261_v53, 0.0 }
 0x6d2   : > { %4302 = vadd.xlane.f32.xlu0 %v4301_v10  ;;  %v10227_v56 = vld [vmem:[#allocation23_spill] sm:$0xff] }
 0x6d3   : > { %v4262_v24 = vmul.f32 %v4230_v25, %v4230_v25 }
 0x6d4   : > { %v3965_v26 = vpop.f32.mrb[48].mxu1 }
 0x6d5   : > { %v4231_v6 = vsub.f32 %v3965_v26, %v10217_v28  ;;  %v3967_v22 = vpop.f32.mrb[49].mxu1  ;;  %5564 = vmatprep.mubr.msk.f32.mxu0 %vm719_vm0, %v3965_v26  ;;  %v4304_v9 = vsel %vm719_vm0, %v4262_v24, 0.0 }
 0x6d6   : > { %4305 = vadd.xlane.f32.xlu1 %v4304_v9  ;;  %v10228_v22 = vld [vmem:[#allocation24_spill] sm:$0xff] }
 0x6d7   : > { %v4263_v49 = vmul.f32 %v4231_v6, %v4231_v6 }
 0x6d8   : > { %v3970_v4 = vpop.f32.mrb[50].mxu1 }
 0x6d9   : > { %v4232_v46 = vsub.f32 %v3970_v4, %v10218_v48  ;;  %v3972_v62 = vpop.f32.mrb[51].mxu1  ;;  %5565 = vmatmul.mubr.msk.f32.gmra.mrb[130].mxu0 %vm719_vm0, %v3970_v4  ;;  %v4307_v0 = vsel %vm719_vm0, %v4263_v49, 0.0 }
 0x6da   : > { %4308 = vadd.xlane.f32.xlu0 %v4307_v0  ;;  %v10229_v62 = vld [vmem:[#allocation25_spill] sm:$0xff] }
 0x6db   : > { %v4264_v39 = vmul.f32 %v4232_v46, %v4232_v46 }
 0x6dc   : > { %v3975_v58 = vpop.f32.mrb[52].mxu1 }
 0x6dd   : > { %v4233_v43 = vsub.f32 %v3975_v58, %v10219_v31  ;;  %v3977_v59 = vpop.f32.mrb[53].mxu1  ;;  %5567 = vmatprep.mubr.msk.f32.mxu0 %vm719_vm0, %v3975_v58  ;;  %v4310_v11 = vsel %vm719_vm0, %v4264_v39, 0.0 }
 0x6de   : > { %4311 = vadd.xlane.f32.xlu1 %v4310_v11  ;;  %v10230_v59 = vld [vmem:[#allocation26_spill] sm:$0xff] }
 0x6df   : > { %v4265_v13 = vmul.f32 %v4233_v43, %v4233_v43 }
 0x6e0   : > { %v3980_v61 = vpop.f32.mrb[54].mxu1 }
 0x6e1   : > { %v4234_v44 = vsub.f32 %v3980_v61, %v10220_v38  ;;  %v3982_v29 = vpop.f32.mrb[55].mxu1  ;;  %5568 = vmatmul.mubr.msk.f32.gmra.mrb[132].mxu0 %vm719_vm0, %v3980_v61  ;;  %v4313_v20 = vsel %vm719_vm0, %v4265_v13, 0.0 }
 0x6e2   : > { %4314 = vadd.xlane.f32.xlu0 %v4313_v20  ;;  %v10231_v29 = vld [vmem:[#allocation27_spill] sm:$0xff] }
 0x6e3   : > { %v4266_v3 = vmul.f32 %v4234_v44, %v4234_v44 }
 0x6e4   : > { %v3985_v35 = vpop.f32.mrb[56].mxu1 }
 0x6e5   : > { %v4235_v21 = vsub.f32 %v3985_v35, %v10221_v15  ;;  %v3987_v1 = vpop.f32.mrb[57].mxu1  ;;  %5570 = vmatprep.mubr.msk.f32.mxu0 %vm719_vm0, %v3985_v35  ;;  %v4316_v54 = vsel %vm719_vm0, %v4266_v3, 0.0 }
 0x6e6   : > { %4317 = vadd.xlane.f32.xlu1 %v4316_v54  ;;  %v10232_v1 = vld [vmem:[#allocation28_spill] sm:$0xff] }
 0x6e7   : > { %v4267_v60 = vmul.f32 %v4235_v21, %v4235_v21 }
 0x6e8   : > { %v3990_v37 = vpop.f32.mrb[58].mxu1 }
 0x6e9   : > { %v4236_v18 = vsub.f32 %v3990_v37, %v10222_v19  ;;  %v3992_v63 = vpop.f32.mrb[59].mxu1  ;;  %5571 = vmatmul.mubr.msk.f32.gmra.mrb[134].mxu0 %vm719_vm0, %v3990_v37  ;;  %v4319_v27 = vsel %vm719_vm0, %v4267_v60, 0.0 }
 0x6ea   : > { %4320 = vadd.xlane.f32.xlu0 %v4319_v27  ;;  %v10233_v63 = vld [vmem:[#allocation29_spill] sm:$0xff] }
 0x6eb   : > { %v4268_v16 = vmul.f32 %v4236_v18, %v4236_v18 }
 0x6ec   : > { %v3995_v41 = vpop.f32.mrb[60].mxu1 }
 0x6ed   : > { %v4237_v40 = vsub.f32 %v3995_v41, %v10223_v2  ;;  %v3997_v14 = vpop.f32.mrb[61].mxu1  ;;  %5573 = vmatprep.mubr.msk.f32.mxu0 %vm719_vm0, %v3995_v41  ;;  %v4322_v7 = vsel %vm719_vm0, %v4268_v16, 0.0 }
 0x6ee   : > { %4323 = vadd.xlane.f32.xlu1 %v4322_v7  ;;  %v10234_v14 = vld [vmem:[#allocation30_spill] sm:$0xff] }
 0x6ef   : > { %v4269_v23 = vmul.f32 %v4237_v40, %v4237_v40 }
 0x6f0   : > { %v4000_v12 = vpop.f32.mrb[62].mxu1 }
 0x6f1   : > { %v4238_v17 = vsub.f32 %v4000_v12, %v10224_v51  ;;  %v4002_v47 = vpop.f32.mrb[63].mxu1  ;;  %5574 = vmatmul.mubr.msk.f32.gmra.mrb[136].mxu0 %vm719_vm0, %v4000_v12  ;;  %v4325_v5 = vsel %vm719_vm0, %v4269_v23, 0.0 }
 0x6f2   : > { %4326 = vadd.xlane.f32.xlu0 %v4325_v5  ;;  %v10235_v47 = vld [vmem:[#allocation31_spill] sm:$0xff] }
 0x6f3   : > { %v4270_v55 = vmul.f32 %v4238_v17, %v4238_v17 }
 0x6f4   : > { %v4005_v30 = vpop.f32.mrb[64].mxu1 }
 0x6f5   : > { %v4239_v42 = vsub.f32 %v4005_v30, %v10225_v50  ;;  %v4007_v8 = vpop.f32.mrb[65].mxu1  ;;  %5576 = vmatprep.mubr.msk.f32.mxu0 %vm719_vm0, %v4005_v30  ;;  %v4328_v36 = vsel %vm719_vm0, %v4270_v55, 0.0 }
 0x6f6   : > { %4329 = vadd.xlane.f32.xlu1 %v4328_v36  ;;  %v10236_v8 = vld [vmem:[#allocation32_spill] sm:$0xff] }
 0x6f7   : > { %v4271_v34 = vmul.f32 %v4239_v42, %v4239_v42 }
 0x6f8   : > { %v4010_v57 = vpop.f32.mrb[66].mxu1 }
 0x6f9   : > { %v4240_v45 = vsub.f32 %v4010_v57, %v10226_v32  ;;  %v4012_v53 = vpop.f32.mrb[67].mxu1  ;;  %5577 = vmatmul.mubr.msk.f32.gmra.mrb[138].mxu0 %vm719_vm0, %v4010_v57  ;;  %v4331_v52 = vsel %vm719_vm0, %v4271_v34, 0.0 }
 0x6fa   : > { %4332 = vadd.xlane.f32.xlu0 %v4331_v52  ;;  %v10237_v53 = vld [vmem:[#allocation33_spill] sm:$0xff] }
 0x6fb   : > { %v4272_v33 = vmul.f32 %v4240_v45, %v4240_v45 }
 0x6fc   : > { %v4015_v25 = vpop.f32.mrb[68].mxu1 }
 0x6fd   : > { %v4241_v10 = vsub.f32 %v4015_v25, %v10227_v56  ;;  %v4017_v24 = vpop.f32.mrb[69].mxu1  ;;  %5579 = vmatprep.mubr.msk.f32.mxu0 %vm719_vm0, %v4015_v25  ;;  %v4334_v26 = vsel %vm719_vm0, %v4272_v33, 0.0 }
 0x6fe   : > { %4335 = vadd.xlane.f32.xlu1 %v4334_v26  ;;  %v10238_v24 = vld [vmem:[#allocation34_spill] sm:$0xff] }
 0x6ff   : > { %v4273_v28 = vmul.f32 %v4241_v10, %v4241_v10 }
 0x700   : > { %v4020_v6 = vpop.f32.mrb[70].mxu1 }
 0x701   : > { %v4242_v9 = vsub.f32 %v4020_v6, %v10228_v22  ;;  %v4022_v49 = vpop.f32.mrb[71].mxu1  ;;  %5580 = vmatmul.mubr.msk.f32.gmra.mrb[140].mxu0 %vm719_vm0, %v4020_v6  ;;  %v4337_v4 = vsel %vm719_vm0, %v4273_v28, 0.0 }
 0x702   : > { %4338 = vadd.xlane.f32.xlu0 %v4337_v4  ;;  %v10239_v49 = vld [vmem:[#allocation35_spill] sm:$0xff] }
 0x703   : > { %v4274_v48 = vmul.f32 %v4242_v9, %v4242_v9 }
 0x704   : > { %v4025_v46 = vpop.f32.mrb[72].mxu1 }
 0x705   : > { %v4243_v0 = vsub.f32 %v4025_v46, %v10229_v62  ;;  %v4027_v39 = vpop.f32.mrb[73].mxu1  ;;  %5582 = vmatprep.mubr.msk.f32.mxu0 %vm719_vm0, %v4025_v46  ;;  %v4340_v58 = vsel %vm719_vm0, %v4274_v48, 0.0 }
 0x706   : > { %4341 = vadd.xlane.f32.xlu1 %v4340_v58  ;;  %v10240_v39 = vld [vmem:[#allocation36_spill] sm:$0xff] }
 0x707   : > { %v4275_v31 = vmul.f32 %v4243_v0, %v4243_v0 }
 0x708   : > { %v4030_v43 = vpop.f32.mrb[74].mxu1 }
 0x709   : > { %v4244_v11 = vsub.f32 %v4030_v43, %v10230_v59  ;;  %v4032_v13 = vpop.f32.mrb[75].mxu1  ;;  %5583 = vmatmul.mubr.msk.f32.gmra.mrb[142].mxu0 %vm719_vm0, %v4030_v43  ;;  %v4343_v61 = vsel %vm719_vm0, %v4275_v31, 0.0 }
 0x70a   : > { %4344 = vadd.xlane.f32.xlu0 %v4343_v61  ;;  %v10241_v13 = vld [vmem:[#allocation37_spill] sm:$0xff] }
 0x70b   : > { %v4276_v38 = vmul.f32 %v4244_v11, %v4244_v11 }
 0x70c   : > { %v4035_v44 = vpop.f32.mrb[76].mxu1 }
 0x70d   : > { %v4245_v20 = vsub.f32 %v4035_v44, %v10231_v29  ;;  %v4037_v3 = vpop.f32.mrb[77].mxu1  ;;  %5585 = vmatprep.mubr.msk.f32.mxu0 %vm719_vm0, %v4035_v44  ;;  %v4346_v35 = vsel %vm719_vm0, %v4276_v38, 0.0 }
 0x70e   : > { %4347 = vadd.xlane.f32.xlu1 %v4346_v35  ;;  %v10242_v3 = vld [vmem:[#allocation38_spill] sm:$0xff] }
 0x70f   : > { %v4277_v15 = vmul.f32 %v4245_v20, %v4245_v20 }
 0x710   : > { %v4040_v21 = vpop.f32.mrb[78].mxu1 }
 0x711   : > { %v4246_v54 = vsub.f32 %v4040_v21, %v10232_v1  ;;  %v4042_v60 = vpop.f32.mrb[79].mxu1  ;;  %5586 = vmatmul.mubr.msk.f32.gmra.mrb[144].mxu0 %vm719_vm0, %v4040_v21  ;;  %v4349_v37 = vsel %vm719_vm0, %v4277_v15, 0.0 }
 0x712   : > { %4350 = vadd.xlane.f32.xlu0 %v4349_v37  ;;  %v10243_v60 = vld [vmem:[#allocation39_spill] sm:$0xff] }
 0x713   : > { %v4278_v19 = vmul.f32 %v4246_v54, %v4246_v54  ;;  %v4096_v37 = vadd.s32 8, %v10243_v60 }
 0x714   : > { %v4045_v18 = vpop.f32.mrb[80].mxu1 }
 0x715   : > { %v4247_v27 = vsub.f32 %v4045_v18, %v10233_v63  ;;  %v4047_v16 = vpop.f32.mrb[81].mxu1  ;;  %5588 = vmatprep.mubr.msk.f32.mxu0 %vm719_vm0, %v4045_v18  ;;  %v4352_v41 = vsel %vm719_vm0, %v4278_v19, 0.0  ;;  %v4097_v19 = vadd.s32 16, %v10243_v60  ;;  %v9539_v18 = vstv %s5331_s16  ;;  %s5370_s16 = sshll.u32 %s6115_s25, 12  ;;  %s9733_s25 = scalar_lea.sflag [#allocation3], %s406_s29 }
 0x716   : > { %4353 = vadd.xlane.f32.xlu1 %v4352_v41  ;;  %v4130_v63 = vadd.s32 %v9539_v18, %v4096_v37  ;;  %v4129_v16 = vadd.s32 %v9539_v18, %v10243_v60  ;;  %s9724_s26 = scalar_lea.hbm %s9784_s10, %s5370_s16 }
 0x717   : > { %v4279_v2 = vmul.f32 %v4247_v27, %v4247_v27  ;;  %v4098_v27 = vadd.s32 24, %v10243_v60  ;;  %v4131_v41 = vadd.s32 %v9539_v18, %v4097_v19  ;;  %v4109_v19 = vadd.s32 112, %v10243_v60 }
 0x718   : > { %v4050_v40 = vpop.f32.mrb[82].mxu1  ;;  %vm4161_vm4 = vcmp.lt.s32.totalorder %v4129_v16, 512 }
 0x719   : > { %v4248_v7 = vsub.f32 %v4050_v40, %v10234_v14  ;;  %v4052_v23 = vpop.f32.mrb[83].mxu1  ;;  %5589 = vmatmul.mubr.msk.f32.gmra.mrb[146].mxu0 %vm719_vm0, %v4050_v40  ;;  %v4355_v12 = vsel %vm719_vm0, %v4279_v2, 0.0  ;;  %v4099_v2 = vadd.s32 32, %v10243_v60  ;;  %v4132_v40 = vadd.s32 %v9539_v18, %v4098_v27 }
 0x71a   : > { %4356 = vadd.xlane.f32.xlu0 %v4355_v12  ;;  %v4100_v14 = vadd.s32 40, %v10243_v60  ;;  %vm4163_vm6 = vcmp.lt.s32.totalorder %v4131_v41, 512  ;;  %v4101_v12 = vadd.s32 48, %v10243_v60 }
 0x71b   : > { %v4280_v51 = vmul.f32 %v4248_v7, %v4248_v7  ;;  %v4133_v23 = vadd.s32 %v9539_v18, %v4099_v2  ;;  %vm4164_vm8 = vcmp.lt.s32.totalorder %v4132_v40, 512  ;;  %v4110_v40 = vadd.s32 120, %v10243_v60 }
 0x71c   : > { %v4055_v17 = vpop.f32.mrb[84].mxu1 }
 0x71d   : > { %v4249_v5 = vsub.f32 %v4055_v17, %v10235_v47  ;;  %v4057_v55 = vpop.f32.mrb[85].mxu1  ;;  %5591 = vmatprep.mubr.msk.f32.mxu0 %vm719_vm0, %v4055_v17  ;;  %v4358_v30 = vsel %vm719_vm0, %v4280_v51, 0.0  ;;  %v10244_v51 = vmov 0.0   ;;  %vm4165_vm3 = vcmp.lt.s32.totalorder %v4133_v23, 512 }
 0x71e   : > { %4359 = vadd.xlane.f32.xlu1 %v4358_v30  ;;  %v4134_v55 = vadd.s32 %v9539_v18, %v4100_v14  ;;  %v4193_v30 = vsel %vm4161_vm4, 1.0, %v10244_v51 }
 0x71f   : > { %v4281_v50 = vmul.f32 %v4249_v5, %v4249_v5  ;;  %v4102_v5 = vadd.s32 56, %v10243_v60 }
 0x720   : > { %v4060_v42 = vpop.f32.mrb[86].mxu1  ;;  %vm4166_vm5 = vcmp.lt.s32.totalorder %v4134_v55, 512 }
 0x721   : > { %v4250_v36 = vsub.f32 %v4060_v42, %v10236_v8  ;;  %v4062_v34 = vpop.f32.mrb[87].mxu1  ;;  %5592 = vmatmul.mubr.msk.f32.gmra.mrb[148].mxu0 %vm719_vm0, %v4060_v42  ;;  %v4361_v57 = vsel %vm719_vm0, %v4281_v50, 0.0  ;;  %v4195_v50 = vsel %vm4163_vm6, 1.0, %v10244_v51  ;;  %v4103_v8 = vadd.s32 64, %v10243_v60 }
 0x722   : > { %4362 = vadd.xlane.f32.xlu0 %v4361_v57  ;;  %v4135_v34 = vadd.s32 %v9539_v18, %v4101_v12  ;;  %v4196_v57 = vsel %vm4164_vm8, 1.0, %v10244_v51  ;;  %v4111_v12 = vadd.s32 128, %v10243_v60 }
 0x723   : > { %v4282_v32 = vmul.f32 %v4250_v36, %v4250_v36 }
 0x724   : > { %v4065_v45 = vpop.f32.mrb[88].mxu1  ;;  %vm4167_vm7 = vcmp.lt.s32.totalorder %v4135_v34, 512 }
 0x725   : > { %v4251_v52 = vsub.f32 %v4065_v45, %v10237_v53  ;;  %v4067_v33 = vpop.f32.mrb[89].mxu1  ;;  %5594 = vmatprep.mubr.msk.f32.mxu0 %vm719_vm0, %v4065_v45  ;;  %v4364_v25 = vsel %vm719_vm0, %v4282_v32, 0.0  ;;  %v4136_v45 = vadd.s32 %v9539_v18, %v4102_v5 }
 0x726   : > { %4365 = vadd.xlane.f32.xlu1 %v4364_v25  ;;  %v4104_v33 = vadd.s32 72, %v10243_v60  ;;  %v4197_v25 = vsel %vm4165_vm3, 1.0, %v10244_v51 }
 0x727   : > { %v4283_v56 = vmul.f32 %v4251_v52, %v4251_v52  ;;  %vm4168_vm9 = vcmp.lt.s32.totalorder %v4136_v45, 512 }
 0x728   : > { %v4070_v10 = vpop.f32.mrb[90].mxu1 }
 0x729   : > { %v4252_v26 = vsub.f32 %v4070_v10, %v10238_v24  ;;  %v4072_v28 = vpop.f32.mrb[91].mxu1  ;;  %5595 = vmatmul.mubr.msk.f32.gmra.mrb[150].mxu0 %vm719_vm0, %v4070_v10  ;;  %v4367_v6 = vsel %vm719_vm0, %v4283_v56, 0.0  ;;  %v4137_v10 = vadd.s32 %v9539_v18, %v4103_v8 }
 0x72a   : > { %4368 = vadd.xlane.f32.xlu0 %v4367_v6  ;;  %v4105_v28 = vadd.s32 80, %v10243_v60  ;;  %v9570_v6 = vld [vmem:[%s9783_s9] ss:$0 sm:$0xff] }
 0x72b   : > { %v4284_v22 = vmul.f32 %v4252_v26, %v4252_v26  ;;  %vm4169_vm13 = vcmp.lt.s32.totalorder %v4137_v10, 512 }
 0x72c   : > { %v4075_v9 = vpop.f32.mrb[92].mxu1 }
 0x72d   : > { %v4253_v4 = vsub.f32 %v4075_v9, %v10239_v49  ;;  %v4077_v48 = vpop.f32.mrb[93].mxu1  ;;  %5597 = vmatprep.mubr.msk.f32.mxu0 %vm719_vm0, %v4075_v9  ;;  %v4370_v46 = vsel %vm719_vm0, %v4284_v22, 0.0  ;;  %v4198_v22 = vsel %vm4166_vm5, 1.0, %v10244_v51 }
 0x72e   : > { %4371 = vadd.xlane.f32.xlu1 %v4370_v46  ;;  %v4138_v48 = vadd.s32 %v9539_v18, %v4104_v33  ;;  %v4106_v46 = vadd.s32 88, %v10243_v60 }
 0x72f   : > { %v4285_v62 = vmul.f32 %v4253_v4, %v4253_v4 }
 0x730   : > { %v4080_v0 = vpop.f32.mrb[94].mxu1  ;;  %vm4170_vm12 = vcmp.lt.s32.totalorder %v4138_v48, 512 }
 0x731   : > { %v4254_v58 = vsub.f32 %v4080_v0, %v10240_v39  ;;  %v4082_v31 = vpop.f32.mrb[95].mxu1  ;;  %5598 = vmatmul.mubr.msk.f32.gmra.mrb[152].mxu0 %vm719_vm0, %v4080_v0  ;;  %v4373_v43 = vsel %vm719_vm0, %v4285_v62, 0.0  ;;  %v4199_v0 = vsel %vm4167_vm7, 1.0, %v10244_v51 }
 0x732   : > { %4374 = vadd.xlane.f32.xlu0 %v4373_v43 }
 0x733   : > { %v4286_v59 = vmul.f32 %v4254_v58, %v4254_v58  ;;  %v4107_v58 = vadd.s32 96, %v10243_v60 }
 0x734   : > { %v4085_v11 = vpop.f32.mrb[96].mxu1 }
 0x735   : > { %v4255_v61 = vsub.f32 %v4085_v11, %v10241_v13  ;;  %v4087_v38 = vpop.f32.mrb[97].mxu1  ;;  %5600 = vmatprep.mubr.msk.f32.mxu0 %vm719_vm0, %v4085_v11  ;;  %v4376_v44 = vsel %vm719_vm0, %v4286_v59, 0.0  ;;  %v4139_v13 = vadd.s32 %v9539_v18, %v4105_v28 }
 0x736   : > { %4377 = vadd.xlane.f32.xlu1 %v4376_v44  ;;  %v4200_v38 = vsel %vm4168_vm9, 1.0, %v10244_v51 }
 0x737   : > { %v4287_v29 = vmul.f32 %v4255_v61, %v4255_v61  ;;  %vm4171_vm14 = vcmp.lt.s32.totalorder %v4139_v13, 512 }
 0x738   : > { %v4090_v20 = vpop.f32.mrb[98].mxu1 }
 0x739   : > { %v4256_v35 = vsub.f32 %v4090_v20, %v10242_v3  ;;  %v4092_v15 = vpop.f32.mrb[99].mxu1  ;;  %5601 = vmatmul.mubr.msk.f32.gmra.mrb[154].mxu0 %vm719_vm0, %v4090_v20  ;;  %v4379_v21 = vsel %vm719_vm0, %v4287_v29, 0.0  ;;  %v4108_v29 = vadd.s32 104, %v10243_v60 }
 0x73a   : > { %4380 = vadd.xlane.f32.xlu0 %v4379_v21  ;;  %v4201_v15 = vsel %vm4169_vm13, 1.0, %v10244_v51 }
 0x73b   : > { %v4288_v1 = vmul.f32 %v4256_v35, %v4256_v35  ;;  %v4140_v35 = vadd.s32 %v9539_v18, %v4106_v46  ;;  %v4142_v16 = vadd.s32 %v9539_v18, %v4108_v29  ;;  %v4115_v46 = vadd.s32 160, %v10243_v60 }
 0x73d   : > { %v4382_v54 = vsel %vm719_vm0, %v4288_v1, 0.0  ;;  %vm4162_vm0 = vcmp.lt.s32.totalorder %v4130_v63, 512  ;;  %v4141_v1 = vadd.s32 %v9539_v18, %v4107_v58  ;;  %v4202_v63 = vsel %vm4170_vm12, 1.0, %v10244_v51 }
 0x73e   : > { %4383 = vadd.xlane.f32.xlu1 %v4382_v54  ;;  %v4194_v17 = vsel %vm4162_vm0, 1.0, %v10244_v51  ;;  %vm4172_vm10 = vcmp.lt.s32.totalorder %v4140_v35, 512  ;;  %vm4174_vm11 = vcmp.lt.s32.totalorder %v4142_v16, 512 }
 0x73f   : > { %vm4173_vm2 = vcmp.lt.s32.totalorder %v4141_v1, 512  ;;  %v4206_v10 = vsel %vm4174_vm11, 1.0, %v10244_v51 }
 0x740   : > { %v4205_v45 = vsel %vm4173_vm2, 1.0, %v10244_v51 }
 0x74f   : > { %v4291_v7 = vpop.xlane.xlu0 %4290 }
 0x750   : > { %v4385_v53 = vmul.f32 %v4291_v7, %v4193_v30  ;;  %v4203_v7 = vsel %vm4171_vm14, 1.0, %v10244_v51  ;;  %v4143_v30 = vadd.s32 %v9539_v18, %v4109_v19 }
 0x752   : > { %vm4175_vm15 = vcmp.lt.s32.totalorder %v4143_v30, 512  ;;  %v4120_v30 = vadd.s32 200, %v10243_v60 }
 0x753   : > { %v4294_v47 = vpop.xlane.xlu1 %4293 }
 0x754   : > { %v4386_v36 = vmul.f32 %v4294_v47, %v4194_v17 }
 0x756   : > { %v4417_v24 = vadd.f32 %v4386_v36, %v4385_v53 }
 0x757   : > { %v4297_v42 = vpop.xlane.xlu0 %4296 }
 0x758   : > { %v4387_v52 = vmul.f32 %v4297_v42, %v4195_v50  ;;  %v4204_v42 = vsel %vm4172_vm10, 1.0, %v10244_v51 }
 0x75a   : > { %v4418_v49 = vadd.f32 %v4417_v24, %v4387_v52  ;;  %v4145_v52 = vadd.s32 %v9539_v18, %v4111_v12 }
 0x75b   : > { %v4300_v32 = vpop.xlane.xlu1 %4299 }
 0x75c   : > { %v4388_v26 = vmul.f32 %v4300_v32, %v4196_v57  ;;  %v4144_v57 = vadd.s32 %v9539_v18, %v4110_v40  ;;  %v4112_v32 = vadd.s32 136, %v10243_v60  ;;  %vm4177_vm4 = vcmp.lt.s32.totalorder %v4145_v52, 512 }
 0x75d   : > { %v4209_v29 = vsel %vm4177_vm4, 1.0, %v10244_v51 }
 0x75e   : > { %v4419_v59 = vadd.f32 %v4418_v49, %v4388_v26  ;;  %v4114_v26 = vadd.s32 152, %v10243_v60  ;;  %vm4176_vm0 = vcmp.lt.s32.totalorder %v4144_v57, 512 }
 0x75f   : > { %v4303_v56 = vpop.xlane.xlu0 %4302 }
 0x760   : > { %v4389_v4 = vmul.f32 %v4303_v56, %v4197_v25  ;;  %v4113_v56 = vadd.s32 144, %v10243_v60  ;;  %v4148_v13 = vadd.s32 %v9539_v18, %v4114_v26  ;;  %v4122_v26 = vadd.s32 216, %v10243_v60 }
 0x762   : > { %v4420_v20 = vadd.f32 %v4419_v59, %v4389_v4  ;;  %v4207_v4 = vsel %vm4175_vm15, 1.0, %v10244_v51  ;;  %v4208_v59 = vsel %vm4176_vm0, 1.0, %v10244_v51  ;;  %vm4180_vm3 = vcmp.lt.s32.totalorder %v4148_v13, 512 }
 0x763   : > { %v4306_v9 = vpop.xlane.xlu1 %4305 }
 0x764   : > { %v4390_v11 = vmul.f32 %v4306_v9, %v4198_v22  ;;  %v4146_v9 = vadd.s32 %v9539_v18, %v4112_v32 }
 0x766   : > { %v4421_v54 = vadd.f32 %v4420_v20, %v4390_v11  ;;  %vm4178_vm6 = vcmp.lt.s32.totalorder %v4146_v9, 512 }
 0x767   : > { %v4309_v39 = vpop.xlane.xlu0 %4308  ;;  %v4210_v1 = vsel %vm4178_vm6, 1.0, %v10244_v51 }
 0x768   : > { %v4391_v3 = vmul.f32 %v4309_v39, %v4199_v0 }
 0x76a   : > { %v4422_v41 = vadd.f32 %v4421_v54, %v4391_v3  ;;  %v4149_v3 = vadd.s32 %v9539_v18, %v4115_v46 }
 0x76b   : > { %v4312_v44 = vpop.xlane.xlu1 %4311 }
 0x76c   : > { %v4392_v37 = vmul.f32 %v4312_v44, %v4200_v38  ;;  %v4116_v44 = vadd.s32 168, %v10243_v60  ;;  %vm4181_vm5 = vcmp.lt.s32.totalorder %v4149_v3, 512 }
 0x76e   : > { %v4423_v5 = vadd.f32 %v4422_v41, %v4392_v37 }
 0x76f   : > { %v4315_v21 = vpop.xlane.xlu0 %4314 }
 0x770   : > { %v4393_v2 = vmul.f32 %v4315_v21, %v4201_v15  ;;  %v4117_v21 = vadd.s32 176, %v10243_v60 }
 0x772   : > { %v4424_v36 = vadd.f32 %v4423_v5, %v4393_v2  ;;  %v4212_v5 = vsel %vm4180_vm3, 1.0, %v10244_v51 }
 0x773   : > { %v4318_v27 = vpop.xlane.xlu1 %4317 }
 0x774   : > { %v4394_v55 = vmul.f32 %v4318_v27, %v4202_v63  ;;  %v4150_v63 = vadd.s32 %v9539_v18, %v4116_v44  ;;  %v4118_v27 = vadd.s32 184, %v10243_v60  ;;  %v4125_v44 = vadd.s32 240, %v10243_v60 }
 0x776   : > { %v4425_v33 = vadd.f32 %v4424_v36, %v4394_v55  ;;  %vm4182_vm7 = vcmp.lt.s32.totalorder %v4150_v63, 512  ;;  %v4213_v36 = vsel %vm4181_vm5, 1.0, %v10244_v51 }
 0x777   : > { %v4321_v23 = vpop.xlane.xlu0 %4320  ;;  %v4214_v52 = vsel %vm4182_vm7, 1.0, %v10244_v51 }
 0x778   : > { %v4395_v34 = vmul.f32 %v4321_v23, %v4203_v7  ;;  %v4119_v7 = vadd.s32 192, %v10243_v60 }
 0x77a   : > { %v4426_v28 = vadd.f32 %v4425_v33, %v4395_v34  ;;  %v4153_v57 = vadd.s32 %v9539_v18, %v4119_v7 }
 0x77b   : > { %v4324_v8 = vpop.xlane.xlu1 %4323 }
 0x77c   : > { %v4396_v25 = vmul.f32 %v4324_v8, %v4204_v42  ;;  %v4152_v8 = vadd.s32 %v9539_v18, %v4118_v27  ;;  %vm4185_vm12 = vcmp.lt.s32.totalorder %v4153_v57, 512 }
 0x77d   : > { %v4217_v13 = vsel %vm4185_vm12, 1.0, %v10244_v51 }
 0x77e   : > { %v4427_v39 = vadd.f32 %v4426_v28, %v4396_v25  ;;  %v4154_v25 = vadd.s32 %v9539_v18, %v4120_v30  ;;  %vm4184_vm13 = vcmp.lt.s32.totalorder %v4152_v8, 512 }
 0x77f   : > { %v4327_v53 = vpop.xlane.xlu0 %4326 }
 0x780   : > { %v4397_v22 = vmul.f32 %v4327_v53, %v4205_v45  ;;  %v4121_v53 = vadd.s32 208, %v10243_v60  ;;  %vm4186_vm14 = vcmp.lt.s32.totalorder %v4154_v25, 512 }
 0x781   : > { %v4218_v3 = vsel %vm4186_vm14, 1.0, %v10244_v51 }
 0x783   : > { %v4330_v24 = vpop.xlane.xlu1 %4329 }
 0x784   : > { %v4398_v58 = vmul.f32 %v4330_v24, %v4206_v10 }
 0x787   : > { %v4333_v48 = vpop.xlane.xlu0 %4332 }
 0x788   : > { %v4399_v38 = vmul.f32 %v4333_v48, %v4207_v4  ;;  %v4123_v4 = vadd.s32 224, %v10243_v60 }
 0x78b   : > { %v4336_v11 = vpop.xlane.xlu1 %4335 }
 0x78c   : > { %v4400_v15 = vmul.f32 %v4336_v11, %v4208_v59  ;;  %v4156_v59 = vadd.s32 %v9539_v18, %v4122_v26  ;;  %v4124_v11 = vadd.s32 232, %v10243_v60 }
 0x78e   : > { %vm4188_vm2 = vcmp.lt.s32.totalorder %v4156_v59, 512 }
 0x78f   : > { %v4339_v20 = vpop.xlane.xlu0 %4338  ;;  %v4220_v7 = vsel %vm4188_vm2, 1.0, %v10244_v51 }
 0x790   : > { %v4401_v19 = vmul.f32 %v4339_v20, %v4209_v29 }
 0x793   : > { %v4342_v54 = vpop.xlane.xlu1 %4341 }
 0x794   : > { %v5557_v62 = vpop.f32.mrb[124].mxu0  ;;  %v4402_v12 = vmul.f32 %v4342_v54, %v4210_v1  ;;  %v4158_v54 = vadd.s32 %v9539_v18, %v4124_v11 }
 0x795   : > { %v4640_v31 = vadd.f32 %v5557_v62, %v9570_v6  ;;  %v4634_v43 = vpop.f32.mrb[125].mxu0 }
 0x796   : > { %v4635_v61 = vadd.f32 %v9570_v6, %v4634_v43  ;;  %vm4190_vm15 = vcmp.lt.s32.totalorder %v4158_v54, 512 }
 0x797   : > { %4794 = vst [vmem:[%s9583_s30 + $0x8] sm:$0xff] %v4640_v31  ;;  %v4147_v31 = vadd.s32 %v9539_v18, %v4113_v56  ;;  %v4345_v2 = vpop.xlane.xlu0 %4344 }
 0x798   : > { %4793 = vst [vmem:[%s9583_s30] sm:$0xff] %v4635_v61  ;;  %v4428_v61 = vadd.f32 %v4427_v39, %v4397_v22  ;;  %v4216_v39 = vsel %vm4184_vm13, 1.0, %v10244_v51 }
 0x799   : > { %vm4179_vm8 = vcmp.lt.s32.totalorder %v4147_v31, 512 }
 0x79a   : > { %v4429_v35 = vadd.f32 %v4428_v61, %v4398_v58  ;;  %v4211_v41 = vsel %vm4179_vm8, 1.0, %v10244_v51 }
 0x79b   : > { %v4348_v55 = vpop.xlane.xlu1 %4347  ;;  %v4403_v42 = vmul.f32 %v4345_v2, %v4211_v41 }
 0x79c   : > { %v5560_v14 = vpop.f32.mrb[126].mxu0  ;;  %v4430_v37 = vadd.f32 %v4429_v35, %v4399_v38  ;;  %v4404_v45 = vmul.f32 %v4348_v55, %v4212_v5  ;;  %v4157_v38 = vadd.s32 %v9539_v18, %v4123_v4 }
 0x79d   : > { %v4650_v17 = vadd.f32 %v5560_v14, %v9570_v6  ;;  %v4644_v47 = vpop.f32.mrb[127].mxu0 }
 0x79e   : > { %v4645_v50 = vadd.f32 %v9570_v6, %v4644_v47  ;;  %v4431_v23 = vadd.f32 %v4430_v37, %v4400_v15  ;;  %vm4189_vm11 = vcmp.lt.s32.totalorder %v4157_v38, 512 }
 0x79f   : > { %4796 = vst [vmem:[%s9583_s30 + $0x18] sm:$0xff] %v4650_v17  ;;  %v4151_v17 = vadd.s32 %v9539_v18, %v4117_v21  ;;  %v4351_v34 = vpop.xlane.xlu0 %4350 }
 0x7a0   : > { %4795 = vst [vmem:[%s9583_s30 + $0x10] sm:$0xff] %v4645_v50  ;;  %v4432_v50 = vadd.f32 %v4431_v23, %v4401_v19  ;;  %v4405_v10 = vmul.f32 %v4351_v34, %v4213_v36 }
 0x7a1   : > { %vm4183_vm9 = vcmp.lt.s32.totalorder %v4151_v17, 512 }
 0x7a2   : > { %v4433_v32 = vadd.f32 %v4432_v50, %v4402_v12  ;;  %v4215_v28 = vsel %vm4183_vm9, 1.0, %v10244_v51 }
 0x7a3   : > { %v4354_v33 = vpop.xlane.xlu1 %4353 }
 0x7a4   : > { %v5563_v49 = vpop.f32.mrb[128].mxu0  ;;  %v4434_v56 = vadd.f32 %v4433_v32, %v4403_v42  ;;  %v4406_v46 = vmul.f32 %v4354_v33, %v4214_v52 }
 0x7a5   : > { %v4660_v62 = vadd.f32 %v5563_v49, %v9570_v6  ;;  %v4654_v0 = vpop.f32.mrb[129].mxu0 }
 0x7a6   : > { %v4655_v43 = vadd.f32 %v9570_v6, %v4654_v0  ;;  %v4435_v48 = vadd.f32 %v4434_v56, %v4404_v45  ;;  %v4155_v0 = vadd.s32 %v9539_v18, %v4121_v53 }
 0x7a7   : > { %4798 = vst [vmem:[%s9583_s30 + $0x28] sm:$0xff] %v4660_v62  ;;  %v4357_v22 = vpop.xlane.xlu0 %4356 }
 0x7a8   : > { %4797 = vst [vmem:[%s9583_s30 + $0x20] sm:$0xff] %v4655_v43  ;;  %v4436_v31 = vadd.f32 %v4435_v48, %v4405_v10  ;;  %v4407_v43 = vmul.f32 %v4357_v22, %v4215_v28  ;;  %vm4187_vm10 = vcmp.lt.s32.totalorder %v4155_v0, 512 }
 0x7a9   : > { %v4219_v37 = vsel %vm4187_vm10, 1.0, %v10244_v51 }
 0x7aa   : > { %v4437_v29 = vadd.f32 %v4436_v31, %v4406_v46 }
 0x7ab   : > { %v4360_v58 = vpop.xlane.xlu1 %4359 }
 0x7ac   : > { %v5566_v16 = vpop.f32.mrb[130].mxu0  ;;  %v4408_v20 = vmul.f32 %v4360_v58, %v4216_v39  ;;  %v4438_v15 = vadd.f32 %v4437_v29, %v4407_v43 }
 0x7ad   : > { %v4670_v40 = vadd.f32 %v5566_v16, %v9570_v6  ;;  %v4664_v14 = vpop.f32.mrb[131].mxu0  ;;  %v4159_v16 = vadd.s32 %v9539_v18, %v4125_v44 }
 0x7ae   : > { %v4665_v47 = vadd.f32 %v9570_v6, %v4664_v14  ;;  %v4439_v41 = vadd.f32 %v4438_v15, %v4408_v20  ;;  %v4126_v14 = vadd.s32 248, %v10243_v60  ;;  %v4222_v60 = vsel %vm4190_vm15, 1.0, %v10244_v51 }
 0x7af   : > { %4800 = vst [vmem:[%s9583_s30 + $0x38] sm:$0xff] %v4670_v40  ;;  %v4363_v61 = vpop.xlane.xlu0 %4362  ;;  %vm4191_vm0 = vcmp.lt.s32.totalorder %v4159_v16, 512 }
 0x7b0   : > { %4799 = vst [vmem:[%s9583_s30 + $0x30] sm:$0xff] %v4665_v47  ;;  %v4409_v21 = vmul.f32 %v4363_v61, %v4217_v13  ;;  %v4221_v47 = vsel %vm4189_vm11, 1.0, %v10244_v51  ;;  %v4160_v50 = vadd.s32 %v9539_v18, %v4126_v14  ;;  %v4223_v45 = vsel %vm4191_vm0, 1.0, %v10244_v51 }
 0x7b2   : > { %v4440_v12 = vadd.f32 %v4439_v41, %v4409_v21  ;;  %vm4192_vm4 = vcmp.lt.s32.totalorder %v4160_v50, 512 }
 0x7b3   : > { %v4366_v35 = vpop.xlane.xlu1 %4365  ;;  %v4224_v10 = vsel %vm4192_vm4, 1.0, %v10244_v51 }
 0x7b4   : > { %v5569_v24 = vpop.f32.mrb[132].mxu0  ;;  %v4410_v2 = vmul.f32 %v4366_v35, %v4218_v3 }
 0x7b5   : > { %v4680_v9 = vadd.f32 %v5569_v24, %v9570_v6  ;;  %v4674_v49 = vpop.f32.mrb[133].mxu0 }
 0x7b6   : > { %v4675_v62 = vadd.f32 %v9570_v6, %v4674_v49  ;;  %v4441_v55 = vadd.f32 %v4440_v12, %v4410_v2 }
 0x7b7   : > { %4802 = vst [vmem:[%s9583_s30 + $0x48] sm:$0xff] %v4680_v9  ;;  %v4369_v19 = vpop.xlane.xlu0 %4368 }
 0x7b8   : > { %4801 = vst [vmem:[%s9583_s30 + $0x40] sm:$0xff] %v4675_v62  ;;  %v4411_v17 = vmul.f32 %v4369_v19, %v4219_v37 }
 0x7ba   : > { %v4442_v8 = vadd.f32 %v4441_v55, %v4411_v17 }
 0x7bb   : > { %v4372_v23 = vpop.xlane.xlu1 %4371 }
 0x7bc   : > { %v5572_v1 = vpop.f32.mrb[134].mxu0  ;;  %v4412_v30 = vmul.f32 %v4372_v23, %v4220_v7 }
 0x7bd   : > { %v4690_v63 = vadd.f32 %v5572_v1, %v9570_v6  ;;  %v4684_v27 = vpop.f32.mrb[135].mxu0 }
 0x7be   : > { %v4685_v40 = vadd.f32 %v9570_v6, %v4684_v27  ;;  %v4443_v53 = vadd.f32 %v4442_v8, %v4412_v30 }
 0x7bf   : > { %4804 = vst [vmem:[%s9583_s30 + $0x58] sm:$0xff] %v4690_v63  ;;  %v4375_v5 = vpop.xlane.xlu0 %4374 }
 0x7c0   : > { %4803 = vst [vmem:[%s9583_s30 + $0x50] sm:$0xff] %v4685_v40  ;;  %v4413_v36 = vmul.f32 %v4375_v5, %v4221_v47 }
 0x7c2   : > { %v4444_v25 = vadd.f32 %v4443_v53, %v4413_v36 }
 0x7c3   : > { %v4378_v42 = vpop.xlane.xlu1 %4377 }
 0x7c4   : > { %v5575_v34 = vpop.f32.mrb[136].mxu0  ;;  %v4414_v52 = vmul.f32 %v4378_v42, %v4222_v60 }
 0x7c5   : > { %v4700_v57 = vadd.f32 %v5575_v34, %v9570_v6  ;;  %v4694_v32 = vpop.f32.mrb[137].mxu0 }
 0x7c6   : > { %v4695_v33 = vadd.f32 %v9570_v6, %v4694_v32  ;;  %v4445_v24 = vadd.f32 %v4444_v25, %v4414_v52 }
 0x7c7   : > { %4806 = vst [vmem:[%s9583_s30 + $0x68] sm:$0xff] %v4700_v57  ;;  %v4381_v18 = vpop.xlane.xlu0 %4380 }
 0x7c8   : > { %4805 = vst [vmem:[%s9583_s30 + $0x60] sm:$0xff] %v4695_v33  ;;  %v4415_v56 = vmul.f32 %v4381_v18, %v4223_v45 }
 0x7ca   : > { %v4446_v28 = vadd.f32 %v4445_v24, %v4415_v56 }
 0x7cb   : > { %v4384_v26 = vpop.xlane.xlu1 %4383 }
 0x7cc   : > { %v4416_v22 = vmul.f32 %v4384_v26, %v4224_v10  ;;  %v5578_v9 = vpop.f32.mrb[138].mxu0 }
 0x7cd   : > { %v4710_v49 = vadd.f32 %v5578_v9, %v9570_v6  ;;  %v4704_v4 = vpop.f32.mrb[139].mxu0 }
 0x7ce   : > { %v4447_v48 = vadd.f32 %v4446_v28, %v4416_v22  ;;  %v4705_v46 = vadd.f32 %v9570_v6, %v4704_v4 }
 0x7cf   : > { %4808 = vst [vmem:[%s9583_s30 + $0x78] sm:$0xff] %v4710_v49 }
 0x7d0   : > { %v4448_v62 = vrot.slane %v4447_v48, 4  ;;  %4807 = vst [vmem:[%s9583_s30 + $0x70] sm:$0xff] %v4705_v46 }
 0x7d2   : > { %v4449_v0 = vadd.f32 %v4448_v62, %v4447_v48 }
 0x7d4   : > { %v4450_v51 = vrot.slane %v4449_v0, 2  ;;  %v5581_v39 = vpop.f32.mrb[140].mxu0 }
 0x7d5   : > { %v4720_v58 = vadd.f32 %v5581_v39, %v9570_v6  ;;  %v4714_v31 = vpop.f32.mrb[141].mxu0 }
 0x7d6   : > { %v4451_v43 = vadd.f32 %v4450_v51, %v4449_v0  ;;  %v4715_v59 = vadd.f32 %v9570_v6, %v4714_v31 }
 0x7d7   : > { %4810 = vst [vmem:[%s9583_s30 + $0x88] sm:$0xff] %v4720_v58 }
 0x7d8   : > { %v4452_v11 = vrot.slane %v4451_v43, 1  ;;  %4809 = vst [vmem:[%s9583_s30 + $0x80] sm:$0xff] %v4715_v59 }
 0x7da   : > { %v4453_v13 = vadd.f32 %v4452_v11, %v4451_v43 }
 0x7dc   : > { %4456 = vst.msk [vmem:[%s432_s23] sm:$0xff] %vm4455_vm1, %v4453_v13  ;;  %v5584_v61 = vpop.f32.mrb[142].mxu0  ;;  %s5965_s23 = scalar_lea.vmem %s5964_s15, 8192 }
 0x7dd   : > { %v4730_v38 = vadd.f32 %v5584_v61, %v9570_v6  ;;  %v4724_v44 = vpop.f32.mrb[143].mxu0  ;;  %p5967_p2 = scmp.lt.s32.totalorder %s5965_s23, %s5959_s17 }
 0x7de   : > { %v4725_v29 = vadd.f32 %v9570_v6, %v4724_v44 }
 0x7df   : > { %4812 = vst [vmem:[%s9583_s30 + $0x98] sm:$0xff] %v4730_v38  ;;  %p5968_p3 = por %p5967_p2, %p5966_p1 }
 0x7e0   : > { %4811 = vst [vmem:[%s9583_s30 + $0x90] sm:$0xff] %v4725_v29 }
 0x7e1   : > { %p5969_p4 = pnand %p5968_p3, %p5962_p0 }
 0x7e4   : > { %v5587_v20 = vpop.f32.mrb[144].mxu0 }
 0x7e5   : > { %v4740_v3 = vadd.f32 %v5587_v20, %v9570_v6  ;;  %v4734_v35 = vpop.f32.mrb[145].mxu0 }
 0x7e6   : > { %v4735_v15 = vadd.f32 %v9570_v6, %v4734_v35 }
 0x7e7   : > { %4814 = vst [vmem:[%s9583_s30 + $0xa8] sm:$0xff] %v4740_v3 }
 0x7e8   : > { %4813 = vst [vmem:[%s9583_s30 + $0xa0] sm:$0xff] %v4735_v15 }
 0x7ec   : > { %v5590_v21 = vpop.f32.mrb[146].mxu0 }
 0x7ed   : > { %v4750_v1 = vadd.f32 %v5590_v21, %v9570_v6  ;;  %v4744_v54 = vpop.f32.mrb[147].mxu0 }
 0x7ee   : > { %v4745_v37 = vadd.f32 %v9570_v6, %v4744_v54 }
 0x7ef   : > { %4816 = vst [vmem:[%s9583_s30 + $0xb8] sm:$0xff] %v4750_v1 }
 0x7f0   : > { %4815 = vst [vmem:[%s9583_s30 + $0xb0] sm:$0xff] %v4745_v37 }
 0x7f4   : > { %v5593_v19 = vpop.f32.mrb[148].mxu0 }
 0x7f5   : > { %v4760_v63 = vadd.f32 %v5593_v19, %v9570_v6  ;;  %v4754_v27 = vpop.f32.mrb[149].mxu0 }
 0x7f6   : > { %v4755_v16 = vadd.f32 %v9570_v6, %v4754_v27 }
 0x7f7   : > { %4818 = vst [vmem:[%s9583_s30 + $0xc8] sm:$0xff] %v4760_v63 }
 0x7f8   : > { %4817 = vst [vmem:[%s9583_s30 + $0xc0] sm:$0xff] %v4755_v16 }
 0x7fc   : > { %v5596_v41 = vpop.f32.mrb[150].mxu0 }
 0x7fd   : > { %v4770_v2 = vadd.f32 %v5596_v41, %v9570_v6  ;;  %v4764_v40 = vpop.f32.mrb[151].mxu0 }
 0x7fe   : > { %v4765_v14 = vadd.f32 %v9570_v6, %v4764_v40 }
 0x7ff   : > { %4820 = vst [vmem:[%s9583_s30 + $0xd8] sm:$0xff] %v4770_v2 }
 0x800   : > { %4819 = vst [vmem:[%s9583_s30 + $0xd0] sm:$0xff] %v4765_v14 }
 0x804   : > { %v5599_v7 = vpop.f32.mrb[152].mxu0 }
 0x805   : > { %v4780_v23 = vadd.f32 %v5599_v7, %v9570_v6  ;;  %v4774_v12 = vpop.f32.mrb[153].mxu0 }
 0x806   : > { %v4775_v17 = vadd.f32 %v9570_v6, %v4774_v12 }
 0x807   : > { %4822 = vst [vmem:[%s9583_s30 + $0xe8] sm:$0xff] %v4780_v23 }
 0x808   : > { %4821 = vst [vmem:[%s9583_s30 + $0xe0] sm:$0xff] %v4775_v17 }
 0x80c   : > { %v5602_v47 = vpop.f32.mrb[154].mxu0 }
 0x80d   : > { %v4790_v5 = vadd.f32 %v5602_v47, %v9570_v6  ;;  %v4784_v55 = vpop.f32.mrb[155].mxu0 }
 0x80e   : > { %v4785_v30 = vadd.f32 %v9570_v6, %v4784_v55 }
 0x80f   : > { %4824 = vst [vmem:[%s9583_s30 + $0xf8] sm:$0xff] %v4790_v5 }
 0x810   : > { %4823 = vst [vmem:[%s9583_s30 + $0xf0] sm:$0xff] %v4785_v30 }
 0x811   : > { %5972 = shalt.err (!%p5969_p4)
}
 0x812   : > { %s5973_s29 = scalar_lea.hbm %s9724_s26, 4096  ;;  %s5977_s19 = scalar_lea.hbm %s9784_s10, 8192 }
 0x813   : > { %p5974_p7 = scmp.ne.s32.totalorder %s9724_s26, %s5973_s29  ;;  %p5978_p10 = scmp.lt.u32.totalorder %s9724_s26, %s9784_s10 }
 0x814   : > { %p5979_p11 = scmp.lt.u32.totalorder %s5977_s19, %s5973_s29  ;;  %p5981_p13 = scmp.lt.u32.totalorder %s5973_s29, %s9724_s26 }
 0x815   : > { %p5975_p8 = pnand %p5974_p7, %p6132_p5 }
 0x816   : > { %p5980_p12 = por %p5979_p11, %p5978_p10 }
 0x817   : > { %p5976_p9 = pneg %p5975_p8 }
 0x818   : > { %p5982_p0 = por %p5981_p13, %p5980_p12 }
 0x81a   : > { %p5983_p1 = pnand %p5982_p0, %p5976_p9 }
 0x81c   : > { %5986 = shalt.err (!%p5983_p1)
}
 0x81d   : > { %s6027_s17 = smov 128   ;;  %s6028_s15 = smov 8  }
 0x81e   : > { %5851 = dma.vmem_to_hbm [thread:$0]  (%p6132_p5), %s9726_s18, 4096, %s9724_s26, %s9733_s25, %s6027_s17, %s6027_s17, %s6028_s15  }
 0x81f PF: > { %p5857_p2 = scmp.ge.s32.totalorder %s6021_s24, 2  ;;  %s4902_s23 = sand.u32 1, %s6009_s21  }
 0x820   : > { %s4903_s29 = scalar_lea.sflag [#allocation3], %s4902_s23 }
 0x821   : > { %p5854_p3 = pnand %p5857_p2, %p6136_p6 }
 0x823   : > { %6004 = dma.done.wait (!%p5854_p3), %s4903_s29, 4096  }
 0x824   : > { %6006 = vsyncadd (!%p5854_p3), %s4903_s29, 4294963200  ;;  %s10245_s30 = sld [smem:[#allocation5_spill]]  ;;  %s10246_s23 = sld [smem:[#allocation6_spill]] }
 0x825   : > { %p23_p4 = scmp.ge.s32.totalorder %s6119_s27, 4   ;;  %s10247_s21 = smov %s6013_s22 }
 0x826   : > { %s10249_s24 = smov %s6119_s27 }
 0x827   :  { %25 = sbr.rel (!%p23_p4) target bundleno = 3 (0x3), region = 119 }
 0x82a   : > { %s10248_s22 = smov %s10245_s30 }
 0x82e   :  { %4923 = vsyncpa [#allocation3], 1 }
 0x82f   :  { %4925 = vsyncpa [#allocation3 + $0x1], 1 }

</bundles_post_ra>
